<compile_context>
chip_gen: v6e
topology: v6e:2x2x1
jax: 0.10.0
libtpu: 0.0.40
codegen_flags: <defaults>
</compile_context>

<pallas_src>
import functools

import jax
import jax.numpy as jnp
import numpy as np
from jax import lax
from jax.experimental import pallas as pl
from jax.experimental.pallas import tpu as pltpu


def _round_up(x, m):
    return ((x + m - 1) // m) * m


# ----------------------------- Pallas kernel --------------------------------
def _bilstm_chunk_kernel(gxf_ref, gxb_ref, mf_ref, mb_ref,
                         h0f_ref, c0f_ref, h0b_ref, c0b_ref,
                         whhf_ref, whhb_ref,
                         outf_ref, outb_ref,
                         hf_sc, cf_sc, hb_sc, cb_sc,
                         *, chunk, hidden):
    """Fused bidirectional LSTM recurrence; grid axis = time chunks (sequential).

    gxf/gxb: precomputed x @ W_ih + b for fwd / bwd direction, (chunk, Bp, 4H).
    mf/mb:   precomputed validity mask, (chunk, Bp, 1) in {0., 1.}.
    The backward direction's blocks arrive via a reversed chunk index_map, and
    inside the chunk it walks local index (chunk-1-i), i.e. real time descending.
    """
    H = hidden

    @pl.when(pl.program_id(0) == 0)
    def _():
        hf_sc[...] = h0f_ref[...]
        cf_sc[...] = c0f_ref[...]
        hb_sc[...] = h0b_ref[...]
        cb_sc[...] = c0b_ref[...]

    whh_f = whhf_ref[...]
    whh_b = whhb_ref[...]

    def cell(gates, c_old):
        i_g = jax.nn.sigmoid(gates[:, 0 * H:1 * H])
        f_g = jax.nn.sigmoid(gates[:, 1 * H:2 * H])
        g_g = jnp.tanh(gates[:, 2 * H:3 * H])
        o_g = jax.nn.sigmoid(gates[:, 3 * H:4 * H])
        c_new = f_g * c_old + i_g * g_g
        h_new = o_g * jnp.tanh(c_new)
        return h_new, c_new

    # Static unroll over the chunk: one long basic block so MXU (h @ W_hh),
    # EUP (sigmoid/tanh) and VPU work from neighboring steps can interleave.
    for i in range(chunk):
        # ---------------- forward direction: local time i ----------------
        hf_old = hf_sc[...]
        cf_old = cf_sc[...]
        gates_f = (jnp.dot(hf_old, whh_f, preferred_element_type=jnp.float32)
                   + gxf_ref[i])
        hf_new, cf_new = cell(gates_f, cf_old)
        m_f = mf_ref[i]                       # (Bp, 1)
        keep_f = m_f > 0.5
        outf_ref[i] = m_f * hf_new            # zero at padded positions
        hf_sc[...] = jnp.where(keep_f, hf_new, hf_old)
        cf_sc[...] = jnp.where(keep_f, cf_new, cf_old)

        # -------------- backward direction: local time chunk-1-i ----------
        j = chunk - 1 - i
        hb_old = hb_sc[...]
        cb_old = cb_sc[...]
        gates_b = (jnp.dot(hb_old, whh_b, preferred_element_type=jnp.float32)
                   + gxb_ref[j])
        hb_new, cb_new = cell(gates_b, cb_old)
        m_b = mb_ref[j]
        keep_b = m_b > 0.5
        outb_ref[j] = m_b * hb_new
        hb_sc[...] = jnp.where(keep_b, hb_new, hb_old)
        cb_sc[...] = jnp.where(keep_b, cb_new, cb_old)


def _run_bilstm_layer(gxf, gxb, mask, h0f, c0f, h0b, c0b, whh_f, whh_b, chunk):
    """One bidirectional layer. gx*: (Tp, Bp, 4H); mask: (Tp, Bp, 1)."""
    Tp, Bp, G = gxf.shape
    H = G // 4
    n_chunks = Tp // chunk

    kern = functools.partial(_bilstm_chunk_kernel, chunk=chunk, hidden=H)

    fwd3 = lambda c: (c, 0, 0)
    bwd3 = lambda c: (n_chunks - 1 - c, 0, 0)
    const2 = lambda c: (0, 0)

    grid_spec = pltpu.PrefetchScalarGridSpec(
        num_scalar_prefetch=0,
        grid=(n_chunks,),
        in_specs=[
            pl.BlockSpec((chunk, Bp, 4 * H), fwd3),   # gates_x fwd
            pl.BlockSpec((chunk, Bp, 4 * H), bwd3),   # gates_x bwd (reversed chunks)
            pl.BlockSpec((chunk, Bp, 1), fwd3),       # mask (fwd order)
            pl.BlockSpec((chunk, Bp, 1), bwd3),       # mask (bwd order)
            pl.BlockSpec((Bp, H), const2),            # h0 fwd
            pl.BlockSpec((Bp, H), const2),            # c0 fwd
            pl.BlockSpec((Bp, H), const2),            # h0 bwd
            pl.BlockSpec((Bp, H), const2),            # c0 bwd
            pl.BlockSpec((H, 4 * H), const2),         # W_hh fwd (transposed)
            pl.BlockSpec((H, 4 * H), const2),         # W_hh bwd (transposed)
        ],
        out_specs=[
            pl.BlockSpec((chunk, Bp, H), fwd3),       # fwd hidden states
            pl.BlockSpec((chunk, Bp, H), bwd3),       # bwd hidden states
        ],
        scratch_shapes=[pltpu.VMEM((Bp, H), jnp.float32)] * 4,
    )
    return pl.pallas_call(
        kern,
        out_shape=(jax.ShapeDtypeStruct((Tp, Bp, H), jnp.float32),
                   jax.ShapeDtypeStruct((Tp, Bp, H), jnp.float32)),
        grid_spec=grid_spec,
        compiler_params=pltpu.CompilerParams(
            dimension_semantics=("arbitrary",)),      # time chunks are sequential
    )(gxf, gxb, mask, mask, h0f, c0f, h0b, c0b, whh_f, whh_b)


# ------------------------------ Wrapper --------------------------------------
def lstm_encoder_forward(inputs, lengths, params, layers_num, hidden_size, *,
                         chunk=8):
    """inputs: (B, T, input_size) batch-first; lengths: (B,) int."""
    B, T, _ = inputs.shape
    H = hidden_size
    Bp = max(8, _round_up(B, 8))           # pad batch to sublane width
    Tp = _round_up(T, chunk)               # pad time to chunk multiple

    x = jnp.zeros((Bp, Tp, inputs.shape[2]), jnp.float32)
    x = x.at[:B, :T].set(inputs.astype(jnp.float32))
    lengths_p = jnp.zeros((Bp,), jnp.int32).at[:B].set(lengths.astype(jnp.int32))

    # Precomputed validity mask (Tp, Bp, 1): 1.0 where t < length (padded rows
    # have length 0, padded timesteps are >= every length).
    mask = (jnp.arange(Tp, dtype=jnp.int32)[:, None]
            < lengths_p[None, :]).astype(jnp.float32)[..., None]

    init_state = params["init_state"]                     # (4L, 1, H)
    c0_all = init_state[: 2 * layers_num]                 # cell_init
    h0_all = init_state[2 * layers_num:]                  # hidden_init

    out_f = out_b = None
    for l in range(layers_num):
        # Stack both directions' input weights -> one large matmul per layer.
        w_cat = jnp.concatenate(
            [params[f"w_ih_l{l}_d0"], params[f"w_ih_l{l}_d1"]], axis=1)   # (Din, 8H)
        b_cat = jnp.concatenate(
            [params[f"b_l{l}_d0"], params[f"b_l{l}_d1"]], axis=1)         # (1, 8H)

        if l == 0:
            # Batch-first in, time-major out: transpose folded into the matmul.
            gx = jnp.einsum("btd,dg->tbg", x, w_cat) + b_cat              # (Tp,Bp,8H)
        else:
            # Split-weight form: consumes fwd/bwd halves directly, no concat pass.
            gx = (jnp.einsum("tbh,hg->tbg", out_f, w_cat[:H])
                  + jnp.einsum("tbh,hg->tbg", out_b, w_cat[H:])
                  + b_cat)
        gxf = gx[..., : 4 * H]
        gxb = gx[..., 4 * H:]

        h0f = jnp.broadcast_to(h0_all[2 * l + 0], (Bp, H))
        c0f = jnp.broadcast_to(c0_all[2 * l + 0], (Bp, H))
        h0b = jnp.broadcast_to(h0_all[2 * l + 1], (Bp, H))
        c0b = jnp.broadcast_to(c0_all[2 * l + 1], (Bp, H))

        out_f, out_b = _run_bilstm_layer(
            gxf, gxb, mask, h0f, c0f, h0b, c0b,
            params[f"w_hh_l{l}_d0"], params[f"w_hh_l{l}_d1"], chunk)

    out = jnp.concatenate([out_f, out_b], axis=-1)        # (Tp, Bp, 2H)
    out = jnp.transpose(out, (1, 0, 2))[:B, :T]           # (B, T, 2H)
    # dropout: nn.Dropout in eval mode -> identity.
    return out


# -------------------------- Pure-JAX reference --------------------------------
def _ref_direction(x_tbd, h0, c0, wih, whh, b, lengths, reverse):
    T, _, _ = x_tbd.shape
    H = h0.shape[1]

    def step(carry, t):
        h, c = carry
        tt = (T - 1 - t) if reverse else t
        gates = x_tbd[tt] @ wih + h @ whh + b
        i = jax.nn.sigmoid(gates[:, :H])
        f = jax.nn.sigmoid(gates[:, H:2 * H])
        g = jnp.tanh(gates[:, 2 * H:3 * H])
        o = jax.nn.sigmoid(gates[:, 3 * H:])
        c_new = f * c + i * g
        h_new = o * jnp.tanh(c_new)
        mask = (tt < lengths)[:, None]
        return ((jnp.where(mask, h_new, h), jnp.where(mask, c_new, c)),
                jnp.where(mask, h_new, 0.0))

    _, outs = lax.scan(step, (h0, c0), jnp.arange(T))
    return outs[::-1] if reverse else outs


def lstm_encoder_reference(inputs, lengths, params, layers_num, hidden_size):
    B = inputs.shape[0]
    init_state = jnp.repeat(params["init_state"], B, axis=1)
    c0_all = init_state[: 2 * layers_num]
    h0_all = init_state[2 * layers_num:]
    x = jnp.transpose(inputs, (1, 0, 2)).astype(jnp.float32)
    for l in range(layers_num):
        outs = []
        for d, reverse in enumerate((False, True)):
            outs.append(_ref_direction(
                x, h0_all[2 * l + d], c0_all[2 * l + d],
                params[f"w_ih_l{l}_d{d}"], params[f"w_hh_l{l}_d{d}"],
                params[f"b_l{l}_d{d}"][0], lengths, reverse))
        x = jnp.concatenate(outs, axis=-1)
    return jnp.transpose(x, (1, 0, 2))


# ------------------------------ Params ---------------------------------------
def make_params(key, input_size, hidden_size, layers_num):
    params = {}
    k = 1.0 / np.sqrt(hidden_size)
    key, sub = jax.random.split(key)
    # PyTorch inits this param to zeros; use small deterministic values so the
    # init-state path is actually exercised.
    params["init_state"] = 0.1 * jax.random.normal(
        sub, (2 * 2 * layers_num, 1, hidden_size), jnp.float32)
    for l in range(layers_num):
        din = input_size if l == 0 else 2 * hidden_size
        for d in range(2):
            key, k1, k2, k3 = jax.random.split(key, 4)
            params[f"w_ih_l{l}_d{d}"] = jax.random.uniform(
                k1, (din, 4 * hidden_size), jnp.float32, -k, k)
            params[f"w_hh_l{l}_d{d}"] = jax.random.uniform(
                k2, (hidden_size, 4 * hidden_size), jnp.float32, -k, k)
            params[f"b_l{l}_d{d}"] = jax.random.uniform(
                k3, (1, 4 * hidden_size), jnp.float32, -k, k)
    return params


# ------------------------------- Main -----------------------------------------
if __name__ == "__main__":
    B, T, input_size, hidden_size, layers_num = 2, 12, 16, 32, 2
    dropout = 0.1  # identity in eval mode

    key = jax.random.PRNGKey(0)
    key, kx = jax.random.split(key)
    inputs = jax.random.normal(kx, (B, T, input_size), jnp.float32)
    lengths = jnp.array([10, 6], dtype=jnp.int32)
    params = make_params(key, input_size, hidden_size, layers_num)

    out = lstm_encoder_forward(inputs, lengths, params, layers_num, hidden_size,
                               chunk=8)
    # pad_packed_sequence trims to max(lengths) (concrete at test time).
    t_out = int(np.asarray(lengths).max())
    out = out[:, :t_out]
    out = jax.block_until_ready(out)

    ref = lstm_encoder_reference(inputs, lengths, params, layers_num, hidden_size)
    ref = ref[:, :t_out]
    np.testing.assert_allclose(np.asarray(out), np.asarray(ref),
                               rtol=1e-4, atol=1e-4)

    print("KERNEL_OK")
</pallas_src>

<mosaic_0001>
module attributes {stable_mosaic.version = 11 : i64} {
  func.func @_bilstm_chunk_kernel(%arg0: i32, %arg1: memref<8x8x128xf32, #tpu.memory_space<vmem>>, %arg2: memref<8x8x128xf32, #tpu.memory_space<vmem>>, %arg3: memref<8x8x1xf32, #tpu.memory_space<vmem>>, %arg4: memref<8x8x1xf32, #tpu.memory_space<vmem>>, %arg5: memref<8x32xf32, #tpu.memory_space<vmem>>, %arg6: memref<8x32xf32, #tpu.memory_space<vmem>>, %arg7: memref<8x32xf32, #tpu.memory_space<vmem>>, %arg8: memref<8x32xf32, #tpu.memory_space<vmem>>, %arg9: memref<32x128xf32, #tpu.memory_space<vmem>>, %arg10: memref<32x128xf32, #tpu.memory_space<vmem>>, %arg11: memref<8x8x32xf32, #tpu.memory_space<vmem>>, %arg12: memref<8x8x32xf32, #tpu.memory_space<vmem>>, %arg13: memref<8x32xf32, #tpu.memory_space<vmem>>, %arg14: memref<8x32xf32, #tpu.memory_space<vmem>>, %arg15: memref<8x32xf32, #tpu.memory_space<vmem>>, %arg16: memref<8x32xf32, #tpu.memory_space<vmem>>) attributes {dimension_semantics = [#tpu.dimension_semantics<arbitrary>], iteration_bounds = array<i64: 2>, scalar_prefetch = 0 : i64, scratch_operands = 4 : i64, tpu.core_type = #tpu.core_type<tc>, window_params = [{transform_indices = @transform_0, window_bounds = array<i64: 8, 8, 128>}, {transform_indices = @transform_1, window_bounds = array<i64: 8, 8, 128>}, {transform_indices = @transform_2, window_bounds = array<i64: 8, 8, 1>}, {transform_indices = @transform_3, window_bounds = array<i64: 8, 8, 1>}, {pipeline_mode = #tpu.pipeline_mode<synchronous>, transform_indices = @transform_4, window_bounds = array<i64: 8, 32>}, {pipeline_mode = #tpu.pipeline_mode<synchronous>, transform_indices = @transform_5, window_bounds = array<i64: 8, 32>}, {pipeline_mode = #tpu.pipeline_mode<synchronous>, transform_indices = @transform_6, window_bounds = array<i64: 8, 32>}, {pipeline_mode = #tpu.pipeline_mode<synchronous>, transform_indices = @transform_7, window_bounds = array<i64: 8, 32>}, {pipeline_mode = #tpu.pipeline_mode<synchronous>, transform_indices = @transform_8, window_bounds = array<i64: 32, 128>}, {pipeline_mode = #tpu.pipeline_mode<synchronous>, transform_indices = @transform_9, window_bounds = array<i64: 32, 128>}, {transform_indices = @transform_10, window_bounds = array<i64: 8, 8, 32>}, {transform_indices = @transform_11, window_bounds = array<i64: 8, 8, 32>}]} {
    %c0_i32 = arith.constant 0 : i32
    %0 = arith.cmpi eq, %arg0, %c0_i32 : i32
    %1 = arith.extui %0 : i1 to i32
    %c0_i32_0 = arith.constant 0 : i32
    %2 = arith.cmpi ne, %1, %c0_i32_0 : i32
    scf.if %2 {
      %c0_348 = arith.constant 0 : index
      %c0_349 = arith.constant 0 : index
      %773 = vector.load %arg5[%c0_348, %c0_349] : memref<8x32xf32, #tpu.memory_space<vmem>>, vector<8x32xf32>
      %c0_350 = arith.constant 0 : index
      %c0_351 = arith.constant 0 : index
      %774 = vector.load %arg13[%c0_350, %c0_351] : memref<8x32xf32, #tpu.memory_space<vmem>>, vector<8x32xf32>
      tpu.vector_store %arg13[%c0_350, %c0_351], %773 {strides = array<i32>} : memref<8x32xf32, #tpu.memory_space<vmem>>, vector<8x32xf32>,
      %c0_352 = arith.constant 0 : index
      %c0_353 = arith.constant 0 : index
      %775 = vector.load %arg6[%c0_352, %c0_353] : memref<8x32xf32, #tpu.memory_space<vmem>>, vector<8x32xf32>
      %c0_354 = arith.constant 0 : index
      %c0_355 = arith.constant 0 : index
      %776 = vector.load %arg14[%c0_354, %c0_355] : memref<8x32xf32, #tpu.memory_space<vmem>>, vector<8x32xf32>
      tpu.vector_store %arg14[%c0_354, %c0_355], %775 {strides = array<i32>} : memref<8x32xf32, #tpu.memory_space<vmem>>, vector<8x32xf32>,
      %c0_356 = arith.constant 0 : index
      %c0_357 = arith.constant 0 : index
      %777 = vector.load %arg7[%c0_356, %c0_357] : memref<8x32xf32, #tpu.memory_space<vmem>>, vector<8x32xf32>
      %c0_358 = arith.constant 0 : index
      %c0_359 = arith.constant 0 : index
      %778 = vector.load %arg15[%c0_358, %c0_359] : memref<8x32xf32, #tpu.memory_space<vmem>>, vector<8x32xf32>
      tpu.vector_store %arg15[%c0_358, %c0_359], %777 {strides = array<i32>} : memref<8x32xf32, #tpu.memory_space<vmem>>, vector<8x32xf32>,
      %c0_360 = arith.constant 0 : index
      %c0_361 = arith.constant 0 : index
      %779 = vector.load %arg8[%c0_360, %c0_361] : memref<8x32xf32, #tpu.memory_space<vmem>>, vector<8x32xf32>
      %c0_362 = arith.constant 0 : index
      %c0_363 = arith.constant 0 : index
      %780 = vector.load %arg16[%c0_362, %c0_363] : memref<8x32xf32, #tpu.memory_space<vmem>>, vector<8x32xf32>
      tpu.vector_store %arg16[%c0_362, %c0_363], %779 {strides = array<i32>} : memref<8x32xf32, #tpu.memory_space<vmem>>, vector<8x32xf32>,
    } else {
    }
    %c0 = arith.constant 0 : index
    %c0_1 = arith.constant 0 : index
    %3 = vector.load %arg9[%c0, %c0_1] : memref<32x128xf32, #tpu.memory_space<vmem>>, vector<32x128xf32>
    %c0_2 = arith.constant 0 : index
    %c0_3 = arith.constant 0 : index
    %4 = vector.load %arg10[%c0_2, %c0_3] : memref<32x128xf32, #tpu.memory_space<vmem>>, vector<32x128xf32>
    %c0_4 = arith.constant 0 : index
    %c0_5 = arith.constant 0 : index
    %5 = vector.load %arg13[%c0_4, %c0_5] : memref<8x32xf32, #tpu.memory_space<vmem>>, vector<8x32xf32>
    %c0_6 = arith.constant 0 : index
    %c0_7 = arith.constant 0 : index
    %6 = vector.load %arg14[%c0_6, %c0_7] : memref<8x32xf32, #tpu.memory_space<vmem>>, vector<8x32xf32>
    %cst = arith.constant dense<0.000000e+00> : vector<8x128xf32>
    %7 = tpu.matmul %5, %3, %cst {dimension_numbers = #tpu.dot_dimension_numbers<[1], [0], [0], [1], [0, 0, 1, 1], [], []>} : vector<8x32xf32>, vector<32x128xf32>, vector<8x128xf32> -> vector<8x128xf32>
    %c0_8 = arith.constant 0 : index
    %c0_9 = arith.constant 0 : index
    %c0_10 = arith.constant 0 : index
    %8 = vector.load %arg1[%c0_8, %c0_9, %c0_10] : memref<8x8x128xf32, #tpu.memory_space<vmem>>, vector<1x8x128xf32>
    %9 = vector.shape_cast %8 : vector<1x8x128xf32> to vector<8x128xf32>
    %10 = arith.addf %7, %9 : vector<8x128xf32>
    %11 = vector.extract_strided_slice %10 {offsets = [0, 0], sizes = [8, 32], strides = [1, 1]} : vector<8x128xf32> to vector<8x32xf32>
    %12 = arith.negf %11 : vector<8x32xf32>
    %13 = math.exp %12 : vector<8x32xf32>
    %cst_11 = arith.constant 1.000000e+00 : f32
    %14 = vector.broadcast %cst_11 : f32 to vector<8x32xf32>
    %15 = arith.addf %14, %13 : vector<8x32xf32>
    %16 = arith.divf %14, %15 : vector<8x32xf32>
    %17 = vector.extract_strided_slice %10 {offsets = [0, 32], sizes = [8, 32], strides = [1, 1]} : vector<8x128xf32> to vector<8x32xf32>
    %18 = arith.negf %17 : vector<8x32xf32>
    %19 = math.exp %18 : vector<8x32xf32>
    %cst_12 = arith.constant 1.000000e+00 : f32
    %20 = vector.broadcast %cst_12 : f32 to vector<8x32xf32>
    %21 = arith.addf %20, %19 : vector<8x32xf32>
    %22 = arith.divf %20, %21 : vector<8x32xf32>
    %23 = vector.extract_strided_slice %10 {offsets = [0, 64], sizes = [8, 32], strides = [1, 1]} : vector<8x128xf32> to vector<8x32xf32>
    %24 = math.tanh %23 : vector<8x32xf32>
    %25 = vector.extract_strided_slice %10 {offsets = [0, 96], sizes = [8, 32], strides = [1, 1]} : vector<8x128xf32> to vector<8x32xf32>
    %26 = arith.negf %25 : vector<8x32xf32>
    %27 = math.exp %26 : vector<8x32xf32>
    %cst_13 = arith.constant 1.000000e+00 : f32
    %28 = vector.broadcast %cst_13 : f32 to vector<8x32xf32>
    %29 = arith.addf %28, %27 : vector<8x32xf32>
    %30 = arith.divf %28, %29 : vector<8x32xf32>
    %31 = arith.mulf %22, %6 : vector<8x32xf32>
    %32 = arith.mulf %16, %24 : vector<8x32xf32>
    %33 = arith.addf %31, %32 : vector<8x32xf32>
    %34 = math.tanh %33 : vector<8x32xf32>
    %35 = arith.mulf %30, %34 : vector<8x32xf32>
    %c0_14 = arith.constant 0 : index
    %c0_15 = arith.constant 0 : index
    %c0_16 = arith.constant 0 : index
    %36 = vector.load %arg3[%c0_14, %c0_15, %c0_16] : memref<8x8x1xf32, #tpu.memory_space<vmem>>, vector<1x8x1xf32>
    %37 = vector.shape_cast %36 : vector<1x8x1xf32> to vector<8x1xf32>
    %cst_17 = arith.constant 5.000000e-01 : f32
    %38 = vector.broadcast %cst_17 : f32 to vector<8x1xf32>
    %39 = arith.cmpf ogt, %37, %38 : vector<8x1xf32>
    %40 = vector.broadcast %37 : vector<8x1xf32> to vector<8x32xf32>
    %41 = arith.mulf %40, %35 : vector<8x32xf32>
    %c0_18 = arith.constant 0 : index
    %c0_19 = arith.constant 0 : index
    %c0_20 = arith.constant 0 : index
    %42 = vector.load %arg11[%c0_18, %c0_19, %c0_20] : memref<8x8x32xf32, #tpu.memory_space<vmem>>, vector<1x8x32xf32>
    %43 = vector.shape_cast %42 : vector<1x8x32xf32> to vector<8x32xf32>
    %44 = vector.shape_cast %41 : vector<8x32xf32> to vector<1x8x32xf32>
    tpu.vector_store %arg11[%c0_18, %c0_19, %c0_20], %44 {strides = array<i32>} : memref<8x8x32xf32, #tpu.memory_space<vmem>>, vector<1x8x32xf32>,
    %45 = vector.shape_cast %39 : vector<8x1xi1> to vector<8x1xi1>
    %46 = vector.broadcast %45 : vector<8x1xi1> to vector<8x32xi1>
    %47 = arith.select %46, %35, %5 : vector<8x32xi1>, vector<8x32xf32>
    %c0_21 = arith.constant 0 : index
    %c0_22 = arith.constant 0 : index
    %48 = vector.load %arg13[%c0_21, %c0_22] : memref<8x32xf32, #tpu.memory_space<vmem>>, vector<8x32xf32>
    tpu.vector_store %arg13[%c0_21, %c0_22], %47 {strides = array<i32>} : memref<8x32xf32, #tpu.memory_space<vmem>>, vector<8x32xf32>,
    %49 = vector.shape_cast %39 : vector<8x1xi1> to vector<8x1xi1>
    %50 = vector.broadcast %49 : vector<8x1xi1> to vector<8x32xi1>
    %51 = arith.select %50, %33, %6 : vector<8x32xi1>, vector<8x32xf32>
    %c0_23 = arith.constant 0 : index
    %c0_24 = arith.constant 0 : index
    %52 = vector.load %arg14[%c0_23, %c0_24] : memref<8x32xf32, #tpu.memory_space<vmem>>, vector<8x32xf32>
    tpu.vector_store %arg14[%c0_23, %c0_24], %51 {strides = array<i32>} : memref<8x32xf32, #tpu.memory_space<vmem>>, vector<8x32xf32>,
    %c0_25 = arith.constant 0 : index
    %c0_26 = arith.constant 0 : index
    %53 = vector.load %arg15[%c0_25, %c0_26] : memref<8x32xf32, #tpu.memory_space<vmem>>, vector<8x32xf32>
    %c0_27 = arith.constant 0 : index
    %c0_28 = arith.constant 0 : index
    %54 = vector.load %arg16[%c0_27, %c0_28] : memref<8x32xf32, #tpu.memory_space<vmem>>, vector<8x32xf32>
    %cst_29 = arith.constant dense<0.000000e+00> : vector<8x128xf32>
    %55 = tpu.matmul %53, %4, %cst_29 {dimension_numbers = #tpu.dot_dimension_numbers<[1], [0], [0], [1], [0, 0, 1, 1], [], []>} : vector<8x32xf32>, vector<32x128xf32>, vector<8x128xf32> -> vector<8x128xf32>
    %c7 = arith.constant 7 : index
    %c0_30 = arith.constant 0 : index
    %c0_31 = arith.constant 0 : index
    %56 = vector.load %arg2[%c7, %c0_30, %c0_31] : memref<8x8x128xf32, #tpu.memory_space<vmem>>, vector<1x8x128xf32>
    %57 = vector.shape_cast %56 : vector<1x8x128xf32> to vector<8x128xf32>
    %58 = arith.addf %55, %57 : vector<8x128xf32>
    %59 = vector.extract_strided_slice %58 {offsets = [0, 0], sizes = [8, 32], strides = [1, 1]} : vector<8x128xf32> to vector<8x32xf32>
    %60 = arith.negf %59 : vector<8x32xf32>
    %61 = math.exp %60 : vector<8x32xf32>
    %cst_32 = arith.constant 1.000000e+00 : f32
    %62 = vector.broadcast %cst_32 : f32 to vector<8x32xf32>
    %63 = arith.addf %62, %61 : vector<8x32xf32>
    %64 = arith.divf %62, %63 : vector<8x32xf32>
    %65 = vector.extract_strided_slice %58 {offsets = [0, 32], sizes = [8, 32], strides = [1, 1]} : vector<8x128xf32> to vector<8x32xf32>
    %66 = arith.negf %65 : vector<8x32xf32>
    %67 = math.exp %66 : vector<8x32xf32>
    %cst_33 = arith.constant 1.000000e+00 : f32
    %68 = vector.broadcast %cst_33 : f32 to vector<8x32xf32>
    %69 = arith.addf %68, %67 : vector<8x32xf32>
    %70 = arith.divf %68, %69 : vector<8x32xf32>
    %71 = vector.extract_strided_slice %58 {offsets = [0, 64], sizes = [8, 32], strides = [1, 1]} : vector<8x128xf32> to vector<8x32xf32>
    %72 = math.tanh %71 : vector<8x32xf32>
    %73 = vector.extract_strided_slice %58 {offsets = [0, 96], sizes = [8, 32], strides = [1, 1]} : vector<8x128xf32> to vector<8x32xf32>
    %74 = arith.negf %73 : vector<8x32xf32>
    %75 = math.exp %74 : vector<8x32xf32>
    %cst_34 = arith.constant 1.000000e+00 : f32
    %76 = vector.broadcast %cst_34 : f32 to vector<8x32xf32>
    %77 = arith.addf %76, %75 : vector<8x32xf32>
    %78 = arith.divf %76, %77 : vector<8x32xf32>
    %79 = arith.mulf %70, %54 : vector<8x32xf32>
    %80 = arith.mulf %64, %72 : vector<8x32xf32>
    %81 = arith.addf %79, %80 : vector<8x32xf32>
    %82 = math.tanh %81 : vector<8x32xf32>
    %83 = arith.mulf %78, %82 : vector<8x32xf32>
    %c7_35 = arith.constant 7 : index
    %c0_36 = arith.constant 0 : index
    %c0_37 = arith.constant 0 : index
    %84 = vector.load %arg4[%c7_35, %c0_36, %c0_37] : memref<8x8x1xf32, #tpu.memory_space<vmem>>, vector<1x8x1xf32>
    %85 = vector.shape_cast %84 : vector<1x8x1xf32> to vector<8x1xf32>
    %cst_38 = arith.constant 5.000000e-01 : f32
    %86 = vector.broadcast %cst_38 : f32 to vector<8x1xf32>
    %87 = arith.cmpf ogt, %85, %86 : vector<8x1xf32>
    %88 = vector.broadcast %85 : vector<8x1xf32> to vector<8x32xf32>
    %89 = arith.mulf %88, %83 : vector<8x32xf32>
    %c7_39 = arith.constant 7 : index
    %c0_40 = arith.constant 0 : index
    %c0_41 = arith.constant 0 : index
    %90 = vector.load %arg12[%c7_39, %c0_40, %c0_41] : memref<8x8x32xf32, #tpu.memory_space<vmem>>, vector<1x8x32xf32>
    %91 = vector.shape_cast %90 : vector<1x8x32xf32> to vector<8x32xf32>
    %92 = vector.shape_cast %89 : vector<8x32xf32> to vector<1x8x32xf32>
    tpu.vector_store %arg12[%c7_39, %c0_40, %c0_41], %92 {strides = array<i32>} : memref<8x8x32xf32, #tpu.memory_space<vmem>>, vector<1x8x32xf32>,
    %93 = vector.shape_cast %87 : vector<8x1xi1> to vector<8x1xi1>
    %94 = vector.broadcast %93 : vector<8x1xi1> to vector<8x32xi1>
    %95 = arith.select %94, %83, %53 : vector<8x32xi1>, vector<8x32xf32>
    %c0_42 = arith.constant 0 : index
    %c0_43 = arith.constant 0 : index
    %96 = vector.load %arg15[%c0_42, %c0_43] : memref<8x32xf32, #tpu.memory_space<vmem>>, vector<8x32xf32>
    tpu.vector_store %arg15[%c0_42, %c0_43], %95 {strides = array<i32>} : memref<8x32xf32, #tpu.memory_space<vmem>>, vector<8x32xf32>,
    %97 = vector.shape_cast %87 : vector<8x1xi1> to vector<8x1xi1>
    %98 = vector.broadcast %97 : vector<8x1xi1> to vector<8x32xi1>
    %99 = arith.select %98, %81, %54 : vector<8x32xi1>, vector<8x32xf32>
    %c0_44 = arith.constant 0 : index
    %c0_45 = arith.constant 0 : index
    %100 = vector.load %arg16[%c0_44, %c0_45] : memref<8x32xf32, #tpu.memory_space<vmem>>, vector<8x32xf32>
    tpu.vector_store %arg16[%c0_44, %c0_45], %99 {strides = array<i32>} : memref<8x32xf32, #tpu.memory_space<vmem>>, vector<8x32xf32>,
    %c0_46 = arith.constant 0 : index
    %c0_47 = arith.constant 0 : index
    %101 = vector.load %arg13[%c0_46, %c0_47] : memref<8x32xf32, #tpu.memory_space<vmem>>, vector<8x32xf32>
    %c0_48 = arith.constant 0 : index
    %c0_49 = arith.constant 0 : index
    %102 = vector.load %arg14[%c0_48, %c0_49] : memref<8x32xf32, #tpu.memory_space<vmem>>, vector<8x32xf32>
    %cst_50 = arith.constant dense<0.000000e+00> : vector<8x128xf32>
    %103 = tpu.matmul %101, %3, %cst_50 {dimension_numbers = #tpu.dot_dimension_numbers<[1], [0], [0], [1], [0, 0, 1, 1], [], []>} : vector<8x32xf32>, vector<32x128xf32>, vector<8x128xf32> -> vector<8x128xf32>
    %c1 = arith.constant 1 : index
    %c0_51 = arith.constant 0 : index
    %c0_52 = arith.constant 0 : index
    %104 = vector.load %arg1[%c1, %c0_51, %c0_52] : memref<8x8x128xf32, #tpu.memory_space<vmem>>, vector<1x8x128xf32>
    %105 = vector.shape_cast %104 : vector<1x8x128xf32> to vector<8x128xf32>
    %106 = arith.addf %103, %105 : vector<8x128xf32>
    %107 = vector.extract_strided_slice %106 {offsets = [0, 0], sizes = [8, 32], strides = [1, 1]} : vector<8x128xf32> to vector<8x32xf32>
    %108 = arith.negf %107 : vector<8x32xf32>
    %109 = math.exp %108 : vector<8x32xf32>
    %cst_53 = arith.constant 1.000000e+00 : f32
    %110 = vector.broadcast %cst_53 : f32 to vector<8x32xf32>
    %111 = arith.addf %110, %109 : vector<8x32xf32>
    %112 = arith.divf %110, %111 : vector<8x32xf32>
    %113 = vector.extract_strided_slice %106 {offsets = [0, 32], sizes = [8, 32], strides = [1, 1]} : vector<8x128xf32> to vector<8x32xf32>
    %114 = arith.negf %113 : vector<8x32xf32>
    %115 = math.exp %114 : vector<8x32xf32>
    %cst_54 = arith.constant 1.000000e+00 : f32
    %116 = vector.broadcast %cst_54 : f32 to vector<8x32xf32>
    %117 = arith.addf %116, %115 : vector<8x32xf32>
    %118 = arith.divf %116, %117 : vector<8x32xf32>
    %119 = vector.extract_strided_slice %106 {offsets = [0, 64], sizes = [8, 32], strides = [1, 1]} : vector<8x128xf32> to vector<8x32xf32>
    %120 = math.tanh %119 : vector<8x32xf32>
    %121 = vector.extract_strided_slice %106 {offsets = [0, 96], sizes = [8, 32], strides = [1, 1]} : vector<8x128xf32> to vector<8x32xf32>
    %122 = arith.negf %121 : vector<8x32xf32>
    %123 = math.exp %122 : vector<8x32xf32>
    %cst_55 = arith.constant 1.000000e+00 : f32
    %124 = vector.broadcast %cst_55 : f32 to vector<8x32xf32>
    %125 = arith.addf %124, %123 : vector<8x32xf32>
    %126 = arith.divf %124, %125 : vector<8x32xf32>
    %127 = arith.mulf %118, %102 : vector<8x32xf32>
    %128 = arith.mulf %112, %120 : vector<8x32xf32>
    %129 = arith.addf %127, %128 : vector<8x32xf32>
    %130 = math.tanh %129 : vector<8x32xf32>
    %131 = arith.mulf %126, %130 : vector<8x32xf32>
    %c1_56 = arith.constant 1 : index
    %c0_57 = arith.constant 0 : index
    %c0_58 = arith.constant 0 : index
    %132 = vector.load %arg3[%c1_56, %c0_57, %c0_58] : memref<8x8x1xf32, #tpu.memory_space<vmem>>, vector<1x8x1xf32>
    %133 = vector.shape_cast %132 : vector<1x8x1xf32> to vector<8x1xf32>
    %cst_59 = arith.constant 5.000000e-01 : f32
    %134 = vector.broadcast %cst_59 : f32 to vector<8x1xf32>
    %135 = arith.cmpf ogt, %133, %134 : vector<8x1xf32>
    %136 = vector.broadcast %133 : vector<8x1xf32> to vector<8x32xf32>
    %137 = arith.mulf %136, %131 : vector<8x32xf32>
    %c1_60 = arith.constant 1 : index
    %c0_61 = arith.constant 0 : index
    %c0_62 = arith.constant 0 : index
    %138 = vector.load %arg11[%c1_60, %c0_61, %c0_62] : memref<8x8x32xf32, #tpu.memory_space<vmem>>, vector<1x8x32xf32>
    %139 = vector.shape_cast %138 : vector<1x8x32xf32> to vector<8x32xf32>
    %140 = vector.shape_cast %137 : vector<8x32xf32> to vector<1x8x32xf32>
    tpu.vector_store %arg11[%c1_60, %c0_61, %c0_62], %140 {strides = array<i32>} : memref<8x8x32xf32, #tpu.memory_space<vmem>>, vector<1x8x32xf32>,
    %141 = vector.shape_cast %135 : vector<8x1xi1> to vector<8x1xi1>
    %142 = vector.broadcast %141 : vector<8x1xi1> to vector<8x32xi1>
    %143 = arith.select %142, %131, %101 : vector<8x32xi1>, vector<8x32xf32>
    %c0_63 = arith.constant 0 : index
    %c0_64 = arith.constant 0 : index
    %144 = vector.load %arg13[%c0_63, %c0_64] : memref<8x32xf32, #tpu.memory_space<vmem>>, vector<8x32xf32>
    tpu.vector_store %arg13[%c0_63, %c0_64], %143 {strides = array<i32>} : memref<8x32xf32, #tpu.memory_space<vmem>>, vector<8x32xf32>,
    %145 = vector.shape_cast %135 : vector<8x1xi1> to vector<8x1xi1>
    %146 = vector.broadcast %145 : vector<8x1xi1> to vector<8x32xi1>
    %147 = arith.select %146, %129, %102 : vector<8x32xi1>, vector<8x32xf32>
    %c0_65 = arith.constant 0 : index
    %c0_66 = arith.constant 0 : index
    %148 = vector.load %arg14[%c0_65, %c0_66] : memref<8x32xf32, #tpu.memory_space<vmem>>, vector<8x32xf32>
    tpu.vector_store %arg14[%c0_65, %c0_66], %147 {strides = array<i32>} : memref<8x32xf32, #tpu.memory_space<vmem>>, vector<8x32xf32>,
    %c0_67 = arith.constant 0 : index
    %c0_68 = arith.constant 0 : index
    %149 = vector.load %arg15[%c0_67, %c0_68] : memref<8x32xf32, #tpu.memory_space<vmem>>, vector<8x32xf32>
    %c0_69 = arith.constant 0 : index
    %c0_70 = arith.constant 0 : index
    %150 = vector.load %arg16[%c0_69, %c0_70] : memref<8x32xf32, #tpu.memory_space<vmem>>, vector<8x32xf32>
    %cst_71 = arith.constant dense<0.000000e+00> : vector<8x128xf32>
    %151 = tpu.matmul %149, %4, %cst_71 {dimension_numbers = #tpu.dot_dimension_numbers<[1], [0], [0], [1], [0, 0, 1, 1], [], []>} : vector<8x32xf32>, vector<32x128xf32>, vector<8x128xf32> -> vector<8x128xf32>
    %c6 = arith.constant 6 : index
    %c0_72 = arith.constant 0 : index
    %c0_73 = arith.constant 0 : index
    %152 = vector.load %arg2[%c6, %c0_72, %c0_73] : memref<8x8x128xf32, #tpu.memory_space<vmem>>, vector<1x8x128xf32>
    %153 = vector.shape_cast %152 : vector<1x8x128xf32> to vector<8x128xf32>
    %154 = arith.addf %151, %153 : vector<8x128xf32>
    %155 = vector.extract_strided_slice %154 {offsets = [0, 0], sizes = [8, 32], strides = [1, 1]} : vector<8x128xf32> to vector<8x32xf32>
    %156 = arith.negf %155 : vector<8x32xf32>
    %157 = math.exp %156 : vector<8x32xf32>
    %cst_74 = arith.constant 1.000000e+00 : f32
    %158 = vector.broadcast %cst_74 : f32 to vector<8x32xf32>
    %159 = arith.addf %158, %157 : vector<8x32xf32>
    %160 = arith.divf %158, %159 : vector<8x32xf32>
    %161 = vector.extract_strided_slice %154 {offsets = [0, 32], sizes = [8, 32], strides = [1, 1]} : vector<8x128xf32> to vector<8x32xf32>
    %162 = arith.negf %161 : vector<8x32xf32>
    %163 = math.exp %162 : vector<8x32xf32>
    %cst_75 = arith.constant 1.000000e+00 : f32
    %164 = vector.broadcast %cst_75 : f32 to vector<8x32xf32>
    %165 = arith.addf %164, %163 : vector<8x32xf32>
    %166 = arith.divf %164, %165 : vector<8x32xf32>
    %167 = vector.extract_strided_slice %154 {offsets = [0, 64], sizes = [8, 32], strides = [1, 1]} : vector<8x128xf32> to vector<8x32xf32>
    %168 = math.tanh %167 : vector<8x32xf32>
    %169 = vector.extract_strided_slice %154 {offsets = [0, 96], sizes = [8, 32], strides = [1, 1]} : vector<8x128xf32> to vector<8x32xf32>
    %170 = arith.negf %169 : vector<8x32xf32>
    %171 = math.exp %170 : vector<8x32xf32>
    %cst_76 = arith.constant 1.000000e+00 : f32
    %172 = vector.broadcast %cst_76 : f32 to vector<8x32xf32>
    %173 = arith.addf %172, %171 : vector<8x32xf32>
    %174 = arith.divf %172, %173 : vector<8x32xf32>
    %175 = arith.mulf %166, %150 : vector<8x32xf32>
    %176 = arith.mulf %160, %168 : vector<8x32xf32>
    %177 = arith.addf %175, %176 : vector<8x32xf32>
    %178 = math.tanh %177 : vector<8x32xf32>
    %179 = arith.mulf %174, %178 : vector<8x32xf32>
    %c6_77 = arith.constant 6 : index
    %c0_78 = arith.constant 0 : index
    %c0_79 = arith.constant 0 : index
    %180 = vector.load %arg4[%c6_77, %c0_78, %c0_79] : memref<8x8x1xf32, #tpu.memory_space<vmem>>, vector<1x8x1xf32>
    %181 = vector.shape_cast %180 : vector<1x8x1xf32> to vector<8x1xf32>
    %cst_80 = arith.constant 5.000000e-01 : f32
    %182 = vector.broadcast %cst_80 : f32 to vector<8x1xf32>
    %183 = arith.cmpf ogt, %181, %182 : vector<8x1xf32>
    %184 = vector.broadcast %181 : vector<8x1xf32> to vector<8x32xf32>
    %185 = arith.mulf %184, %179 : vector<8x32xf32>
    %c6_81 = arith.constant 6 : index
    %c0_82 = arith.constant 0 : index
    %c0_83 = arith.constant 0 : index
    %186 = vector.load %arg12[%c6_81, %c0_82, %c0_83] : memref<8x8x32xf32, #tpu.memory_space<vmem>>, vector<1x8x32xf32>
    %187 = vector.shape_cast %186 : vector<1x8x32xf32> to vector<8x32xf32>
    %188 = vector.shape_cast %185 : vector<8x32xf32> to vector<1x8x32xf32>
    tpu.vector_store %arg12[%c6_81, %c0_82, %c0_83], %188 {strides = array<i32>} : memref<8x8x32xf32, #tpu.memory_space<vmem>>, vector<1x8x32xf32>,
    %189 = vector.shape_cast %183 : vector<8x1xi1> to vector<8x1xi1>
    %190 = vector.broadcast %189 : vector<8x1xi1> to vector<8x32xi1>
    %191 = arith.select %190, %179, %149 : vector<8x32xi1>, vector<8x32xf32>
    %c0_84 = arith.constant 0 : index
    %c0_85 = arith.constant 0 : index
    %192 = vector.load %arg15[%c0_84, %c0_85] : memref<8x32xf32, #tpu.memory_space<vmem>>, vector<8x32xf32>
    tpu.vector_store %arg15[%c0_84, %c0_85], %191 {strides = array<i32>} : memref<8x32xf32, #tpu.memory_space<vmem>>, vector<8x32xf32>,
    %193 = vector.shape_cast %183 : vector<8x1xi1> to vector<8x1xi1>
    %194 = vector.broadcast %193 : vector<8x1xi1> to vector<8x32xi1>
    %195 = arith.select %194, %177, %150 : vector<8x32xi1>, vector<8x32xf32>
    %c0_86 = arith.constant 0 : index
    %c0_87 = arith.constant 0 : index
    %196 = vector.load %arg16[%c0_86, %c0_87] : memref<8x32xf32, #tpu.memory_space<vmem>>, vector<8x32xf32>
    tpu.vector_store %arg16[%c0_86, %c0_87], %195 {strides = array<i32>} : memref<8x32xf32, #tpu.memory_space<vmem>>, vector<8x32xf32>,
    %c0_88 = arith.constant 0 : index
    %c0_89 = arith.constant 0 : index
    %197 = vector.load %arg13[%c0_88, %c0_89] : memref<8x32xf32, #tpu.memory_space<vmem>>, vector<8x32xf32>
    %c0_90 = arith.constant 0 : index
    %c0_91 = arith.constant 0 : index
    %198 = vector.load %arg14[%c0_90, %c0_91] : memref<8x32xf32, #tpu.memory_space<vmem>>, vector<8x32xf32>
    %cst_92 = arith.constant dense<0.000000e+00> : vector<8x128xf32>
    %199 = tpu.matmul %197, %3, %cst_92 {dimension_numbers = #tpu.dot_dimension_numbers<[1], [0], [0], [1], [0, 0, 1, 1], [], []>} : vector<8x32xf32>, vector<32x128xf32>, vector<8x128xf32> -> vector<8x128xf32>
    %c2 = arith.constant 2 : index
    %c0_93 = arith.constant 0 : index
    %c0_94 = arith.constant 0 : index
    %200 = vector.load %arg1[%c2, %c0_93, %c0_94] : memref<8x8x128xf32, #tpu.memory_space<vmem>>, vector<1x8x128xf32>
    %201 = vector.shape_cast %200 : vector<1x8x128xf32> to vector<8x128xf32>
    %202 = arith.addf %199, %201 : vector<8x128xf32>
    %203 = vector.extract_strided_slice %202 {offsets = [0, 0], sizes = [8, 32], strides = [1, 1]} : vector<8x128xf32> to vector<8x32xf32>
    %204 = arith.negf %203 : vector<8x32xf32>
    %205 = math.exp %204 : vector<8x32xf32>
    %cst_95 = arith.constant 1.000000e+00 : f32
    %206 = vector.broadcast %cst_95 : f32 to vector<8x32xf32>
    %207 = arith.addf %206, %205 : vector<8x32xf32>
    %208 = arith.divf %206, %207 : vector<8x32xf32>
    %209 = vector.extract_strided_slice %202 {offsets = [0, 32], sizes = [8, 32], strides = [1, 1]} : vector<8x128xf32> to vector<8x32xf32>
    %210 = arith.negf %209 : vector<8x32xf32>
    %211 = math.exp %210 : vector<8x32xf32>
    %cst_96 = arith.constant 1.000000e+00 : f32
    %212 = vector.broadcast %cst_96 : f32 to vector<8x32xf32>
    %213 = arith.addf %212, %211 : vector<8x32xf32>
    %214 = arith.divf %212, %213 : vector<8x32xf32>
    %215 = vector.extract_strided_slice %202 {offsets = [0, 64], sizes = [8, 32], strides = [1, 1]} : vector<8x128xf32> to vector<8x32xf32>
    %216 = math.tanh %215 : vector<8x32xf32>
    %217 = vector.extract_strided_slice %202 {offsets = [0, 96], sizes = [8, 32], strides = [1, 1]} : vector<8x128xf32> to vector<8x32xf32>
    %218 = arith.negf %217 : vector<8x32xf32>
    %219 = math.exp %218 : vector<8x32xf32>
    %cst_97 = arith.constant 1.000000e+00 : f32
    %220 = vector.broadcast %cst_97 : f32 to vector<8x32xf32>
    %221 = arith.addf %220, %219 : vector<8x32xf32>
    %222 = arith.divf %220, %221 : vector<8x32xf32>
    %223 = arith.mulf %214, %198 : vector<8x32xf32>
    %224 = arith.mulf %208, %216 : vector<8x32xf32>
    %225 = arith.addf %223, %224 : vector<8x32xf32>
    %226 = math.tanh %225 : vector<8x32xf32>
    %227 = arith.mulf %222, %226 : vector<8x32xf32>
    %c2_98 = arith.constant 2 : index
    %c0_99 = arith.constant 0 : index
    %c0_100 = arith.constant 0 : index
    %228 = vector.load %arg3[%c2_98, %c0_99, %c0_100] : memref<8x8x1xf32, #tpu.memory_space<vmem>>, vector<1x8x1xf32>
    %229 = vector.shape_cast %228 : vector<1x8x1xf32> to vector<8x1xf32>
    %cst_101 = arith.constant 5.000000e-01 : f32
    %230 = vector.broadcast %cst_101 : f32 to vector<8x1xf32>
    %231 = arith.cmpf ogt, %229, %230 : vector<8x1xf32>
    %232 = vector.broadcast %229 : vector<8x1xf32> to vector<8x32xf32>
    %233 = arith.mulf %232, %227 : vector<8x32xf32>
    %c2_102 = arith.constant 2 : index
    %c0_103 = arith.constant 0 : index
    %c0_104 = arith.constant 0 : index
    %234 = vector.load %arg11[%c2_102, %c0_103, %c0_104] : memref<8x8x32xf32, #tpu.memory_space<vmem>>, vector<1x8x32xf32>
    %235 = vector.shape_cast %234 : vector<1x8x32xf32> to vector<8x32xf32>
    %236 = vector.shape_cast %233 : vector<8x32xf32> to vector<1x8x32xf32>
    tpu.vector_store %arg11[%c2_102, %c0_103, %c0_104], %236 {strides = array<i32>} : memref<8x8x32xf32, #tpu.memory_space<vmem>>, vector<1x8x32xf32>,
    %237 = vector.shape_cast %231 : vector<8x1xi1> to vector<8x1xi1>
    %238 = vector.broadcast %237 : vector<8x1xi1> to vector<8x32xi1>
    %239 = arith.select %238, %227, %197 : vector<8x32xi1>, vector<8x32xf32>
    %c0_105 = arith.constant 0 : index
    %c0_106 = arith.constant 0 : index
    %240 = vector.load %arg13[%c0_105, %c0_106] : memref<8x32xf32, #tpu.memory_space<vmem>>, vector<8x32xf32>
    tpu.vector_store %arg13[%c0_105, %c0_106], %239 {strides = array<i32>} : memref<8x32xf32, #tpu.memory_space<vmem>>, vector<8x32xf32>,
    %241 = vector.shape_cast %231 : vector<8x1xi1> to vector<8x1xi1>
    %242 = vector.broadcast %241 : vector<8x1xi1> to vector<8x32xi1>
    %243 = arith.select %242, %225, %198 : vector<8x32xi1>, vector<8x32xf32>
    %c0_107 = arith.constant 0 : index
    %c0_108 = arith.constant 0 : index
    %244 = vector.load %arg14[%c0_107, %c0_108] : memref<8x32xf32, #tpu.memory_space<vmem>>, vector<8x32xf32>
    tpu.vector_store %arg14[%c0_107, %c0_108], %243 {strides = array<i32>} : memref<8x32xf32, #tpu.memory_space<vmem>>, vector<8x32xf32>,
    %c0_109 = arith.constant 0 : index
    %c0_110 = arith.constant 0 : index
    %245 = vector.load %arg15[%c0_109, %c0_110] : memref<8x32xf32, #tpu.memory_space<vmem>>, vector<8x32xf32>
    %c0_111 = arith.constant 0 : index
    %c0_112 = arith.constant 0 : index
    %246 = vector.load %arg16[%c0_111, %c0_112] : memref<8x32xf32, #tpu.memory_space<vmem>>, vector<8x32xf32>
    %cst_113 = arith.constant dense<0.000000e+00> : vector<8x128xf32>
    %247 = tpu.matmul %245, %4, %cst_113 {dimension_numbers = #tpu.dot_dimension_numbers<[1], [0], [0], [1], [0, 0, 1, 1], [], []>} : vector<8x32xf32>, vector<32x128xf32>, vector<8x128xf32> -> vector<8x128xf32>
    %c5 = arith.constant 5 : index
    %c0_114 = arith.constant 0 : index
    %c0_115 = arith.constant 0 : index
    %248 = vector.load %arg2[%c5, %c0_114, %c0_115] : memref<8x8x128xf32, #tpu.memory_space<vmem>>, vector<1x8x128xf32>
    %249 = vector.shape_cast %248 : vector<1x8x128xf32> to vector<8x128xf32>
    %250 = arith.addf %247, %249 : vector<8x128xf32>
    %251 = vector.extract_strided_slice %250 {offsets = [0, 0], sizes = [8, 32], strides = [1, 1]} : vector<8x128xf32> to vector<8x32xf32>
    %252 = arith.negf %251 : vector<8x32xf32>
    %253 = math.exp %252 : vector<8x32xf32>
    %cst_116 = arith.constant 1.000000e+00 : f32
    %254 = vector.broadcast %cst_116 : f32 to vector<8x32xf32>
    %255 = arith.addf %254, %253 : vector<8x32xf32>
    %256 = arith.divf %254, %255 : vector<8x32xf32>
    %257 = vector.extract_strided_slice %250 {offsets = [0, 32], sizes = [8, 32], strides = [1, 1]} : vector<8x128xf32> to vector<8x32xf32>
    %258 = arith.negf %257 : vector<8x32xf32>
    %259 = math.exp %258 : vector<8x32xf32>
    %cst_117 = arith.constant 1.000000e+00 : f32
    %260 = vector.broadcast %cst_117 : f32 to vector<8x32xf32>
    %261 = arith.addf %260, %259 : vector<8x32xf32>
    %262 = arith.divf %260, %261 : vector<8x32xf32>
    %263 = vector.extract_strided_slice %250 {offsets = [0, 64], sizes = [8, 32], strides = [1, 1]} : vector<8x128xf32> to vector<8x32xf32>
    %264 = math.tanh %263 : vector<8x32xf32>
    %265 = vector.extract_strided_slice %250 {offsets = [0, 96], sizes = [8, 32], strides = [1, 1]} : vector<8x128xf32> to vector<8x32xf32>
    %266 = arith.negf %265 : vector<8x32xf32>
    %267 = math.exp %266 : vector<8x32xf32>
    %cst_118 = arith.constant 1.000000e+00 : f32
    %268 = vector.broadcast %cst_118 : f32 to vector<8x32xf32>
    %269 = arith.addf %268, %267 : vector<8x32xf32>
    %270 = arith.divf %268, %269 : vector<8x32xf32>
    %271 = arith.mulf %262, %246 : vector<8x32xf32>
    %272 = arith.mulf %256, %264 : vector<8x32xf32>
    %273 = arith.addf %271, %272 : vector<8x32xf32>
    %274 = math.tanh %273 : vector<8x32xf32>
    %275 = arith.mulf %270, %274 : vector<8x32xf32>
    %c5_119 = arith.constant 5 : index
    %c0_120 = arith.constant 0 : index
    %c0_121 = arith.constant 0 : index
    %276 = vector.load %arg4[%c5_119, %c0_120, %c0_121] : memref<8x8x1xf32, #tpu.memory_space<vmem>>, vector<1x8x1xf32>
    %277 = vector.shape_cast %276 : vector<1x8x1xf32> to vector<8x1xf32>
    %cst_122 = arith.constant 5.000000e-01 : f32
    %278 = vector.broadcast %cst_122 : f32 to vector<8x1xf32>
    %279 = arith.cmpf ogt, %277, %278 : vector<8x1xf32>
    %280 = vector.broadcast %277 : vector<8x1xf32> to vector<8x32xf32>
    %281 = arith.mulf %280, %275 : vector<8x32xf32>
    %c5_123 = arith.constant 5 : index
    %c0_124 = arith.constant 0 : index
    %c0_125 = arith.constant 0 : index
    %282 = vector.load %arg12[%c5_123, %c0_124, %c0_125] : memref<8x8x32xf32, #tpu.memory_space<vmem>>, vector<1x8x32xf32>
    %283 = vector.shape_cast %282 : vector<1x8x32xf32> to vector<8x32xf32>
    %284 = vector.shape_cast %281 : vector<8x32xf32> to vector<1x8x32xf32>
    tpu.vector_store %arg12[%c5_123, %c0_124, %c0_125], %284 {strides = array<i32>} : memref<8x8x32xf32, #tpu.memory_space<vmem>>, vector<1x8x32xf32>,
    %285 = vector.shape_cast %279 : vector<8x1xi1> to vector<8x1xi1>
    %286 = vector.broadcast %285 : vector<8x1xi1> to vector<8x32xi1>
    %287 = arith.select %286, %275, %245 : vector<8x32xi1>, vector<8x32xf32>
    %c0_126 = arith.constant 0 : index
    %c0_127 = arith.constant 0 : index
    %288 = vector.load %arg15[%c0_126, %c0_127] : memref<8x32xf32, #tpu.memory_space<vmem>>, vector<8x32xf32>
    tpu.vector_store %arg15[%c0_126, %c0_127], %287 {strides = array<i32>} : memref<8x32xf32, #tpu.memory_space<vmem>>, vector<8x32xf32>,
    %289 = vector.shape_cast %279 : vector<8x1xi1> to vector<8x1xi1>
    %290 = vector.broadcast %289 : vector<8x1xi1> to vector<8x32xi1>
    %291 = arith.select %290, %273, %246 : vector<8x32xi1>, vector<8x32xf32>
    %c0_128 = arith.constant 0 : index
    %c0_129 = arith.constant 0 : index
    %292 = vector.load %arg16[%c0_128, %c0_129] : memref<8x32xf32, #tpu.memory_space<vmem>>, vector<8x32xf32>
    tpu.vector_store %arg16[%c0_128, %c0_129], %291 {strides = array<i32>} : memref<8x32xf32, #tpu.memory_space<vmem>>, vector<8x32xf32>,
    %c0_130 = arith.constant 0 : index
    %c0_131 = arith.constant 0 : index
    %293 = vector.load %arg13[%c0_130, %c0_131] : memref<8x32xf32, #tpu.memory_space<vmem>>, vector<8x32xf32>
    %c0_132 = arith.constant 0 : index
    %c0_133 = arith.constant 0 : index
    %294 = vector.load %arg14[%c0_132, %c0_133] : memref<8x32xf32, #tpu.memory_space<vmem>>, vector<8x32xf32>
    %cst_134 = arith.constant dense<0.000000e+00> : vector<8x128xf32>
    %295 = tpu.matmul %293, %3, %cst_134 {dimension_numbers = #tpu.dot_dimension_numbers<[1], [0], [0], [1], [0, 0, 1, 1], [], []>} : vector<8x32xf32>, vector<32x128xf32>, vector<8x128xf32> -> vector<8x128xf32>
    %c3 = arith.constant 3 : index
    %c0_135 = arith.constant 0 : index
    %c0_136 = arith.constant 0 : index
    %296 = vector.load %arg1[%c3, %c0_135, %c0_136] : memref<8x8x128xf32, #tpu.memory_space<vmem>>, vector<1x8x128xf32>
    %297 = vector.shape_cast %296 : vector<1x8x128xf32> to vector<8x128xf32>
    %298 = arith.addf %295, %297 : vector<8x128xf32>
    %299 = vector.extract_strided_slice %298 {offsets = [0, 0], sizes = [8, 32], strides = [1, 1]} : vector<8x128xf32> to vector<8x32xf32>
    %300 = arith.negf %299 : vector<8x32xf32>
    %301 = math.exp %300 : vector<8x32xf32>
    %cst_137 = arith.constant 1.000000e+00 : f32
    %302 = vector.broadcast %cst_137 : f32 to vector<8x32xf32>
    %303 = arith.addf %302, %301 : vector<8x32xf32>
    %304 = arith.divf %302, %303 : vector<8x32xf32>
    %305 = vector.extract_strided_slice %298 {offsets = [0, 32], sizes = [8, 32], strides = [1, 1]} : vector<8x128xf32> to vector<8x32xf32>
    %306 = arith.negf %305 : vector<8x32xf32>
    %307 = math.exp %306 : vector<8x32xf32>
    %cst_138 = arith.constant 1.000000e+00 : f32
    %308 = vector.broadcast %cst_138 : f32 to vector<8x32xf32>
    %309 = arith.addf %308, %307 : vector<8x32xf32>
    %310 = arith.divf %308, %309 : vector<8x32xf32>
    %311 = vector.extract_strided_slice %298 {offsets = [0, 64], sizes = [8, 32], strides = [1, 1]} : vector<8x128xf32> to vector<8x32xf32>
    %312 = math.tanh %311 : vector<8x32xf32>
    %313 = vector.extract_strided_slice %298 {offsets = [0, 96], sizes = [8, 32], strides = [1, 1]} : vector<8x128xf32> to vector<8x32xf32>
    %314 = arith.negf %313 : vector<8x32xf32>
    %315 = math.exp %314 : vector<8x32xf32>
    %cst_139 = arith.constant 1.000000e+00 : f32
    %316 = vector.broadcast %cst_139 : f32 to vector<8x32xf32>
    %317 = arith.addf %316, %315 : vector<8x32xf32>
    %318 = arith.divf %316, %317 : vector<8x32xf32>
    %319 = arith.mulf %310, %294 : vector<8x32xf32>
    %320 = arith.mulf %304, %312 : vector<8x32xf32>
    %321 = arith.addf %319, %320 : vector<8x32xf32>
    %322 = math.tanh %321 : vector<8x32xf32>
    %323 = arith.mulf %318, %322 : vector<8x32xf32>
    %c3_140 = arith.constant 3 : index
    %c0_141 = arith.constant 0 : index
    %c0_142 = arith.constant 0 : index
    %324 = vector.load %arg3[%c3_140, %c0_141, %c0_142] : memref<8x8x1xf32, #tpu.memory_space<vmem>>, vector<1x8x1xf32>
    %325 = vector.shape_cast %324 : vector<1x8x1xf32> to vector<8x1xf32>
    %cst_143 = arith.constant 5.000000e-01 : f32
    %326 = vector.broadcast %cst_143 : f32 to vector<8x1xf32>
    %327 = arith.cmpf ogt, %325, %326 : vector<8x1xf32>
    %328 = vector.broadcast %325 : vector<8x1xf32> to vector<8x32xf32>
    %329 = arith.mulf %328, %323 : vector<8x32xf32>
    %c3_144 = arith.constant 3 : index
    %c0_145 = arith.constant 0 : index
    %c0_146 = arith.constant 0 : index
    %330 = vector.load %arg11[%c3_144, %c0_145, %c0_146] : memref<8x8x32xf32, #tpu.memory_space<vmem>>, vector<1x8x32xf32>
    %331 = vector.shape_cast %330 : vector<1x8x32xf32> to vector<8x32xf32>
    %332 = vector.shape_cast %329 : vector<8x32xf32> to vector<1x8x32xf32>
    tpu.vector_store %arg11[%c3_144, %c0_145, %c0_146], %332 {strides = array<i32>} : memref<8x8x32xf32, #tpu.memory_space<vmem>>, vector<1x8x32xf32>,
    %333 = vector.shape_cast %327 : vector<8x1xi1> to vector<8x1xi1>
    %334 = vector.broadcast %333 : vector<8x1xi1> to vector<8x32xi1>
    %335 = arith.select %334, %323, %293 : vector<8x32xi1>, vector<8x32xf32>
    %c0_147 = arith.constant 0 : index
    %c0_148 = arith.constant 0 : index
    %336 = vector.load %arg13[%c0_147, %c0_148] : memref<8x32xf32, #tpu.memory_space<vmem>>, vector<8x32xf32>
    tpu.vector_store %arg13[%c0_147, %c0_148], %335 {strides = array<i32>} : memref<8x32xf32, #tpu.memory_space<vmem>>, vector<8x32xf32>,
    %337 = vector.shape_cast %327 : vector<8x1xi1> to vector<8x1xi1>
    %338 = vector.broadcast %337 : vector<8x1xi1> to vector<8x32xi1>
    %339 = arith.select %338, %321, %294 : vector<8x32xi1>, vector<8x32xf32>
    %c0_149 = arith.constant 0 : index
    %c0_150 = arith.constant 0 : index
    %340 = vector.load %arg14[%c0_149, %c0_150] : memref<8x32xf32, #tpu.memory_space<vmem>>, vector<8x32xf32>
    tpu.vector_store %arg14[%c0_149, %c0_150], %339 {strides = array<i32>} : memref<8x32xf32, #tpu.memory_space<vmem>>, vector<8x32xf32>,
    %c0_151 = arith.constant 0 : index
    %c0_152 = arith.constant 0 : index
    %341 = vector.load %arg15[%c0_151, %c0_152] : memref<8x32xf32, #tpu.memory_space<vmem>>, vector<8x32xf32>
    %c0_153 = arith.constant 0 : index
    %c0_154 = arith.constant 0 : index
    %342 = vector.load %arg16[%c0_153, %c0_154] : memref<8x32xf32, #tpu.memory_space<vmem>>, vector<8x32xf32>
    %cst_155 = arith.constant dense<0.000000e+00> : vector<8x128xf32>
    %343 = tpu.matmul %341, %4, %cst_155 {dimension_numbers = #tpu.dot_dimension_numbers<[1], [0], [0], [1], [0, 0, 1, 1], [], []>} : vector<8x32xf32>, vector<32x128xf32>, vector<8x128xf32> -> vector<8x128xf32>
    %c4 = arith.constant 4 : index
    %c0_156 = arith.constant 0 : index
    %c0_157 = arith.constant 0 : index
    %344 = vector.load %arg2[%c4, %c0_156, %c0_157] : memref<8x8x128xf32, #tpu.memory_space<vmem>>, vector<1x8x128xf32>
    %345 = vector.shape_cast %344 : vector<1x8x128xf32> to vector<8x128xf32>
    %346 = arith.addf %343, %345 : vector<8x128xf32>
    %347 = vector.extract_strided_slice %346 {offsets = [0, 0], sizes = [8, 32], strides = [1, 1]} : vector<8x128xf32> to vector<8x32xf32>
    %348 = arith.negf %347 : vector<8x32xf32>
    %349 = math.exp %348 : vector<8x32xf32>
    %cst_158 = arith.constant 1.000000e+00 : f32
    %350 = vector.broadcast %cst_158 : f32 to vector<8x32xf32>
    %351 = arith.addf %350, %349 : vector<8x32xf32>
    %352 = arith.divf %350, %351 : vector<8x32xf32>
    %353 = vector.extract_strided_slice %346 {offsets = [0, 32], sizes = [8, 32], strides = [1, 1]} : vector<8x128xf32> to vector<8x32xf32>
    %354 = arith.negf %353 : vector<8x32xf32>
    %355 = math.exp %354 : vector<8x32xf32>
    %cst_159 = arith.constant 1.000000e+00 : f32
    %356 = vector.broadcast %cst_159 : f32 to vector<8x32xf32>
    %357 = arith.addf %356, %355 : vector<8x32xf32>
    %358 = arith.divf %356, %357 : vector<8x32xf32>
    %359 = vector.extract_strided_slice %346 {offsets = [0, 64], sizes = [8, 32], strides = [1, 1]} : vector<8x128xf32> to vector<8x32xf32>
    %360 = math.tanh %359 : vector<8x32xf32>
    %361 = vector.extract_strided_slice %346 {offsets = [0, 96], sizes = [8, 32], strides = [1, 1]} : vector<8x128xf32> to vector<8x32xf32>
    %362 = arith.negf %361 : vector<8x32xf32>
    %363 = math.exp %362 : vector<8x32xf32>
    %cst_160 = arith.constant 1.000000e+00 : f32
    %364 = vector.broadcast %cst_160 : f32 to vector<8x32xf32>
    %365 = arith.addf %364, %363 : vector<8x32xf32>
    %366 = arith.divf %364, %365 : vector<8x32xf32>
    %367 = arith.mulf %358, %342 : vector<8x32xf32>
    %368 = arith.mulf %352, %360 : vector<8x32xf32>
    %369 = arith.addf %367, %368 : vector<8x32xf32>
    %370 = math.tanh %369 : vector<8x32xf32>
    %371 = arith.mulf %366, %370 : vector<8x32xf32>
    %c4_161 = arith.constant 4 : index
    %c0_162 = arith.constant 0 : index
    %c0_163 = arith.constant 0 : index
    %372 = vector.load %arg4[%c4_161, %c0_162, %c0_163] : memref<8x8x1xf32, #tpu.memory_space<vmem>>, vector<1x8x1xf32>
    %373 = vector.shape_cast %372 : vector<1x8x1xf32> to vector<8x1xf32>
    %cst_164 = arith.constant 5.000000e-01 : f32
    %374 = vector.broadcast %cst_164 : f32 to vector<8x1xf32>
    %375 = arith.cmpf ogt, %373, %374 : vector<8x1xf32>
    %376 = vector.broadcast %373 : vector<8x1xf32> to vector<8x32xf32>
    %377 = arith.mulf %376, %371 : vector<8x32xf32>
    %c4_165 = arith.constant 4 : index
    %c0_166 = arith.constant 0 : index
    %c0_167 = arith.constant 0 : index
    %378 = vector.load %arg12[%c4_165, %c0_166, %c0_167] : memref<8x8x32xf32, #tpu.memory_space<vmem>>, vector<1x8x32xf32>
    %379 = vector.shape_cast %378 : vector<1x8x32xf32> to vector<8x32xf32>
    %380 = vector.shape_cast %377 : vector<8x32xf32> to vector<1x8x32xf32>
    tpu.vector_store %arg12[%c4_165, %c0_166, %c0_167], %380 {strides = array<i32>} : memref<8x8x32xf32, #tpu.memory_space<vmem>>, vector<1x8x32xf32>,
    %381 = vector.shape_cast %375 : vector<8x1xi1> to vector<8x1xi1>
    %382 = vector.broadcast %381 : vector<8x1xi1> to vector<8x32xi1>
    %383 = arith.select %382, %371, %341 : vector<8x32xi1>, vector<8x32xf32>
    %c0_168 = arith.constant 0 : index
    %c0_169 = arith.constant 0 : index
    %384 = vector.load %arg15[%c0_168, %c0_169] : memref<8x32xf32, #tpu.memory_space<vmem>>, vector<8x32xf32>
    tpu.vector_store %arg15[%c0_168, %c0_169], %383 {strides = array<i32>} : memref<8x32xf32, #tpu.memory_space<vmem>>, vector<8x32xf32>,
    %385 = vector.shape_cast %375 : vector<8x1xi1> to vector<8x1xi1>
    %386 = vector.broadcast %385 : vector<8x1xi1> to vector<8x32xi1>
    %387 = arith.select %386, %369, %342 : vector<8x32xi1>, vector<8x32xf32>
    %c0_170 = arith.constant 0 : index
    %c0_171 = arith.constant 0 : index
    %388 = vector.load %arg16[%c0_170, %c0_171] : memref<8x32xf32, #tpu.memory_space<vmem>>, vector<8x32xf32>
    tpu.vector_store %arg16[%c0_170, %c0_171], %387 {strides = array<i32>} : memref<8x32xf32, #tpu.memory_space<vmem>>, vector<8x32xf32>,
    %c0_172 = arith.constant 0 : index
    %c0_173 = arith.constant 0 : index
    %389 = vector.load %arg13[%c0_172, %c0_173] : memref<8x32xf32, #tpu.memory_space<vmem>>, vector<8x32xf32>
    %c0_174 = arith.constant 0 : index
    %c0_175 = arith.constant 0 : index
    %390 = vector.load %arg14[%c0_174, %c0_175] : memref<8x32xf32, #tpu.memory_space<vmem>>, vector<8x32xf32>
    %cst_176 = arith.constant dense<0.000000e+00> : vector<8x128xf32>
    %391 = tpu.matmul %389, %3, %cst_176 {dimension_numbers = #tpu.dot_dimension_numbers<[1], [0], [0], [1], [0, 0, 1, 1], [], []>} : vector<8x32xf32>, vector<32x128xf32>, vector<8x128xf32> -> vector<8x128xf32>
    %c4_177 = arith.constant 4 : index
    %c0_178 = arith.constant 0 : index
    %c0_179 = arith.constant 0 : index
    %392 = vector.load %arg1[%c4_177, %c0_178, %c0_179] : memref<8x8x128xf32, #tpu.memory_space<vmem>>, vector<1x8x128xf32>
    %393 = vector.shape_cast %392 : vector<1x8x128xf32> to vector<8x128xf32>
    %394 = arith.addf %391, %393 : vector<8x128xf32>
    %395 = vector.extract_strided_slice %394 {offsets = [0, 0], sizes = [8, 32], strides = [1, 1]} : vector<8x128xf32> to vector<8x32xf32>
    %396 = arith.negf %395 : vector<8x32xf32>
    %397 = math.exp %396 : vector<8x32xf32>
    %cst_180 = arith.constant 1.000000e+00 : f32
    %398 = vector.broadcast %cst_180 : f32 to vector<8x32xf32>
    %399 = arith.addf %398, %397 : vector<8x32xf32>
    %400 = arith.divf %398, %399 : vector<8x32xf32>
    %401 = vector.extract_strided_slice %394 {offsets = [0, 32], sizes = [8, 32], strides = [1, 1]} : vector<8x128xf32> to vector<8x32xf32>
    %402 = arith.negf %401 : vector<8x32xf32>
    %403 = math.exp %402 : vector<8x32xf32>
    %cst_181 = arith.constant 1.000000e+00 : f32
    %404 = vector.broadcast %cst_181 : f32 to vector<8x32xf32>
    %405 = arith.addf %404, %403 : vector<8x32xf32>
    %406 = arith.divf %404, %405 : vector<8x32xf32>
    %407 = vector.extract_strided_slice %394 {offsets = [0, 64], sizes = [8, 32], strides = [1, 1]} : vector<8x128xf32> to vector<8x32xf32>
    %408 = math.tanh %407 : vector<8x32xf32>
    %409 = vector.extract_strided_slice %394 {offsets = [0, 96], sizes = [8, 32], strides = [1, 1]} : vector<8x128xf32> to vector<8x32xf32>
    %410 = arith.negf %409 : vector<8x32xf32>
    %411 = math.exp %410 : vector<8x32xf32>
    %cst_182 = arith.constant 1.000000e+00 : f32
    %412 = vector.broadcast %cst_182 : f32 to vector<8x32xf32>
    %413 = arith.addf %412, %411 : vector<8x32xf32>
    %414 = arith.divf %412, %413 : vector<8x32xf32>
    %415 = arith.mulf %406, %390 : vector<8x32xf32>
    %416 = arith.mulf %400, %408 : vector<8x32xf32>
    %417 = arith.addf %415, %416 : vector<8x32xf32>
    %418 = math.tanh %417 : vector<8x32xf32>
    %419 = arith.mulf %414, %418 : vector<8x32xf32>
    %c4_183 = arith.constant 4 : index
    %c0_184 = arith.constant 0 : index
    %c0_185 = arith.constant 0 : index
    %420 = vector.load %arg3[%c4_183, %c0_184, %c0_185] : memref<8x8x1xf32, #tpu.memory_space<vmem>>, vector<1x8x1xf32>
    %421 = vector.shape_cast %420 : vector<1x8x1xf32> to vector<8x1xf32>
    %cst_186 = arith.constant 5.000000e-01 : f32
    %422 = vector.broadcast %cst_186 : f32 to vector<8x1xf32>
    %423 = arith.cmpf ogt, %421, %422 : vector<8x1xf32>
    %424 = vector.broadcast %421 : vector<8x1xf32> to vector<8x32xf32>
    %425 = arith.mulf %424, %419 : vector<8x32xf32>
    %c4_187 = arith.constant 4 : index
    %c0_188 = arith.constant 0 : index
    %c0_189 = arith.constant 0 : index
    %426 = vector.load %arg11[%c4_187, %c0_188, %c0_189] : memref<8x8x32xf32, #tpu.memory_space<vmem>>, vector<1x8x32xf32>
    %427 = vector.shape_cast %426 : vector<1x8x32xf32> to vector<8x32xf32>
    %428 = vector.shape_cast %425 : vector<8x32xf32> to vector<1x8x32xf32>
    tpu.vector_store %arg11[%c4_187, %c0_188, %c0_189], %428 {strides = array<i32>} : memref<8x8x32xf32, #tpu.memory_space<vmem>>, vector<1x8x32xf32>,
    %429 = vector.shape_cast %423 : vector<8x1xi1> to vector<8x1xi1>
    %430 = vector.broadcast %429 : vector<8x1xi1> to vector<8x32xi1>
    %431 = arith.select %430, %419, %389 : vector<8x32xi1>, vector<8x32xf32>
    %c0_190 = arith.constant 0 : index
    %c0_191 = arith.constant 0 : index
    %432 = vector.load %arg13[%c0_190, %c0_191] : memref<8x32xf32, #tpu.memory_space<vmem>>, vector<8x32xf32>
    tpu.vector_store %arg13[%c0_190, %c0_191], %431 {strides = array<i32>} : memref<8x32xf32, #tpu.memory_space<vmem>>, vector<8x32xf32>,
    %433 = vector.shape_cast %423 : vector<8x1xi1> to vector<8x1xi1>
    %434 = vector.broadcast %433 : vector<8x1xi1> to vector<8x32xi1>
    %435 = arith.select %434, %417, %390 : vector<8x32xi1>, vector<8x32xf32>
    %c0_192 = arith.constant 0 : index
    %c0_193 = arith.constant 0 : index
    %436 = vector.load %arg14[%c0_192, %c0_193] : memref<8x32xf32, #tpu.memory_space<vmem>>, vector<8x32xf32>
    tpu.vector_store %arg14[%c0_192, %c0_193], %435 {strides = array<i32>} : memref<8x32xf32, #tpu.memory_space<vmem>>, vector<8x32xf32>,
    %c0_194 = arith.constant 0 : index
    %c0_195 = arith.constant 0 : index
    %437 = vector.load %arg15[%c0_194, %c0_195] : memref<8x32xf32, #tpu.memory_space<vmem>>, vector<8x32xf32>
    %c0_196 = arith.constant 0 : index
    %c0_197 = arith.constant 0 : index
    %438 = vector.load %arg16[%c0_196, %c0_197] : memref<8x32xf32, #tpu.memory_space<vmem>>, vector<8x32xf32>
    %cst_198 = arith.constant dense<0.000000e+00> : vector<8x128xf32>
    %439 = tpu.matmul %437, %4, %cst_198 {dimension_numbers = #tpu.dot_dimension_numbers<[1], [0], [0], [1], [0, 0, 1, 1], [], []>} : vector<8x32xf32>, vector<32x128xf32>, vector<8x128xf32> -> vector<8x128xf32>
    %c3_199 = arith.constant 3 : index
    %c0_200 = arith.constant 0 : index
    %c0_201 = arith.constant 0 : index
    %440 = vector.load %arg2[%c3_199, %c0_200, %c0_201] : memref<8x8x128xf32, #tpu.memory_space<vmem>>, vector<1x8x128xf32>
    %441 = vector.shape_cast %440 : vector<1x8x128xf32> to vector<8x128xf32>
    %442 = arith.addf %439, %441 : vector<8x128xf32>
    %443 = vector.extract_strided_slice %442 {offsets = [0, 0], sizes = [8, 32], strides = [1, 1]} : vector<8x128xf32> to vector<8x32xf32>
    %444 = arith.negf %443 : vector<8x32xf32>
    %445 = math.exp %444 : vector<8x32xf32>
    %cst_202 = arith.constant 1.000000e+00 : f32
    %446 = vector.broadcast %cst_202 : f32 to vector<8x32xf32>
    %447 = arith.addf %446, %445 : vector<8x32xf32>
    %448 = arith.divf %446, %447 : vector<8x32xf32>
    %449 = vector.extract_strided_slice %442 {offsets = [0, 32], sizes = [8, 32], strides = [1, 1]} : vector<8x128xf32> to vector<8x32xf32>
    %450 = arith.negf %449 : vector<8x32xf32>
    %451 = math.exp %450 : vector<8x32xf32>
    %cst_203 = arith.constant 1.000000e+00 : f32
    %452 = vector.broadcast %cst_203 : f32 to vector<8x32xf32>
    %453 = arith.addf %452, %451 : vector<8x32xf32>
    %454 = arith.divf %452, %453 : vector<8x32xf32>
    %455 = vector.extract_strided_slice %442 {offsets = [0, 64], sizes = [8, 32], strides = [1, 1]} : vector<8x128xf32> to vector<8x32xf32>
    %456 = math.tanh %455 : vector<8x32xf32>
    %457 = vector.extract_strided_slice %442 {offsets = [0, 96], sizes = [8, 32], strides = [1, 1]} : vector<8x128xf32> to vector<8x32xf32>
    %458 = arith.negf %457 : vector<8x32xf32>
    %459 = math.exp %458 : vector<8x32xf32>
    %cst_204 = arith.constant 1.000000e+00 : f32
    %460 = vector.broadcast %cst_204 : f32 to vector<8x32xf32>
    %461 = arith.addf %460, %459 : vector<8x32xf32>
    %462 = arith.divf %460, %461 : vector<8x32xf32>
    %463 = arith.mulf %454, %438 : vector<8x32xf32>
    %464 = arith.mulf %448, %456 : vector<8x32xf32>
    %465 = arith.addf %463, %464 : vector<8x32xf32>
    %466 = math.tanh %465 : vector<8x32xf32>
    %467 = arith.mulf %462, %466 : vector<8x32xf32>
    %c3_205 = arith.constant 3 : index
    %c0_206 = arith.constant 0 : index
    %c0_207 = arith.constant 0 : index
    %468 = vector.load %arg4[%c3_205, %c0_206, %c0_207] : memref<8x8x1xf32, #tpu.memory_space<vmem>>, vector<1x8x1xf32>
    %469 = vector.shape_cast %468 : vector<1x8x1xf32> to vector<8x1xf32>
    %cst_208 = arith.constant 5.000000e-01 : f32
    %470 = vector.broadcast %cst_208 : f32 to vector<8x1xf32>
    %471 = arith.cmpf ogt, %469, %470 : vector<8x1xf32>
    %472 = vector.broadcast %469 : vector<8x1xf32> to vector<8x32xf32>
    %473 = arith.mulf %472, %467 : vector<8x32xf32>
    %c3_209 = arith.constant 3 : index
    %c0_210 = arith.constant 0 : index
    %c0_211 = arith.constant 0 : index
    %474 = vector.load %arg12[%c3_209, %c0_210, %c0_211] : memref<8x8x32xf32, #tpu.memory_space<vmem>>, vector<1x8x32xf32>
    %475 = vector.shape_cast %474 : vector<1x8x32xf32> to vector<8x32xf32>
    %476 = vector.shape_cast %473 : vector<8x32xf32> to vector<1x8x32xf32>
    tpu.vector_store %arg12[%c3_209, %c0_210, %c0_211], %476 {strides = array<i32>} : memref<8x8x32xf32, #tpu.memory_space<vmem>>, vector<1x8x32xf32>,
    %477 = vector.shape_cast %471 : vector<8x1xi1> to vector<8x1xi1>
    %478 = vector.broadcast %477 : vector<8x1xi1> to vector<8x32xi1>
    %479 = arith.select %478, %467, %437 : vector<8x32xi1>, vector<8x32xf32>
    %c0_212 = arith.constant 0 : index
    %c0_213 = arith.constant 0 : index
    %480 = vector.load %arg15[%c0_212, %c0_213] : memref<8x32xf32, #tpu.memory_space<vmem>>, vector<8x32xf32>
    tpu.vector_store %arg15[%c0_212, %c0_213], %479 {strides = array<i32>} : memref<8x32xf32, #tpu.memory_space<vmem>>, vector<8x32xf32>,
    %481 = vector.shape_cast %471 : vector<8x1xi1> to vector<8x1xi1>
    %482 = vector.broadcast %481 : vector<8x1xi1> to vector<8x32xi1>
    %483 = arith.select %482, %465, %438 : vector<8x32xi1>, vector<8x32xf32>
    %c0_214 = arith.constant 0 : index
    %c0_215 = arith.constant 0 : index
    %484 = vector.load %arg16[%c0_214, %c0_215] : memref<8x32xf32, #tpu.memory_space<vmem>>, vector<8x32xf32>
    tpu.vector_store %arg16[%c0_214, %c0_215], %483 {strides = array<i32>} : memref<8x32xf32, #tpu.memory_space<vmem>>, vector<8x32xf32>,
    %c0_216 = arith.constant 0 : index
    %c0_217 = arith.constant 0 : index
    %485 = vector.load %arg13[%c0_216, %c0_217] : memref<8x32xf32, #tpu.memory_space<vmem>>, vector<8x32xf32>
    %c0_218 = arith.constant 0 : index
    %c0_219 = arith.constant 0 : index
    %486 = vector.load %arg14[%c0_218, %c0_219] : memref<8x32xf32, #tpu.memory_space<vmem>>, vector<8x32xf32>
    %cst_220 = arith.constant dense<0.000000e+00> : vector<8x128xf32>
    %487 = tpu.matmul %485, %3, %cst_220 {dimension_numbers = #tpu.dot_dimension_numbers<[1], [0], [0], [1], [0, 0, 1, 1], [], []>} : vector<8x32xf32>, vector<32x128xf32>, vector<8x128xf32> -> vector<8x128xf32>
    %c5_221 = arith.constant 5 : index
    %c0_222 = arith.constant 0 : index
    %c0_223 = arith.constant 0 : index
    %488 = vector.load %arg1[%c5_221, %c0_222, %c0_223] : memref<8x8x128xf32, #tpu.memory_space<vmem>>, vector<1x8x128xf32>
    %489 = vector.shape_cast %488 : vector<1x8x128xf32> to vector<8x128xf32>
    %490 = arith.addf %487, %489 : vector<8x128xf32>
    %491 = vector.extract_strided_slice %490 {offsets = [0, 0], sizes = [8, 32], strides = [1, 1]} : vector<8x128xf32> to vector<8x32xf32>
    %492 = arith.negf %491 : vector<8x32xf32>
    %493 = math.exp %492 : vector<8x32xf32>
    %cst_224 = arith.constant 1.000000e+00 : f32
    %494 = vector.broadcast %cst_224 : f32 to vector<8x32xf32>
    %495 = arith.addf %494, %493 : vector<8x32xf32>
    %496 = arith.divf %494, %495 : vector<8x32xf32>
    %497 = vector.extract_strided_slice %490 {offsets = [0, 32], sizes = [8, 32], strides = [1, 1]} : vector<8x128xf32> to vector<8x32xf32>
    %498 = arith.negf %497 : vector<8x32xf32>
    %499 = math.exp %498 : vector<8x32xf32>
    %cst_225 = arith.constant 1.000000e+00 : f32
    %500 = vector.broadcast %cst_225 : f32 to vector<8x32xf32>
    %501 = arith.addf %500, %499 : vector<8x32xf32>
    %502 = arith.divf %500, %501 : vector<8x32xf32>
    %503 = vector.extract_strided_slice %490 {offsets = [0, 64], sizes = [8, 32], strides = [1, 1]} : vector<8x128xf32> to vector<8x32xf32>
    %504 = math.tanh %503 : vector<8x32xf32>
    %505 = vector.extract_strided_slice %490 {offsets = [0, 96], sizes = [8, 32], strides = [1, 1]} : vector<8x128xf32> to vector<8x32xf32>
    %506 = arith.negf %505 : vector<8x32xf32>
    %507 = math.exp %506 : vector<8x32xf32>
    %cst_226 = arith.constant 1.000000e+00 : f32
    %508 = vector.broadcast %cst_226 : f32 to vector<8x32xf32>
    %509 = arith.addf %508, %507 : vector<8x32xf32>
    %510 = arith.divf %508, %509 : vector<8x32xf32>
    %511 = arith.mulf %502, %486 : vector<8x32xf32>
    %512 = arith.mulf %496, %504 : vector<8x32xf32>
    %513 = arith.addf %511, %512 : vector<8x32xf32>
    %514 = math.tanh %513 : vector<8x32xf32>
    %515 = arith.mulf %510, %514 : vector<8x32xf32>
    %c5_227 = arith.constant 5 : index
    %c0_228 = arith.constant 0 : index
    %c0_229 = arith.constant 0 : index
    %516 = vector.load %arg3[%c5_227, %c0_228, %c0_229] : memref<8x8x1xf32, #tpu.memory_space<vmem>>, vector<1x8x1xf32>
    %517 = vector.shape_cast %516 : vector<1x8x1xf32> to vector<8x1xf32>
    %cst_230 = arith.constant 5.000000e-01 : f32
    %518 = vector.broadcast %cst_230 : f32 to vector<8x1xf32>
    %519 = arith.cmpf ogt, %517, %518 : vector<8x1xf32>
    %520 = vector.broadcast %517 : vector<8x1xf32> to vector<8x32xf32>
    %521 = arith.mulf %520, %515 : vector<8x32xf32>
    %c5_231 = arith.constant 5 : index
    %c0_232 = arith.constant 0 : index
    %c0_233 = arith.constant 0 : index
    %522 = vector.load %arg11[%c5_231, %c0_232, %c0_233] : memref<8x8x32xf32, #tpu.memory_space<vmem>>, vector<1x8x32xf32>
    %523 = vector.shape_cast %522 : vector<1x8x32xf32> to vector<8x32xf32>
    %524 = vector.shape_cast %521 : vector<8x32xf32> to vector<1x8x32xf32>
    tpu.vector_store %arg11[%c5_231, %c0_232, %c0_233], %524 {strides = array<i32>} : memref<8x8x32xf32, #tpu.memory_space<vmem>>, vector<1x8x32xf32>,
    %525 = vector.shape_cast %519 : vector<8x1xi1> to vector<8x1xi1>
    %526 = vector.broadcast %525 : vector<8x1xi1> to vector<8x32xi1>
    %527 = arith.select %526, %515, %485 : vector<8x32xi1>, vector<8x32xf32>
    %c0_234 = arith.constant 0 : index
    %c0_235 = arith.constant 0 : index
    %528 = vector.load %arg13[%c0_234, %c0_235] : memref<8x32xf32, #tpu.memory_space<vmem>>, vector<8x32xf32>
    tpu.vector_store %arg13[%c0_234, %c0_235], %527 {strides = array<i32>} : memref<8x32xf32, #tpu.memory_space<vmem>>, vector<8x32xf32>,
    %529 = vector.shape_cast %519 : vector<8x1xi1> to vector<8x1xi1>
    %530 = vector.broadcast %529 : vector<8x1xi1> to vector<8x32xi1>
    %531 = arith.select %530, %513, %486 : vector<8x32xi1>, vector<8x32xf32>
    %c0_236 = arith.constant 0 : index
    %c0_237 = arith.constant 0 : index
    %532 = vector.load %arg14[%c0_236, %c0_237] : memref<8x32xf32, #tpu.memory_space<vmem>>, vector<8x32xf32>
    tpu.vector_store %arg14[%c0_236, %c0_237], %531 {strides = array<i32>} : memref<8x32xf32, #tpu.memory_space<vmem>>, vector<8x32xf32>,
    %c0_238 = arith.constant 0 : index
    %c0_239 = arith.constant 0 : index
    %533 = vector.load %arg15[%c0_238, %c0_239] : memref<8x32xf32, #tpu.memory_space<vmem>>, vector<8x32xf32>
    %c0_240 = arith.constant 0 : index
    %c0_241 = arith.constant 0 : index
    %534 = vector.load %arg16[%c0_240, %c0_241] : memref<8x32xf32, #tpu.memory_space<vmem>>, vector<8x32xf32>
    %cst_242 = arith.constant dense<0.000000e+00> : vector<8x128xf32>
    %535 = tpu.matmul %533, %4, %cst_242 {dimension_numbers = #tpu.dot_dimension_numbers<[1], [0], [0], [1], [0, 0, 1, 1], [], []>} : vector<8x32xf32>, vector<32x128xf32>, vector<8x128xf32> -> vector<8x128xf32>
    %c2_243 = arith.constant 2 : index
    %c0_244 = arith.constant 0 : index
    %c0_245 = arith.constant 0 : index
    %536 = vector.load %arg2[%c2_243, %c0_244, %c0_245] : memref<8x8x128xf32, #tpu.memory_space<vmem>>, vector<1x8x128xf32>
    %537 = vector.shape_cast %536 : vector<1x8x128xf32> to vector<8x128xf32>
    %538 = arith.addf %535, %537 : vector<8x128xf32>
    %539 = vector.extract_strided_slice %538 {offsets = [0, 0], sizes = [8, 32], strides = [1, 1]} : vector<8x128xf32> to vector<8x32xf32>
    %540 = arith.negf %539 : vector<8x32xf32>
    %541 = math.exp %540 : vector<8x32xf32>
    %cst_246 = arith.constant 1.000000e+00 : f32
    %542 = vector.broadcast %cst_246 : f32 to vector<8x32xf32>
    %543 = arith.addf %542, %541 : vector<8x32xf32>
    %544 = arith.divf %542, %543 : vector<8x32xf32>
    %545 = vector.extract_strided_slice %538 {offsets = [0, 32], sizes = [8, 32], strides = [1, 1]} : vector<8x128xf32> to vector<8x32xf32>
    %546 = arith.negf %545 : vector<8x32xf32>
    %547 = math.exp %546 : vector<8x32xf32>
    %cst_247 = arith.constant 1.000000e+00 : f32
    %548 = vector.broadcast %cst_247 : f32 to vector<8x32xf32>
    %549 = arith.addf %548, %547 : vector<8x32xf32>
    %550 = arith.divf %548, %549 : vector<8x32xf32>
    %551 = vector.extract_strided_slice %538 {offsets = [0, 64], sizes = [8, 32], strides = [1, 1]} : vector<8x128xf32> to vector<8x32xf32>
    %552 = math.tanh %551 : vector<8x32xf32>
    %553 = vector.extract_strided_slice %538 {offsets = [0, 96], sizes = [8, 32], strides = [1, 1]} : vector<8x128xf32> to vector<8x32xf32>
    %554 = arith.negf %553 : vector<8x32xf32>
    %555 = math.exp %554 : vector<8x32xf32>
    %cst_248 = arith.constant 1.000000e+00 : f32
    %556 = vector.broadcast %cst_248 : f32 to vector<8x32xf32>
    %557 = arith.addf %556, %555 : vector<8x32xf32>
    %558 = arith.divf %556, %557 : vector<8x32xf32>
    %559 = arith.mulf %550, %534 : vector<8x32xf32>
    %560 = arith.mulf %544, %552 : vector<8x32xf32>
    %561 = arith.addf %559, %560 : vector<8x32xf32>
    %562 = math.tanh %561 : vector<8x32xf32>
    %563 = arith.mulf %558, %562 : vector<8x32xf32>
    %c2_249 = arith.constant 2 : index
    %c0_250 = arith.constant 0 : index
    %c0_251 = arith.constant 0 : index
    %564 = vector.load %arg4[%c2_249, %c0_250, %c0_251] : memref<8x8x1xf32, #tpu.memory_space<vmem>>, vector<1x8x1xf32>
    %565 = vector.shape_cast %564 : vector<1x8x1xf32> to vector<8x1xf32>
    %cst_252 = arith.constant 5.000000e-01 : f32
    %566 = vector.broadcast %cst_252 : f32 to vector<8x1xf32>
    %567 = arith.cmpf ogt, %565, %566 : vector<8x1xf32>
    %568 = vector.broadcast %565 : vector<8x1xf32> to vector<8x32xf32>
    %569 = arith.mulf %568, %563 : vector<8x32xf32>
    %c2_253 = arith.constant 2 : index
    %c0_254 = arith.constant 0 : index
    %c0_255 = arith.constant 0 : index
    %570 = vector.load %arg12[%c2_253, %c0_254, %c0_255] : memref<8x8x32xf32, #tpu.memory_space<vmem>>, vector<1x8x32xf32>
    %571 = vector.shape_cast %570 : vector<1x8x32xf32> to vector<8x32xf32>
    %572 = vector.shape_cast %569 : vector<8x32xf32> to vector<1x8x32xf32>
    tpu.vector_store %arg12[%c2_253, %c0_254, %c0_255], %572 {strides = array<i32>} : memref<8x8x32xf32, #tpu.memory_space<vmem>>, vector<1x8x32xf32>,
    %573 = vector.shape_cast %567 : vector<8x1xi1> to vector<8x1xi1>
    %574 = vector.broadcast %573 : vector<8x1xi1> to vector<8x32xi1>
    %575 = arith.select %574, %563, %533 : vector<8x32xi1>, vector<8x32xf32>
    %c0_256 = arith.constant 0 : index
    %c0_257 = arith.constant 0 : index
    %576 = vector.load %arg15[%c0_256, %c0_257] : memref<8x32xf32, #tpu.memory_space<vmem>>, vector<8x32xf32>
    tpu.vector_store %arg15[%c0_256, %c0_257], %575 {strides = array<i32>} : memref<8x32xf32, #tpu.memory_space<vmem>>, vector<8x32xf32>,
    %577 = vector.shape_cast %567 : vector<8x1xi1> to vector<8x1xi1>
    %578 = vector.broadcast %577 : vector<8x1xi1> to vector<8x32xi1>
    %579 = arith.select %578, %561, %534 : vector<8x32xi1>, vector<8x32xf32>
    %c0_258 = arith.constant 0 : index
    %c0_259 = arith.constant 0 : index
    %580 = vector.load %arg16[%c0_258, %c0_259] : memref<8x32xf32, #tpu.memory_space<vmem>>, vector<8x32xf32>
    tpu.vector_store %arg16[%c0_258, %c0_259], %579 {strides = array<i32>} : memref<8x32xf32, #tpu.memory_space<vmem>>, vector<8x32xf32>,
    %c0_260 = arith.constant 0 : index
    %c0_261 = arith.constant 0 : index
    %581 = vector.load %arg13[%c0_260, %c0_261] : memref<8x32xf32, #tpu.memory_space<vmem>>, vector<8x32xf32>
    %c0_262 = arith.constant 0 : index
    %c0_263 = arith.constant 0 : index
    %582 = vector.load %arg14[%c0_262, %c0_263] : memref<8x32xf32, #tpu.memory_space<vmem>>, vector<8x32xf32>
    %cst_264 = arith.constant dense<0.000000e+00> : vector<8x128xf32>
    %583 = tpu.matmul %581, %3, %cst_264 {dimension_numbers = #tpu.dot_dimension_numbers<[1], [0], [0], [1], [0, 0, 1, 1], [], []>} : vector<8x32xf32>, vector<32x128xf32>, vector<8x128xf32> -> vector<8x128xf32>
    %c6_265 = arith.constant 6 : index
    %c0_266 = arith.constant 0 : index
    %c0_267 = arith.constant 0 : index
    %584 = vector.load %arg1[%c6_265, %c0_266, %c0_267] : memref<8x8x128xf32, #tpu.memory_space<vmem>>, vector<1x8x128xf32>
    %585 = vector.shape_cast %584 : vector<1x8x128xf32> to vector<8x128xf32>
    %586 = arith.addf %583, %585 : vector<8x128xf32>
    %587 = vector.extract_strided_slice %586 {offsets = [0, 0], sizes = [8, 32], strides = [1, 1]} : vector<8x128xf32> to vector<8x32xf32>
    %588 = arith.negf %587 : vector<8x32xf32>
    %589 = math.exp %588 : vector<8x32xf32>
    %cst_268 = arith.constant 1.000000e+00 : f32
    %590 = vector.broadcast %cst_268 : f32 to vector<8x32xf32>
    %591 = arith.addf %590, %589 : vector<8x32xf32>
    %592 = arith.divf %590, %591 : vector<8x32xf32>
    %593 = vector.extract_strided_slice %586 {offsets = [0, 32], sizes = [8, 32], strides = [1, 1]} : vector<8x128xf32> to vector<8x32xf32>
    %594 = arith.negf %593 : vector<8x32xf32>
    %595 = math.exp %594 : vector<8x32xf32>
    %cst_269 = arith.constant 1.000000e+00 : f32
    %596 = vector.broadcast %cst_269 : f32 to vector<8x32xf32>
    %597 = arith.addf %596, %595 : vector<8x32xf32>
    %598 = arith.divf %596, %597 : vector<8x32xf32>
    %599 = vector.extract_strided_slice %586 {offsets = [0, 64], sizes = [8, 32], strides = [1, 1]} : vector<8x128xf32> to vector<8x32xf32>
    %600 = math.tanh %599 : vector<8x32xf32>
    %601 = vector.extract_strided_slice %586 {offsets = [0, 96], sizes = [8, 32], strides = [1, 1]} : vector<8x128xf32> to vector<8x32xf32>
    %602 = arith.negf %601 : vector<8x32xf32>
    %603 = math.exp %602 : vector<8x32xf32>
    %cst_270 = arith.constant 1.000000e+00 : f32
    %604 = vector.broadcast %cst_270 : f32 to vector<8x32xf32>
    %605 = arith.addf %604, %603 : vector<8x32xf32>
    %606 = arith.divf %604, %605 : vector<8x32xf32>
    %607 = arith.mulf %598, %582 : vector<8x32xf32>
    %608 = arith.mulf %592, %600 : vector<8x32xf32>
    %609 = arith.addf %607, %608 : vector<8x32xf32>
    %610 = math.tanh %609 : vector<8x32xf32>
    %611 = arith.mulf %606, %610 : vector<8x32xf32>
    %c6_271 = arith.constant 6 : index
    %c0_272 = arith.constant 0 : index
    %c0_273 = arith.constant 0 : index
    %612 = vector.load %arg3[%c6_271, %c0_272, %c0_273] : memref<8x8x1xf32, #tpu.memory_space<vmem>>, vector<1x8x1xf32>
    %613 = vector.shape_cast %612 : vector<1x8x1xf32> to vector<8x1xf32>
    %cst_274 = arith.constant 5.000000e-01 : f32
    %614 = vector.broadcast %cst_274 : f32 to vector<8x1xf32>
    %615 = arith.cmpf ogt, %613, %614 : vector<8x1xf32>
    %616 = vector.broadcast %613 : vector<8x1xf32> to vector<8x32xf32>
    %617 = arith.mulf %616, %611 : vector<8x32xf32>
    %c6_275 = arith.constant 6 : index
    %c0_276 = arith.constant 0 : index
    %c0_277 = arith.constant 0 : index
    %618 = vector.load %arg11[%c6_275, %c0_276, %c0_277] : memref<8x8x32xf32, #tpu.memory_space<vmem>>, vector<1x8x32xf32>
    %619 = vector.shape_cast %618 : vector<1x8x32xf32> to vector<8x32xf32>
    %620 = vector.shape_cast %617 : vector<8x32xf32> to vector<1x8x32xf32>
    tpu.vector_store %arg11[%c6_275, %c0_276, %c0_277], %620 {strides = array<i32>} : memref<8x8x32xf32, #tpu.memory_space<vmem>>, vector<1x8x32xf32>,
    %621 = vector.shape_cast %615 : vector<8x1xi1> to vector<8x1xi1>
    %622 = vector.broadcast %621 : vector<8x1xi1> to vector<8x32xi1>
    %623 = arith.select %622, %611, %581 : vector<8x32xi1>, vector<8x32xf32>
    %c0_278 = arith.constant 0 : index
    %c0_279 = arith.constant 0 : index
    %624 = vector.load %arg13[%c0_278, %c0_279] : memref<8x32xf32, #tpu.memory_space<vmem>>, vector<8x32xf32>
    tpu.vector_store %arg13[%c0_278, %c0_279], %623 {strides = array<i32>} : memref<8x32xf32, #tpu.memory_space<vmem>>, vector<8x32xf32>,
    %625 = vector.shape_cast %615 : vector<8x1xi1> to vector<8x1xi1>
    %626 = vector.broadcast %625 : vector<8x1xi1> to vector<8x32xi1>
    %627 = arith.select %626, %609, %582 : vector<8x32xi1>, vector<8x32xf32>
    %c0_280 = arith.constant 0 : index
    %c0_281 = arith.constant 0 : index
    %628 = vector.load %arg14[%c0_280, %c0_281] : memref<8x32xf32, #tpu.memory_space<vmem>>, vector<8x32xf32>
    tpu.vector_store %arg14[%c0_280, %c0_281], %627 {strides = array<i32>} : memref<8x32xf32, #tpu.memory_space<vmem>>, vector<8x32xf32>,
    %c0_282 = arith.constant 0 : index
    %c0_283 = arith.constant 0 : index
    %629 = vector.load %arg15[%c0_282, %c0_283] : memref<8x32xf32, #tpu.memory_space<vmem>>, vector<8x32xf32>
    %c0_284 = arith.constant 0 : index
    %c0_285 = arith.constant 0 : index
    %630 = vector.load %arg16[%c0_284, %c0_285] : memref<8x32xf32, #tpu.memory_space<vmem>>, vector<8x32xf32>
    %cst_286 = arith.constant dense<0.000000e+00> : vector<8x128xf32>
    %631 = tpu.matmul %629, %4, %cst_286 {dimension_numbers = #tpu.dot_dimension_numbers<[1], [0], [0], [1], [0, 0, 1, 1], [], []>} : vector<8x32xf32>, vector<32x128xf32>, vector<8x128xf32> -> vector<8x128xf32>
    %c1_287 = arith.constant 1 : index
    %c0_288 = arith.constant 0 : index
    %c0_289 = arith.constant 0 : index
    %632 = vector.load %arg2[%c1_287, %c0_288, %c0_289] : memref<8x8x128xf32, #tpu.memory_space<vmem>>, vector<1x8x128xf32>
    %633 = vector.shape_cast %632 : vector<1x8x128xf32> to vector<8x128xf32>
    %634 = arith.addf %631, %633 : vector<8x128xf32>
    %635 = vector.extract_strided_slice %634 {offsets = [0, 0], sizes = [8, 32], strides = [1, 1]} : vector<8x128xf32> to vector<8x32xf32>
    %636 = arith.negf %635 : vector<8x32xf32>
    %637 = math.exp %636 : vector<8x32xf32>
    %cst_290 = arith.constant 1.000000e+00 : f32
    %638 = vector.broadcast %cst_290 : f32 to vector<8x32xf32>
    %639 = arith.addf %638, %637 : vector<8x32xf32>
    %640 = arith.divf %638, %639 : vector<8x32xf32>
    %641 = vector.extract_strided_slice %634 {offsets = [0, 32], sizes = [8, 32], strides = [1, 1]} : vector<8x128xf32> to vector<8x32xf32>
    %642 = arith.negf %641 : vector<8x32xf32>
    %643 = math.exp %642 : vector<8x32xf32>
    %cst_291 = arith.constant 1.000000e+00 : f32
    %644 = vector.broadcast %cst_291 : f32 to vector<8x32xf32>
    %645 = arith.addf %644, %643 : vector<8x32xf32>
    %646 = arith.divf %644, %645 : vector<8x32xf32>
    %647 = vector.extract_strided_slice %634 {offsets = [0, 64], sizes = [8, 32], strides = [1, 1]} : vector<8x128xf32> to vector<8x32xf32>
    %648 = math.tanh %647 : vector<8x32xf32>
    %649 = vector.extract_strided_slice %634 {offsets = [0, 96], sizes = [8, 32], strides = [1, 1]} : vector<8x128xf32> to vector<8x32xf32>
    %650 = arith.negf %649 : vector<8x32xf32>
    %651 = math.exp %650 : vector<8x32xf32>
    %cst_292 = arith.constant 1.000000e+00 : f32
    %652 = vector.broadcast %cst_292 : f32 to vector<8x32xf32>
    %653 = arith.addf %652, %651 : vector<8x32xf32>
    %654 = arith.divf %652, %653 : vector<8x32xf32>
    %655 = arith.mulf %646, %630 : vector<8x32xf32>
    %656 = arith.mulf %640, %648 : vector<8x32xf32>
    %657 = arith.addf %655, %656 : vector<8x32xf32>
    %658 = math.tanh %657 : vector<8x32xf32>
    %659 = arith.mulf %654, %658 : vector<8x32xf32>
    %c1_293 = arith.constant 1 : index
    %c0_294 = arith.constant 0 : index
    %c0_295 = arith.constant 0 : index
    %660 = vector.load %arg4[%c1_293, %c0_294, %c0_295] : memref<8x8x1xf32, #tpu.memory_space<vmem>>, vector<1x8x1xf32>
    %661 = vector.shape_cast %660 : vector<1x8x1xf32> to vector<8x1xf32>
    %cst_296 = arith.constant 5.000000e-01 : f32
    %662 = vector.broadcast %cst_296 : f32 to vector<8x1xf32>
    %663 = arith.cmpf ogt, %661, %662 : vector<8x1xf32>
    %664 = vector.broadcast %661 : vector<8x1xf32> to vector<8x32xf32>
    %665 = arith.mulf %664, %659 : vector<8x32xf32>
    %c1_297 = arith.constant 1 : index
    %c0_298 = arith.constant 0 : index
    %c0_299 = arith.constant 0 : index
    %666 = vector.load %arg12[%c1_297, %c0_298, %c0_299] : memref<8x8x32xf32, #tpu.memory_space<vmem>>, vector<1x8x32xf32>
    %667 = vector.shape_cast %666 : vector<1x8x32xf32> to vector<8x32xf32>
    %668 = vector.shape_cast %665 : vector<8x32xf32> to vector<1x8x32xf32>
    tpu.vector_store %arg12[%c1_297, %c0_298, %c0_299], %668 {strides = array<i32>} : memref<8x8x32xf32, #tpu.memory_space<vmem>>, vector<1x8x32xf32>,
    %669 = vector.shape_cast %663 : vector<8x1xi1> to vector<8x1xi1>
    %670 = vector.broadcast %669 : vector<8x1xi1> to vector<8x32xi1>
    %671 = arith.select %670, %659, %629 : vector<8x32xi1>, vector<8x32xf32>
    %c0_300 = arith.constant 0 : index
    %c0_301 = arith.constant 0 : index
    %672 = vector.load %arg15[%c0_300, %c0_301] : memref<8x32xf32, #tpu.memory_space<vmem>>, vector<8x32xf32>
    tpu.vector_store %arg15[%c0_300, %c0_301], %671 {strides = array<i32>} : memref<8x32xf32, #tpu.memory_space<vmem>>, vector<8x32xf32>,
    %673 = vector.shape_cast %663 : vector<8x1xi1> to vector<8x1xi1>
    %674 = vector.broadcast %673 : vector<8x1xi1> to vector<8x32xi1>
    %675 = arith.select %674, %657, %630 : vector<8x32xi1>, vector<8x32xf32>
    %c0_302 = arith.constant 0 : index
    %c0_303 = arith.constant 0 : index
    %676 = vector.load %arg16[%c0_302, %c0_303] : memref<8x32xf32, #tpu.memory_space<vmem>>, vector<8x32xf32>
    tpu.vector_store %arg16[%c0_302, %c0_303], %675 {strides = array<i32>} : memref<8x32xf32, #tpu.memory_space<vmem>>, vector<8x32xf32>,
    %c0_304 = arith.constant 0 : index
    %c0_305 = arith.constant 0 : index
    %677 = vector.load %arg13[%c0_304, %c0_305] : memref<8x32xf32, #tpu.memory_space<vmem>>, vector<8x32xf32>
    %c0_306 = arith.constant 0 : index
    %c0_307 = arith.constant 0 : index
    %678 = vector.load %arg14[%c0_306, %c0_307] : memref<8x32xf32, #tpu.memory_space<vmem>>, vector<8x32xf32>
    %cst_308 = arith.constant dense<0.000000e+00> : vector<8x128xf32>
    %679 = tpu.matmul %677, %3, %cst_308 {dimension_numbers = #tpu.dot_dimension_numbers<[1], [0], [0], [1], [0, 0, 1, 1], [], []>} : vector<8x32xf32>, vector<32x128xf32>, vector<8x128xf32> -> vector<8x128xf32>
    %c7_309 = arith.constant 7 : index
    %c0_310 = arith.constant 0 : index
    %c0_311 = arith.constant 0 : index
    %680 = vector.load %arg1[%c7_309, %c0_310, %c0_311] : memref<8x8x128xf32, #tpu.memory_space<vmem>>, vector<1x8x128xf32>
    %681 = vector.shape_cast %680 : vector<1x8x128xf32> to vector<8x128xf32>
    %682 = arith.addf %679, %681 : vector<8x128xf32>
    %683 = vector.extract_strided_slice %682 {offsets = [0, 0], sizes = [8, 32], strides = [1, 1]} : vector<8x128xf32> to vector<8x32xf32>
    %684 = arith.negf %683 : vector<8x32xf32>
    %685 = math.exp %684 : vector<8x32xf32>
    %cst_312 = arith.constant 1.000000e+00 : f32
    %686 = vector.broadcast %cst_312 : f32 to vector<8x32xf32>
    %687 = arith.addf %686, %685 : vector<8x32xf32>
    %688 = arith.divf %686, %687 : vector<8x32xf32>
    %689 = vector.extract_strided_slice %682 {offsets = [0, 32], sizes = [8, 32], strides = [1, 1]} : vector<8x128xf32> to vector<8x32xf32>
    %690 = arith.negf %689 : vector<8x32xf32>
    %691 = math.exp %690 : vector<8x32xf32>
    %cst_313 = arith.constant 1.000000e+00 : f32
    %692 = vector.broadcast %cst_313 : f32 to vector<8x32xf32>
    %693 = arith.addf %692, %691 : vector<8x32xf32>
    %694 = arith.divf %692, %693 : vector<8x32xf32>
    %695 = vector.extract_strided_slice %682 {offsets = [0, 64], sizes = [8, 32], strides = [1, 1]} : vector<8x128xf32> to vector<8x32xf32>
    %696 = math.tanh %695 : vector<8x32xf32>
    %697 = vector.extract_strided_slice %682 {offsets = [0, 96], sizes = [8, 32], strides = [1, 1]} : vector<8x128xf32> to vector<8x32xf32>
    %698 = arith.negf %697 : vector<8x32xf32>
    %699 = math.exp %698 : vector<8x32xf32>
    %cst_314 = arith.constant 1.000000e+00 : f32
    %700 = vector.broadcast %cst_314 : f32 to vector<8x32xf32>
    %701 = arith.addf %700, %699 : vector<8x32xf32>
    %702 = arith.divf %700, %701 : vector<8x32xf32>
    %703 = arith.mulf %694, %678 : vector<8x32xf32>
    %704 = arith.mulf %688, %696 : vector<8x32xf32>
    %705 = arith.addf %703, %704 : vector<8x32xf32>
    %706 = math.tanh %705 : vector<8x32xf32>
    %707 = arith.mulf %702, %706 : vector<8x32xf32>
    %c7_315 = arith.constant 7 : index
    %c0_316 = arith.constant 0 : index
    %c0_317 = arith.constant 0 : index
    %708 = vector.load %arg3[%c7_315, %c0_316, %c0_317] : memref<8x8x1xf32, #tpu.memory_space<vmem>>, vector<1x8x1xf32>
    %709 = vector.shape_cast %708 : vector<1x8x1xf32> to vector<8x1xf32>
    %cst_318 = arith.constant 5.000000e-01 : f32
    %710 = vector.broadcast %cst_318 : f32 to vector<8x1xf32>
    %711 = arith.cmpf ogt, %709, %710 : vector<8x1xf32>
    %712 = vector.broadcast %709 : vector<8x1xf32> to vector<8x32xf32>
    %713 = arith.mulf %712, %707 : vector<8x32xf32>
    %c7_319 = arith.constant 7 : index
    %c0_320 = arith.constant 0 : index
    %c0_321 = arith.constant 0 : index
    %714 = vector.load %arg11[%c7_319, %c0_320, %c0_321] : memref<8x8x32xf32, #tpu.memory_space<vmem>>, vector<1x8x32xf32>
    %715 = vector.shape_cast %714 : vector<1x8x32xf32> to vector<8x32xf32>
    %716 = vector.shape_cast %713 : vector<8x32xf32> to vector<1x8x32xf32>
    tpu.vector_store %arg11[%c7_319, %c0_320, %c0_321], %716 {strides = array<i32>} : memref<8x8x32xf32, #tpu.memory_space<vmem>>, vector<1x8x32xf32>,
    %717 = vector.shape_cast %711 : vector<8x1xi1> to vector<8x1xi1>
    %718 = vector.broadcast %717 : vector<8x1xi1> to vector<8x32xi1>
    %719 = arith.select %718, %707, %677 : vector<8x32xi1>, vector<8x32xf32>
    %c0_322 = arith.constant 0 : index
    %c0_323 = arith.constant 0 : index
    %720 = vector.load %arg13[%c0_322, %c0_323] : memref<8x32xf32, #tpu.memory_space<vmem>>, vector<8x32xf32>
    tpu.vector_store %arg13[%c0_322, %c0_323], %719 {strides = array<i32>} : memref<8x32xf32, #tpu.memory_space<vmem>>, vector<8x32xf32>,
    %721 = vector.shape_cast %711 : vector<8x1xi1> to vector<8x1xi1>
    %722 = vector.broadcast %721 : vector<8x1xi1> to vector<8x32xi1>
    %723 = arith.select %722, %705, %678 : vector<8x32xi1>, vector<8x32xf32>
    %c0_324 = arith.constant 0 : index
    %c0_325 = arith.constant 0 : index
    %724 = vector.load %arg14[%c0_324, %c0_325] : memref<8x32xf32, #tpu.memory_space<vmem>>, vector<8x32xf32>
    tpu.vector_store %arg14[%c0_324, %c0_325], %723 {strides = array<i32>} : memref<8x32xf32, #tpu.memory_space<vmem>>, vector<8x32xf32>,
    %c0_326 = arith.constant 0 : index
    %c0_327 = arith.constant 0 : index
    %725 = vector.load %arg15[%c0_326, %c0_327] : memref<8x32xf32, #tpu.memory_space<vmem>>, vector<8x32xf32>
    %c0_328 = arith.constant 0 : index
    %c0_329 = arith.constant 0 : index
    %726 = vector.load %arg16[%c0_328, %c0_329] : memref<8x32xf32, #tpu.memory_space<vmem>>, vector<8x32xf32>
    %cst_330 = arith.constant dense<0.000000e+00> : vector<8x128xf32>
    %727 = tpu.matmul %725, %4, %cst_330 {dimension_numbers = #tpu.dot_dimension_numbers<[1], [0], [0], [1], [0, 0, 1, 1], [], []>} : vector<8x32xf32>, vector<32x128xf32>, vector<8x128xf32> -> vector<8x128xf32>
    %c0_331 = arith.constant 0 : index
    %c0_332 = arith.constant 0 : index
    %c0_333 = arith.constant 0 : index
    %728 = vector.load %arg2[%c0_331, %c0_332, %c0_333] : memref<8x8x128xf32, #tpu.memory_space<vmem>>, vector<1x8x128xf32>
    %729 = vector.shape_cast %728 : vector<1x8x128xf32> to vector<8x128xf32>
    %730 = arith.addf %727, %729 : vector<8x128xf32>
    %731 = vector.extract_strided_slice %730 {offsets = [0, 0], sizes = [8, 32], strides = [1, 1]} : vector<8x128xf32> to vector<8x32xf32>
    %732 = arith.negf %731 : vector<8x32xf32>
    %733 = math.exp %732 : vector<8x32xf32>
    %cst_334 = arith.constant 1.000000e+00 : f32
    %734 = vector.broadcast %cst_334 : f32 to vector<8x32xf32>
    %735 = arith.addf %734, %733 : vector<8x32xf32>
    %736 = arith.divf %734, %735 : vector<8x32xf32>
    %737 = vector.extract_strided_slice %730 {offsets = [0, 32], sizes = [8, 32], strides = [1, 1]} : vector<8x128xf32> to vector<8x32xf32>
    %738 = arith.negf %737 : vector<8x32xf32>
    %739 = math.exp %738 : vector<8x32xf32>
    %cst_335 = arith.constant 1.000000e+00 : f32
    %740 = vector.broadcast %cst_335 : f32 to vector<8x32xf32>
    %741 = arith.addf %740, %739 : vector<8x32xf32>
    %742 = arith.divf %740, %741 : vector<8x32xf32>
    %743 = vector.extract_strided_slice %730 {offsets = [0, 64], sizes = [8, 32], strides = [1, 1]} : vector<8x128xf32> to vector<8x32xf32>
    %744 = math.tanh %743 : vector<8x32xf32>
    %745 = vector.extract_strided_slice %730 {offsets = [0, 96], sizes = [8, 32], strides = [1, 1]} : vector<8x128xf32> to vector<8x32xf32>
    %746 = arith.negf %745 : vector<8x32xf32>
    %747 = math.exp %746 : vector<8x32xf32>
    %cst_336 = arith.constant 1.000000e+00 : f32
    %748 = vector.broadcast %cst_336 : f32 to vector<8x32xf32>
    %749 = arith.addf %748, %747 : vector<8x32xf32>
    %750 = arith.divf %748, %749 : vector<8x32xf32>
    %751 = arith.mulf %742, %726 : vector<8x32xf32>
    %752 = arith.mulf %736, %744 : vector<8x32xf32>
    %753 = arith.addf %751, %752 : vector<8x32xf32>
    %754 = math.tanh %753 : vector<8x32xf32>
    %755 = arith.mulf %750, %754 : vector<8x32xf32>
    %c0_337 = arith.constant 0 : index
    %c0_338 = arith.constant 0 : index
    %c0_339 = arith.constant 0 : index
    %756 = vector.load %arg4[%c0_337, %c0_338, %c0_339] : memref<8x8x1xf32, #tpu.memory_space<vmem>>, vector<1x8x1xf32>
    %757 = vector.shape_cast %756 : vector<1x8x1xf32> to vector<8x1xf32>
    %cst_340 = arith.constant 5.000000e-01 : f32
    %758 = vector.broadcast %cst_340 : f32 to vector<8x1xf32>
    %759 = arith.cmpf ogt, %757, %758 : vector<8x1xf32>
    %760 = vector.broadcast %757 : vector<8x1xf32> to vector<8x32xf32>
    %761 = arith.mulf %760, %755 : vector<8x32xf32>
    %c0_341 = arith.constant 0 : index
    %c0_342 = arith.constant 0 : index
    %c0_343 = arith.constant 0 : index
    %762 = vector.load %arg12[%c0_341, %c0_342, %c0_343] : memref<8x8x32xf32, #tpu.memory_space<vmem>>, vector<1x8x32xf32>
    %763 = vector.shape_cast %762 : vector<1x8x32xf32> to vector<8x32xf32>
    %764 = vector.shape_cast %761 : vector<8x32xf32> to vector<1x8x32xf32>
    tpu.vector_store %arg12[%c0_341, %c0_342, %c0_343], %764 {strides = array<i32>} : memref<8x8x32xf32, #tpu.memory_space<vmem>>, vector<1x8x32xf32>,
    %765 = vector.shape_cast %759 : vector<8x1xi1> to vector<8x1xi1>
    %766 = vector.broadcast %765 : vector<8x1xi1> to vector<8x32xi1>
    %767 = arith.select %766, %755, %725 : vector<8x32xi1>, vector<8x32xf32>
    %c0_344 = arith.constant 0 : index
    %c0_345 = arith.constant 0 : index
    %768 = vector.load %arg15[%c0_344, %c0_345] : memref<8x32xf32, #tpu.memory_space<vmem>>, vector<8x32xf32>
    tpu.vector_store %arg15[%c0_344, %c0_345], %767 {strides = array<i32>} : memref<8x32xf32, #tpu.memory_space<vmem>>, vector<8x32xf32>,
    %769 = vector.shape_cast %759 : vector<8x1xi1> to vector<8x1xi1>
    %770 = vector.broadcast %769 : vector<8x1xi1> to vector<8x32xi1>
    %771 = arith.select %770, %753, %726 : vector<8x32xi1>, vector<8x32xf32>
    %c0_346 = arith.constant 0 : index
    %c0_347 = arith.constant 0 : index
    %772 = vector.load %arg16[%c0_346, %c0_347] : memref<8x32xf32, #tpu.memory_space<vmem>>, vector<8x32xf32>
    tpu.vector_store %arg16[%c0_346, %c0_347], %771 {strides = array<i32>} : memref<8x32xf32, #tpu.memory_space<vmem>>, vector<8x32xf32>,
    return
  }
  func.func @transform_0(%arg0: i32) -> (i32, i32, i32) {
    %c0_i32 = arith.constant 0 : i32
    %c0_i32_0 = arith.constant 0 : i32
    %c0_i32_1 = arith.constant 0 : i32
    return %arg0, %c0_i32, %c0_i32_0 : i32, i32, i32
  }
  func.func @transform_1(%arg0: i32) -> (i32, i32, i32) {
    %c1_i32 = arith.constant 1 : i32
    %0 = arith.subi %c1_i32, %arg0 : i32
    %c0_i32 = arith.constant 0 : i32
    %c0_i32_0 = arith.constant 0 : i32
    %c0_i32_1 = arith.constant 0 : i32
    return %0, %c0_i32, %c0_i32_0 : i32, i32, i32
  }
  func.func @transform_2(%arg0: i32) -> (i32, i32, i32) {
    %c0_i32 = arith.constant 0 : i32
    %c0_i32_0 = arith.constant 0 : i32
    %c0_i32_1 = arith.constant 0 : i32
    return %arg0, %c0_i32, %c0_i32_0 : i32, i32, i32
  }
  func.func @transform_3(%arg0: i32) -> (i32, i32, i32) {
    %c1_i32 = arith.constant 1 : i32
    %0 = arith.subi %c1_i32, %arg0 : i32
    %c0_i32 = arith.constant 0 : i32
    %c0_i32_0 = arith.constant 0 : i32
    %c0_i32_1 = arith.constant 0 : i32
    return %0, %c0_i32, %c0_i32_0 : i32, i32, i32
  }
  func.func @transform_4(%arg0: i32) -> (i32, i32) {
    %c0_i32 = arith.constant 0 : i32
    %c0_i32_0 = arith.constant 0 : i32
    %c0_i32_1 = arith.constant 0 : i32
    return %c0_i32, %c0_i32_0 : i32, i32
  }
  func.func @transform_5(%arg0: i32) -> (i32, i32) {
    %c0_i32 = arith.constant 0 : i32
    %c0_i32_0 = arith.constant 0 : i32
    %c0_i32_1 = arith.constant 0 : i32
    return %c0_i32, %c0_i32_0 : i32, i32
  }
  func.func @transform_6(%arg0: i32) -> (i32, i32) {
    %c0_i32 = arith.constant 0 : i32
    %c0_i32_0 = arith.constant 0 : i32
    %c0_i32_1 = arith.constant 0 : i32
    return %c0_i32, %c0_i32_0 : i32, i32
  }
  func.func @transform_7(%arg0: i32) -> (i32, i32) {
    %c0_i32 = arith.constant 0 : i32
    %c0_i32_0 = arith.constant 0 : i32
    %c0_i32_1 = arith.constant 0 : i32
    return %c0_i32, %c0_i32_0 : i32, i32
  }
  func.func @transform_8(%arg0: i32) -> (i32, i32) {
    %c0_i32 = arith.constant 0 : i32
    %c0_i32_0 = arith.constant 0 : i32
    %c0_i32_1 = arith.constant 0 : i32
    return %c0_i32, %c0_i32_0 : i32, i32
  }
  func.func @transform_9(%arg0: i32) -> (i32, i32) {
    %c0_i32 = arith.constant 0 : i32
    %c0_i32_0 = arith.constant 0 : i32
    %c0_i32_1 = arith.constant 0 : i32
    return %c0_i32, %c0_i32_0 : i32, i32
  }
  func.func @transform_10(%arg0: i32) -> (i32, i32, i32) {
    %c0_i32 = arith.constant 0 : i32
    %c0_i32_0 = arith.constant 0 : i32
    %c0_i32_1 = arith.constant 0 : i32
    return %arg0, %c0_i32, %c0_i32_0 : i32, i32, i32
  }
  func.func @transform_11(%arg0: i32) -> (i32, i32, i32) {
    %c1_i32 = arith.constant 1 : i32
    %0 = arith.subi %c1_i32, %arg0 : i32
    %c0_i32 = arith.constant 0 : i32
    %c0_i32_0 = arith.constant 0 : i32
    %c0_i32_1 = arith.constant 0 : i32
    return %0, %c0_i32, %c0_i32_0 : i32, i32, i32
  }
}

</mosaic_0001>

<bundles_post_ra>
// kernel: tpu_custom_call.1
= control target key start
LH: loop header
LB: loop body
LE: loop exit
PB: predicated region body
PF: predicated region fallthrough
CT: control target
= control target key end

     0   :  { %s4866_s0 = inlined_call_operand.vmem [shape: f32[16,8,128], index: 0, kind: input, shape index: {}]   ;;  %s4867_s1 = inlined_call_operand.vmem [shape: f32[16,8,128], index: 1, kind: input, shape index: {}]   ;;  %s4868_s2 = inlined_call_operand.vmem [shape: f32[16,8,1], index: 2, kind: input, shape index: {}]   ;;  %s4869_s3 = inlined_call_operand.vmem [shape: f32[16,8,1], index: 3, kind: input, shape index: {}]   ;;  %s4870_s4 = inlined_call_operand.vmem [shape: f32[8,32], index: 4, kind: input, shape index: {}]   ;;  %s4871_s5 = inlined_call_operand.hbm [shape: f32[8,32], index: 5, kind: input, shape index: {}]   ;;  %s4872_s6 = inlined_call_operand.vmem [shape: f32[8,32], index: 6, kind: input, shape index: {}]   ;;  %s4873_s7 = inlined_call_operand.hbm [shape: f32[8,32], index: 7, kind: input, shape index: {}]   ;;  %s4874_s8 = inlined_call_operand.hbm [shape: f32[32,128], index: 8, kind: input, shape index: {}]   ;;  %s4875_s9 = inlined_call_operand.hbm [shape: f32[32,128], index: 9, kind: input, shape index: {}]   ;;  %s4876_s10 = inlined_call_operand.hbm [shape: f32[16,8,32], index: 10, kind: output, shape index: {0}]   ;;  %s4877_s11 = inlined_call_operand.hbm [shape: f32[16,8,32], index: 11, kind: output, shape index: {1}]  }
   0x1   :  { %4894 = sst [smem:[#allocation32_spill]] %s4871_s5 }
   0x2   :  { %4895 = sst [smem:[#allocation33_spill]] %s4873_s7 }
   0x3   :  { %4896 = sst [smem:[#allocation34_spill]] %s4874_s8 }
   0x4   :  { %4897 = sst [smem:[#allocation35_spill]] %s4875_s9 }
   0x5   :  { %17 = vsyncpa [#allocation7], 0 }
   0x6   :  { %18 = vsyncpa [#allocation10], 0 }
   0x7   :  { %19 = vsyncpa [#allocation13], 0 }
   0x8   :  { %20 = vsyncpa [#allocation8], 0 }
   0x9   :  { %22 = vsyncpa [#allocation8 + $0x1], 0 }
   0xa   :  { %23 = vsyncpa [#allocation16], 0 }
   0xb   :  { %25 = vsyncpa [#allocation16 + $0x1], 0  ;;  %s3935_s17 = smov 0   ;;  %s3937_s18 = smov 0  }
   0xc   :  { %s3939_s19 = smov 0   ;;  %s3941_s20 = smov 0  }
   0xd   :  { %s3943_s21 = smov 0   ;;  %s3945_s22 = smov 0  }
   0xe   :  { %s3947_s23 = smov 0  }
   0xf LB: > { %4898 = sst [smem:[#allocation22_spill]] %s3833_s17  ;;  %s3971_s24 = sadd.s32 4294967295, %s3857_s23   ;;  %s3857_s23 = sphi %s3947_s23, %s4939_s23   ;;  %s3853_s22 = sphi %s3945_s22, %s4943_s22   ;;  %s3849_s21 = sphi %s3943_s21, %s4947_s21   ;;  %s3845_s20 = sphi %s3941_s20, %s4946_s20   ;;  %s3841_s19 = sphi %s3939_s19, %s4941_s19   ;;  %s3837_s18 = sphi %s3937_s18, %s4945_s18   ;;  %s3833_s17 = sphi %s3935_s17, %s4944_s17  }
  0x10   : > { %4899 = sst [smem:[#allocation23_spill]] %s3841_s19  ;;  %s3001_s25 = sadd.s32 4294967294, %s3857_s23  }
  0x11   : > { %4900 = sst [smem:[#allocation24_spill]] %s3845_s20  ;;  %s3975_s26 = sadd.s32 1, %s3857_s23  }
  0x12   : > { %4901 = sst [smem:[#allocation25_spill]] %s3853_s22  ;;  %s272_s27 = sadd.s32 1, %s3853_s22 }
  0x13   : > { %4902 = sst [smem:[#allocation26_spill]] %s3857_s23  ;;  %s269_s28 = ssub.s32 %s3857_s23, %s3975_s26 }
  0x14   : > { %4903 = sst [smem:[#allocation27_spill]] %s3975_s26  ;;  %p282_p0 = scmp.ne.s32.totalorder %s3853_s22, %s3849_s21 }
  0x15   : > { %p270_p1 = scmp.eq.s32.totalorder %s269_s28, 0  ;;  %p283_p2 = scmp.eq.s32.totalorder %s3971_s24, 1 }
  0x16   : > { %p288_p3 = scmp.ne.s32.totalorder %s3849_s21, %s3845_s20  ;;  %p3985_p4 = scmp.eq.s32.totalorder %s3001_s25, 1 }
  0x17   : > { %s3990_s30 = scalar_select %p270_p1, %s3853_s22, %s272_s27  }
  0x18   : > { %p3994_p5 = por %p283_p2, %p282_p0  ;;  %p4000_p6 = por %p3985_p4, %p288_p3 }
  0x19   : > { %4905 = sst [smem:[#allocation28_spill]] %s3990_s30  ;;  %s295_s14 = ssub.s32 1, %s3857_s23 }
  0x1a   : > { %s4906_s12 = scalar_select %p3994_p5, 1, 0 }
  0x1b   : > { %s4907_s13 = scalar_select %p4000_p6, 1, 0 }
  0x1c   : > { %s296_s15 = ssub.s32 1, %s3975_s26  ;;  %s300_s25 = sadd.s32 1, %s3841_s19 }
  0x1d   : > { %4908 = sst [smem:[#allocation29_spill]] %s4907_s13  ;;  %s297_s16 = ssub.s32 %s295_s14, %s296_s15 }
  0x1e   : > { %p298_p7 = scmp.eq.s32.totalorder %s297_s16, 0  ;;  %p310_p8 = scmp.ne.s32.totalorder %s3841_s19, %s3837_s18 }
  0x1f   : > { %p316_p9 = scmp.ne.s32.totalorder %s3837_s18, %s3833_s17  ;;  %p3002_p10 = scmp.ge.s32.totalorder %s3857_s23, 1 }
  0x20   : > { %s4013_s27 = scalar_select %p298_p7, %s3841_s19, %s300_s25  }
  0x21   : > { %p4017_p11 = por %p310_p8, %p283_p2  ;;  %p4023_p12 = por %p316_p9, %p3985_p4 }
  0x22   : > { %4909 = sst [smem:[#allocation30_spill]] %s4013_s27  ;;  %p324_p13 = scmp.lt.s32.totalorder %s3857_s23, 3 }
  0x23   : > { %s4910_s28 = scalar_select %p4017_p11, 1, 0 }
  0x24   : > { %s4911_s30 = scalar_select %p4023_p12, 1, 0 }
  0x25   : > { %p4880_p1 = scmp.eq.s32.totalorder %s3971_s24, 0  ;;  %p4030_p3 = pnand %p3002_p10, %p324_p13 }
  0x26   : > { %4912 = sst [smem:[#allocation31_spill]] %s4911_s30  ;;  %s3859_s15 = smov [#allocation9]  }
  0x27   : > { %s4913_s14 = scalar_select %p4030_p3, 1, 0 }
  0x28   : > { %s354_s16 = sshll.u32 %s3859_s15, 4  ;;  %p3384_p2 = pneg %p4030_p3  ;;  %s355_s16 = int_to_ptr.vmem [resolvable:$true] %s354_s16 }
  0x29   : > { %s3860_s25 = smov [#allocation6]   ;;  %s3861_s27 = smov [#allocation11]  }
  0x2a   : > { %s340_s22 = sshll.u32 %s3860_s25, 4  ;;  %p4038_p4 = pnand %p4880_p1, %p3384_p2  ;;  %s341_s22 = int_to_ptr.vmem [resolvable:$true] %s340_s22 }
  0x2b   : > { %s364_s19 = sshll.u32 %s3861_s27, 4  ;;  %s3638_s15 = scalar_lea.vmem %s355_s16, 128  ;;  %s4042_s19 = int_to_ptr.vmem [resolvable:$true] %s364_s19 }
  0x2c   : > { %p3629_p7 = pneg %p4038_p4  ;;  %p3639_p8 = scmp.ne.s32.totalorder %s355_s16, %s3638_s15 }
  0x2d   : > { %p3646_p13 = scmp.lt.s32.totalorder %s355_s16, %s355_s16  ;;  %p3647_p0 = scmp.lt.s32.totalorder %s3638_s15, %s3638_s15 }
  0x2e   : > { %p3641_p9 = pnand %p3639_p8, %p3629_p7 }
  0x2f   : > { %p3648_p2 = por %p3647_p0, %p3646_p13 }
  0x30   : > { %p3642_p10 = pneg %p3641_p9 }
  0x32   : > { %p3649_p1 = pnand %p3648_p2, %p3642_p10 }
  0x34   : > { %3652 = shalt.err (!%p3649_p1)
}
  0x35   : > { %s4915_s7 = sld [smem:[#allocation33_spill]]  ;;  %s3664_s27 = scalar_lea.vmem %s341_s22, 128 }
  0x36   : > { %p3665_p12 = scmp.ne.s32.totalorder %s341_s22, %s3664_s27  ;;  %p3672_p8 = scmp.lt.s32.totalorder %s341_s22, %s341_s22 }
  0x37   : > { %p3673_p9 = scmp.lt.s32.totalorder %s3664_s27, %s3664_s27 }
  0x38   : > { %p3667_p6 = pnand %p3665_p12, %p3629_p7 }
  0x39   : > { %p3674_p11 = por %p3673_p9, %p3672_p8 }
  0x3a   : > { %p3668_p5 = pneg %p3667_p6 }
  0x3b   : > { %3390 = dma.hbm_to_vmem [thread:$0]  (!%p4038_p4), %s4915_s7, 128, %s355_s16, [#allocation10]  }
  0x3c   : > { %p3675_p3 = pnand %p3674_p11, %p3668_p5 }
  0x3e   : > { %3678 = shalt.err (!%p3675_p3)
}
  0x3f   : > { %s4916_s5 = sld [smem:[#allocation32_spill]]  ;;  %s3690_s26 = scalar_lea.vmem %s4042_s19, 512 }
  0x40   : > { %p3691_p0 = scmp.ne.s32.totalorder %s4042_s19, %s3690_s26  ;;  %p3698_p1 = scmp.lt.s32.totalorder %s4042_s19, %s4042_s19 }
  0x41   : > { %p3699_p5 = scmp.lt.s32.totalorder %s3690_s26, %s3690_s26 }
  0x42   : > { %p3693_p6 = pnand %p3691_p0, %p3629_p7 }
  0x43   : > { %p3700_p11 = por %p3699_p5, %p3698_p1 }
  0x44   : > { %p3694_p12 = pneg %p3693_p6 }
  0x45   : > { %3387 = dma.hbm_to_vmem [thread:$0]  (!%p4038_p4), %s4916_s5, 128, %s341_s22, [#allocation7]  }
  0x46   : > { %p3701_p3 = pnand %p3700_p11, %p3694_p12 }
  0x48   : > { %3704 = shalt.err (!%p3701_p3)
}
  0x49   : > { %s3862_s16 = smov 128   ;;  %s3863_s30 = smov 8  }
  0x4a   : > { %s4917_s8 = sld [smem:[#allocation34_spill]]  ;;  %s3864_s27 = smov [#allocation12]  }
  0x4b   : > { %s377_s15 = sshll.u32 %s3864_s27, 4  ;;  %s378_s15 = int_to_ptr.vmem [resolvable:$true] %s377_s15 }
  0x4c   : > { %s3716_s5 = scalar_lea.vmem %s378_s15, 512  ;;  %p3724_p8 = scmp.lt.s32.totalorder %s378_s15, %s378_s15 }
  0x4d   : > { %p3717_p10 = scmp.ne.s32.totalorder %s378_s15, %s3716_s5  ;;  %p3725_p9 = scmp.lt.s32.totalorder %s3716_s5, %s3716_s5 }
  0x4f   : > { %p3719_p13 = pnand %p3717_p10, %p3629_p7  ;;  %p3726_p0 = por %p3725_p9, %p3724_p8 }
  0x50   : > { %3393 = dma.hbm_to_vmem [thread:$0]  (!%p4038_p4), %s4917_s8, 512, %s4042_s19, [#allocation10], %s3862_s16, %s3862_s16, %s3863_s30  }
  0x51   : > { %p3720_p2 = pneg %p3719_p13 }
  0x53   : > { %p3727_p6 = pnand %p3726_p0, %p3720_p2 }
  0x55   : > { %3730 = shalt.err (!%p3727_p6)
}
  0x56   : > { %s4918_s9 = sld [smem:[#allocation35_spill]]  ;;  %p4919_p12 = scmp.ne.s32.totalorder %s4913_s14, 0 }
  0x57   : > { %p4920_p1 = scmp.eq.s32.totalorder (!%p4919_p12), %s3971_s24, 0 }
  0x58   : > { %433 = sbr.rel (%p4919_p12) target bundleno = 5763 (0x1683), region = 60 }
  0x5c   : > { %3396 = dma.hbm_to_vmem [thread:$0]  (!%p4038_p4), %s4918_s9, 512, %s378_s15, [#allocation13], %s3862_s16, %s3862_s16, %s3863_s30  }
  0x5d   : > { %3812 = dma.done.wait (%p4920_p1), [#allocation7], 128   ;;  %p4921_p7 = pmov %p4920_p1 }
  0x5e   : > { %p4922_p5 = pmov %p4920_p1 }
  0x5f   : > { %3814 = vsyncadd (%p4921_p7), [#allocation7], 4294967168 }
  0x60   : > { %3816 = dma.done.wait (%p4922_p5), [#allocation10], 640   ;;  %p4923_p11 = pmov %p4920_p1 }
  0x61   : > { %p4924_p3 = pmov %p4920_p1 }
  0x62   : > { %3818 = vsyncadd (%p4923_p11), [#allocation10], 4294966656 }
  0x63   : > { %3820 = dma.done.wait (%p4924_p3), [#allocation13], 512   ;;  %p4925_p4 = pmov %p4920_p1 }
  0x64   : > { %s4887_s5 = sand.u32 1, %s3849_s21   ;;  %s4888_s7 = sand.u32 1, %s3837_s18  }
  0x65   : > { %3822 = vsyncadd (%p4925_p4), [#allocation13], 4294966784  ;;  %s3013_s19 = sshll.u32 %s4887_s5, 6  ;;  %s3014_s14 = sshll.u32 %s4888_s7, 6 }
  0x66   : > { %s3015_s29 = sshll.u32 %s3971_s24, 3  ;;  %s4891_s16 = ssub.s32 1, %s3971_s24 }
  0x67   : > { %p508_p10 = scmp.lt.s32.totalorder %s3015_s29, 15  ;;  %s3017_s30 = sshll.u32 %s4891_s16, 3 }
  0x68   : > { %p515_p13 = scmp.lt.s32.totalorder %s3017_s30, 15  ;;  %s4127_s23 = scalar_lea.vmem [#allocation14], %s3013_s19 }
  0x69   : > { %s4949_s29 = smov (!%p508_p10, %s3015_s29), 15  ;;  %s4129_s22 = scalar_lea.vmem [#allocation15], %s3014_s14 }
  0x6a   : > { %s4951_s30 = smov (!%p515_p13, %s3017_s30), 15  ;;  %s3016_s25 = sshll.u32 %s4949_s29, 3 }
  0x6b   : > { %s4110_s15 = scalar_lea.vmem %s4866_s0, %s3016_s25  ;;  %s3018_s26 = sshll.u32 %s4951_s30, 3 }
  0x6c   : > { %s4115_s5 = scalar_lea.vmem %s4867_s1, %s3018_s26  ;;  %s4120_s13 = scalar_lea.vmem %s4868_s2, %s3016_s25 }
  0x6d   : > { %s4125_s29 = scalar_lea.vmem %s4869_s3, %s3018_s26  ;;  %p4926_p2 = scmp.ne.s32.totalorder %s3971_s24, 0 }
  0x6f   : > { %541 = sbr.rel (%p4926_p2) target bundleno = 120 (0x78), region = 80 }
  0x74   : > { %v542_v0 = vld [vmem:[%s4870_s4] sm:$0xff]  ;;  %vm543_vm0 = vcmask 261120   ;;  %v549_v3 = vld [vmem:[#allocation9] sm:$0xff] }
  0x75   : > { %v545_v1 = vld [vmem:[#allocation6] sm:$0xff]  ;;  %544 = vst.msk [vmem:[#allocation2] sm:$0xff] %vm543_vm0, %v542_v0  ;;  %550 = vst.msk [vmem:[#allocation5] sm:$0xff] %vm543_vm0, %v549_v3 }
  0x76   : > { %v547_v2 = vld [vmem:[%s4872_s6] sm:$0xff]  ;;  %546 = vst.msk [vmem:[#allocation3] sm:$0xff] %vm543_vm0, %v545_v1 }
  0x77   : > { %548 = vst.msk [vmem:[#allocation4] sm:$0xff] %vm543_vm0, %v547_v2 }
  0x78 PF: > { %v4139_v4 = vld [vmem:[#allocation11 + $0x18] sm:$0xff]  ;;  %v3865_v6 = vmov 0.0   ;;  %v4144_v7 = vld [vmem:[#allocation11 + $0x10] sm:$0xff]  ;;  %v4152_v9 = vld [vmem:[#allocation11 + $0x8] sm:$0xff]  ;;  %vm3866_vm1 = vmmov 0   ;;  %vm562_vm2 = vcmask 261120  }
  0x79   : > { %v4141_v5 = vld [vmem:[#allocation12 + $0x18] sm:$0xff]  ;;  %3188 = vmatprep.subr.mxu0 %v3865_v6  ;;  %3199 = vmatprep.subr.mxu1 %v3865_v6  ;;  %v4147_v8 = vld [vmem:[#allocation12 + $0x10] sm:$0xff]  ;;  %v4157_v10 = vld [vmem:[#allocation12 + $0x8] sm:$0xff]  ;;  %s3867_s20 = smov 32   ;;  %v3868_v25 = vmov 0   ;;  %s3869_s19 = smov 64  }
  0x7a   : > { %3189 = vmatpush3.msra.mxu0 %v4139_v4  ;;  %3200 = vmatpush3.msra.mxu1 %v4141_v5  ;;  %v4160_v11 = vld [vmem:[#allocation11] sm:$0xff]  ;;  %v561_v17 = vld [vmem:[%s4110_s15] sm:$0xff]  ;;  %v3026_v19 = vld [vmem:[%s4115_s5 + $0x38] sm:$0xff]  ;;  %s3870_s14 = smov 96   ;;  %s4927_s16 = ssub.s32 1, %s3971_s24 }
  0x7b   : > { %3190 = vmatprep.subr.mxu0 %v3865_v6  ;;  %3201 = vmatprep.subr.mxu1 %v3865_v6  ;;  %v4168_v13 = vld [vmem:[#allocation12] sm:$0xff]  ;;  %v664_v34 = vld [vmem:[%s4120_s13] sm:$0xff]  ;;  %v3029_v38 = vld [vmem:[%s4125_s29 + $0x38] sm:$0xff]  ;;  %s3107_s30 = sshll.u32 %s4927_s16, 10  ;;  %s2830_s25 = sshll.u32 %s4129_s22, 4  ;;  %s4769_s25 = int_to_ptr.vmem [resolvable:$true] %s2830_s25 }
  0x7c   : > { %3191 = vmatpush3.msra.mxu0 %v4144_v7  ;;  %3202 = vmatpush3.msra.mxu1 %v4147_v8  ;;  %v4166_v12 = vld [vmem:[#allocation2] sm:$0xff]  ;;  %v698_v16 = vld [vmem:[#allocation5] sm:$0xff]  ;;  %vm665_vm3 = vcmp.gt.f32.partialorder %v664_v34, 0.5  ;;  %vm804_vm4 = vcmp.gt.f32.partialorder %v3029_v38, 0.5  ;;  %s4767_s26 = scalar_lea.hbm %s4877_s11, %s3107_s30  ;;  %s4928_s9 = sand.u32 1, %s3837_s18  }
  0x7d   : > { %3192 = vmatprep.subr.mxu0 %v3865_v6  ;;  %3196 = vmatprep.mubr.msk.f32.mxu0 %vm3866_vm1, %v3865_v6  ;;  %v560_v14 = vld [vmem:[#allocation3] sm:$0xff]  ;;  %v677_v41 = vsel %vm665_vm3, 1, %v3868_v25  ;;  %v817_v43 = vsel %vm804_vm4, 1, %v3868_v25  ;;  %s4784_s17 = scalar_lea.sflag [#allocation16], %s4928_s9  ;;  %s3731_s7 = scalar_lea.vmem %s4769_s25, 1024 }
  0x7e   : > { %3193 = vmatpush3.msra.mxu0 %v4152_v9  ;;  %3203 = vmatprep.subr.mxu1 %v3865_v6  ;;  %v4174_v15 = vld [vmem:[#allocation4] sm:$0xff]  ;;  %p3732_p8 = scmp.ne.s32.totalorder %s4769_s25, %s3731_s7  ;;  %p4929_p9 = scmp.ne.s32.totalorder %s4910_s28, 0 }
  0x7f   : > { %3194 = vmatprep.subr.mxu0 %v3865_v6  ;;  %3204 = vmatpush3.msra.mxu1 %v4157_v10 }
  0x80   : > { %3195 = vmatpush3.msra.mxu0 %v4160_v11  ;;  %3205 = vmatprep.subr.mxu1 %v3865_v6  ;;  %p3733_p0 = pnand %p3732_p8, %p4929_p9 }
  0x81   : > { %3197 = vmatmul.mubr.msk.f32.vlgmr.msra.gmra.mxu0 %vm562_vm2, %v4166_v12  ;;  %3206 = vmatpush3.msra.mxu1 %v4168_v13 }
  0x82   : > { %3207 = vmatprep.mubr.msk.f32.mxu1 %vm3866_vm1, %v3865_v6  ;;  %644 = vrot.lane.b32.xlu1 %v560_v14, %s3867_s20  ;;  %p3734_p6 = pneg %p3733_p0 }
  0x83   : > { %3208 = vmatmul.mubr.msk.f32.vlgmr.msra.gmra.mxu1 %vm562_vm2, %v4174_v15  ;;  %3210 = vmatprep.subr.mxu0 %v3865_v6 }
  0x84   : > { %3211 = vmatpush3.msra.mxu0 %v4139_v4  ;;  %3221 = vmatprep.subr.mxu1 %v3865_v6 }
  0x85   : > { %3212 = vmatprep.subr.mxu0 %v3865_v6  ;;  %3222 = vmatpush3.msra.mxu1 %v4141_v5 }
  0x86   : > { %782 = vrot.lane.b32.xlu1 %v698_v16, %s3867_s20  ;;  %3213 = vmatpush3.msra.mxu0 %v4144_v7 }
  0x87   : > { %3214 = vmatprep.subr.mxu0 %v3865_v6  ;;  %3223 = vmatprep.subr.mxu1 %v3865_v6 }
  0x88   : > { %3215 = vmatpush3.msra.mxu0 %v4152_v9  ;;  %3218 = vmatprep.mubr.msk.f32.mxu0 %vm3866_vm1, %v3865_v6 }
  0x89   : > { %3216 = vmatprep.subr.mxu0 %v3865_v6  ;;  %3224 = vmatpush3.msra.mxu1 %v4147_v8 }
  0x8a   : > { %3217 = vmatpush3.msra.mxu0 %v4160_v11  ;;  %3225 = vmatprep.subr.mxu1 %v3865_v6 }
  0x8b   : > { %3226 = vmatpush3.msra.mxu1 %v4157_v10  ;;  %3229 = vmatprep.mubr.msk.f32.mxu1 %vm3866_vm1, %v3865_v6 }
  0x8c   : > { %3227 = vmatprep.subr.mxu1 %v3865_v6  ;;  %3232 = vmatprep.subr.mxu0 %v3865_v6 }
  0x8d   : > { %3228 = vmatpush3.msra.mxu1 %v4168_v13  ;;  %3483 = vset.pattern.permute.xlu0 %v3868_v25 }
  0x8e   : > { %3243 = vmatprep.subr.mxu1 %v3865_v6  ;;  %3484 = vset.pattern.permute.xlu1 %v3868_v25 }
  0xf4   : > { %v645_v44 = vpop.permute.xlu1 %644 }
  0xf8   : > { %v783_v46 = vpop.permute.xlu1 %782 }
 0x141   : > { %v632_v18 = vpop.f32.mrf.mxu0 }
 0x142   : > { %v633_v20 = vadd.f32 %v632_v18, %v561_v17  ;;  %v3031_v17 = vld [vmem:[%s4110_s15 + $0x8] sm:$0xff] }
 0x143   : > { %v3198_v21 = vpop.f32.mrf.mxu0  ;;  %v770_v22 = vpop.f32.mrf.mxu1 }
 0x144   : > { %3485 = vtanh.f32 %v633_v20  ;;  %v771_v23 = vadd.f32 %v3026_v19, %v770_v22  ;;  %v3025_v28 = vmul.f32 -1.442695, %v633_v20  ;;  %v3036_v21 = vld [vmem:[%s4115_s5 + $0x30] sm:$0xff] }
 0x145   : > { %v3209_v24 = vpop.f32.mrf.mxu1 }
 0x146   : > { %3487 = vtanh.f32 %v771_v23  ;;  %v3028_v29 = vmul.f32 -1.442695, %v771_v23 }
 0x147   : > { %3489 = vpow2.f32 %v3025_v28 }
 0x148   : > { %3491 = vpow2.f32 %v3028_v29 }
 0x151   : > { %v3486_v26 = vpop.eup %3485 }
 0x152   : > { %649 = vrot.lane.b32.xlu0 %v3486_v26, %s3869_s19 }
 0x153   : > { %v3488_v27 = vpop.eup %3487 }
 0x154   : > { %v3490_v30 = vpop.eup %3489 }
 0x155   : > { %v639_v31 = vadd.f32 1.0, %v3490_v30  ;;  %v3492_v32 = vpop.eup %3491 }
 0x156   : > { %787 = vrot.lane.b32.xlu0 %v3488_v27, %s3869_s19  ;;  %v777_v33 = vadd.f32 1.0, %v3492_v32 }
 0x157   : > { %3493 = vrcp.f32 %v639_v31 }
 0x158   : > { %3495 = vrcp.f32 %v777_v33 }
 0x164   : > { %v3494_v35 = vpop.eup %3493 }
 0x165   : > { %v3496_v39 = vpop.eup %3495  ;;  %v647_v45 = vmul.f32 %v3494_v35, %v645_v44 }
 0x166   : > { %v785_v49 = vmul.f32 %v3496_v39, %v783_v46 }
 0x1c4   : > { %v650_v36 = vpop.permute.xlu0 %649 }
 0x1c5   : > { %v652_v37 = vmul.f32 %v3494_v35, %v650_v36  ;;  %v3034_v36 = vld [vmem:[%s4120_s13 + $0x8] sm:$0xff] }
 0x1c6   : > { %vm944_vm7 = vcmp.gt.f32.partialorder %v3034_v36, 0.5 }
 0x1c7   : > { %654 = vrot.lane.b32.xlu0 %v652_v37, %s3867_s20 }
 0x1c8   : > { %v788_v40 = vpop.permute.xlu0 %787 }
 0x1c9   : > { %v790_v42 = vmul.f32 %v3496_v39, %v788_v40  ;;  %v3039_v40 = vld [vmem:[%s4125_s29 + $0x30] sm:$0xff] }
 0x1ca   : > { %vm1084_vm8 = vcmp.gt.f32.partialorder %v3039_v40, 0.5  ;;  %v3044_v40 = vld [vmem:[%s4120_s13 + $0x10] sm:$0xff] }
 0x1cb   : > { %792 = vrot.lane.b32.xlu1 %v790_v42, %s3867_s20  ;;  %679 = vperm.xlu0 %3483, %v677_v41   ;;  %vm1224_vm11 = vcmp.gt.f32.partialorder %v3044_v40, 0.5 }
 0x1cf   : > { %819 = vperm.xlu1 %3484, %v817_v43   ;;  %v957_v43 = vsel %vm944_vm7, 1, %v3868_v25 }
 0x239   : > { %v655_v47 = vpop.permute.xlu0 %654 }
 0x23a   : > { %v657_v48 = vadd.f32 %v655_v47, %v647_v45  ;;  %v1097_v45 = vsel %vm1084_vm8, 1, %v3868_v25 }
 0x23c   : > { %3497 = vtanh.f32 %v657_v48 }
 0x23d   : > { %v793_v50 = vpop.permute.xlu1 %792 }
 0x23e   : > { %v795_v51 = vadd.f32 %v793_v50, %v785_v49 }
 0x240   : > { %3499 = vtanh.f32 %v795_v51 }
 0x246   : > { %v680_v55 = vpop.permute.xlu0 %679 }
 0x247   : > { %vm681_vm5 = vcmp.eq.s32.totalorder %v680_v55, 1 }
 0x248   : > { %v691_v0 = vsel %vm681_vm5, %v657_v48, %v645_v44 }
 0x249   : > { %v3498_v52 = vpop.eup %3497 }
 0x24a   : > { %660 = vrot.lane.b32.xlu1 %v3498_v52, %s3869_s19  ;;  %v820_v54 = vpop.permute.xlu1 %819 }
 0x24b   : > { %vm821_vm6 = vcmp.eq.s32.totalorder %v820_v54, 1 }
 0x24c   : > { %v831_v1 = vsel %vm821_vm6, %v795_v51, %v783_v46 }
 0x24d   : > { %v3500_v53 = vpop.eup %3499 }
 0x24e   : > { %798 = vrot.lane.b32.xlu0 %v3500_v53, %s3869_s19  ;;  %682 = vrot.lane.b32.xlu1 %v4166_v12, %s3870_s14 }
 0x252   : > { %822 = vrot.lane.b32.xlu0 %v4174_v15, %s3870_s14 }
 0x2bc   : > { %v661_v56 = vpop.permute.xlu1 %660 }
 0x2bd   : > { %v4225_v57 = vmul.f32 %v3494_v35, %v661_v56 }
 0x2c0   : > { %v799_v58 = vpop.permute.xlu0 %798  ;;  %v683_v59 = vpop.permute.xlu1 %682 }
 0x2c1   : > { %v685_v60 = vsel %vm681_vm5, %v4225_v57, %v683_v59  ;;  %v4229_v61 = vmul.f32 %v3496_v39, %v799_v58 }
 0x2c2   : > { %687 = vrot.lane.b32.xlu1 %v685_v60, %s3867_s20 }
 0x2c4   : > { %v823_v62 = vpop.permute.xlu0 %822 }
 0x2c5   : > { %v825_v63 = vsel %vm821_vm6, %v4229_v61, %v823_v62 }
 0x2c6   : > { %827 = vrot.lane.b32.xlu0 %v825_v63, %s3867_s20  ;;  %693 = vrot.lane.b32.xlu1 %v691_v0, %s3870_s14 }
 0x2ca   : > { %833 = vrot.lane.b32.xlu0 %v831_v1, %s3870_s14 }
 0x334   : > { %v688_v2 = vpop.permute.xlu1 %687 }
 0x335   : > { %690 = vst.msk [vmem:[#allocation2] sm:$0xff] %vm562_vm2, %v688_v2 }
 0x338   : > { %v828_v3 = vpop.permute.xlu0 %827  ;;  %v694_v12 = vpop.permute.xlu1 %693 }
 0x339   : > { %830 = vst.msk [vmem:[#allocation4] sm:$0xff] %vm562_vm2, %v828_v3  ;;  %696 = vst.msk [vmem:[#allocation3] sm:$0xff] %vm562_vm2, %v694_v12 }
 0x33c   : > { %v834_v14 = vpop.permute.xlu0 %833  ;;  %v4238_v15 = vld [vmem:[#allocation2] sm:$0xff] }
 0x33d   : > { %836 = vst.msk [vmem:[#allocation5] sm:$0xff] %vm562_vm2, %v834_v14  ;;  %3219 = vmatmul.mubr.msk.f32.vlgmr.msra.gmra.mxu0 %vm562_vm2, %v4238_v15 }
 0x33e   : > { %3233 = vmatpush3.msra.mxu0 %v4139_v4  ;;  %3240 = vmatprep.mubr.msk.f32.mxu0 %vm3866_vm1, %v3865_v6 }
 0x33f   : > { %3234 = vmatprep.subr.mxu0 %v3865_v6 }
 0x340   : > { %v4247_v16 = vld [vmem:[#allocation4] sm:$0xff]  ;;  %3235 = vmatpush3.msra.mxu0 %v4144_v7  ;;  %v838_v28 = vld [vmem:[#allocation3] sm:$0xff] }
 0x341   : > { %3230 = vmatmul.mubr.msk.f32.vlgmr.msra.gmra.mxu1 %vm562_vm2, %v4247_v16  ;;  %3236 = vmatprep.subr.mxu0 %v3865_v6 }
 0x342   : > { %3237 = vmatpush3.msra.mxu0 %v4152_v9  ;;  %3244 = vmatpush3.msra.mxu1 %v4141_v5 }
 0x343   : > { %3238 = vmatprep.subr.mxu0 %v3865_v6  ;;  %3245 = vmatprep.subr.mxu1 %v3865_v6 }
 0x344   : > { %3246 = vmatpush3.msra.mxu1 %v4147_v8  ;;  %3239 = vmatpush3.msra.mxu0 %v4160_v11  ;;  %v978_v29 = vld [vmem:[#allocation5] sm:$0xff] }
 0x345   : > { %3247 = vmatprep.subr.mxu1 %v3865_v6  ;;  %3251 = vmatprep.mubr.msk.f32.mxu1 %vm3866_vm1, %v3865_v6 }
 0x346   : > { %3248 = vmatpush3.msra.mxu1 %v4157_v10  ;;  %3254 = vmatprep.subr.mxu0 %v3865_v6 }
 0x347   : > { %3249 = vmatprep.subr.mxu1 %v3865_v6 }
 0x348   : > { %3250 = vmatpush3.msra.mxu1 %v4168_v13 }
 0x349   : > { %3265 = vmatprep.subr.mxu1 %v3865_v6 }
 0x3fd   : > { %v910_v18 = vpop.f32.mrf.mxu0 }
 0x3fe   : > { %v911_v19 = vadd.f32 %v3031_v17, %v910_v18 }
 0x3ff   : > { %v3220_v20 = vpop.f32.mrf.mxu0 }
 0x400   : > { %3501 = vtanh.f32 %v911_v19  ;;  %v3033_v30 = vmul.f32 -1.442695, %v911_v19 }
 0x401   : > { %v1050_v22 = vpop.f32.mrf.mxu1 }
 0x402   : > { %v1051_v23 = vadd.f32 %v3036_v21, %v1050_v22  ;;  %v3041_v21 = vld [vmem:[%s4110_s15 + $0x10] sm:$0xff] }
 0x403   : > { %v3231_v24 = vpop.f32.mrf.mxu1 }
 0x404   : > { %3503 = vtanh.f32 %v1051_v23  ;;  %v3038_v31 = vmul.f32 -1.442695, %v1051_v23 }
 0x405   : > { %3505 = vpow2.f32 %v3033_v30 }
 0x406   : > { %3507 = vpow2.f32 %v3038_v31 }
 0x40d   : > { %v3502_v26 = vpop.eup %3501 }
 0x40e   : > { %927 = vrot.lane.b32.xlu1 %v3502_v26, %s3869_s19  ;;  %v3046_v26 = vld [vmem:[%s4115_s5 + $0x28] sm:$0xff] }
 0x411   : > { %v3504_v27 = vpop.eup %3503 }
 0x412   : > { %1067 = vrot.lane.b32.xlu0 %v3504_v27, %s3869_s19  ;;  %922 = vrot.lane.b32.xlu1 %v838_v28, %s3867_s20  ;;  %v3506_v32 = vpop.eup %3505 }
 0x413   : > { %v917_v33 = vadd.f32 1.0, %v3506_v32  ;;  %v3508_v34 = vpop.eup %3507 }
 0x414   : > { %v1057_v35 = vadd.f32 1.0, %v3508_v34 }
 0x415   : > { %3509 = vrcp.f32 %v917_v33 }
 0x416   : > { %1062 = vrot.lane.b32.xlu0 %v978_v29, %s3867_s20  ;;  %3511 = vrcp.f32 %v1057_v35 }
 0x422   : > { %v3510_v37 = vpop.eup %3509 }
 0x423   : > { %v3512_v41 = vpop.eup %3511 }
 0x480   : > { %v928_v38 = vpop.permute.xlu1 %927 }
 0x481   : > { %v930_v39 = vmul.f32 %v3510_v37, %v928_v38 }
 0x483   : > { %932 = vrot.lane.b32.xlu1 %v930_v39, %s3867_s20 }
 0x484   : > { %v1068_v42 = vpop.permute.xlu0 %1067  ;;  %v923_v46 = vpop.permute.xlu1 %922 }
 0x485   : > { %v1070_v44 = vmul.f32 %v3512_v41, %v1068_v42  ;;  %v925_v47 = vmul.f32 %v3510_v37, %v923_v46 }
 0x487   : > { %1072 = vrot.lane.b32.xlu0 %v1070_v44, %s3867_s20  ;;  %959 = vperm.xlu1 %3484, %v957_v43   ;;  %v3049_v44 = vld [vmem:[%s4125_s29 + $0x28] sm:$0xff] }
 0x488   : > { %v1063_v48 = vpop.permute.xlu0 %1062  ;;  %vm1364_vm12 = vcmp.gt.f32.partialorder %v3049_v44, 0.5 }
 0x489   : > { %v1065_v51 = vmul.f32 %v3512_v41, %v1063_v48 }
 0x48b   : > { %1099 = vperm.xlu0 %3483, %v1097_v45  }
 0x4f5   : > { %v933_v49 = vpop.permute.xlu1 %932 }
 0x4f6   : > { %v935_v50 = vadd.f32 %v933_v49, %v925_v47  ;;  %v1237_v47 = vsel %vm1224_vm11, 1, %v3868_v25  ;;  %v1377_v49 = vsel %vm1364_vm12, 1, %v3868_v25 }
 0x4f8   : > { %3513 = vtanh.f32 %v935_v50 }
 0x4f9   : > { %v1073_v52 = vpop.permute.xlu0 %1072 }
 0x4fa   : > { %v1075_v53 = vadd.f32 %v1073_v52, %v1065_v51 }
 0x4fc   : > { %3515 = vtanh.f32 %v1075_v53 }
 0x502   : > { %v960_v56 = vpop.permute.xlu1 %959 }
 0x503   : > { %vm961_vm9 = vcmp.eq.s32.totalorder %v960_v56, 1 }
 0x504   : > { %v971_v12 = vsel %vm961_vm9, %v935_v50, %v923_v46 }
 0x505   : > { %v3514_v54 = vpop.eup %3513 }
 0x506   : > { %938 = vrot.lane.b32.xlu1 %v3514_v54, %s3869_s19  ;;  %v1100_v58 = vpop.permute.xlu0 %1099 }
 0x507   : > { %vm1101_vm10 = vcmp.eq.s32.totalorder %v1100_v58, 1 }
 0x508   : > { %v1111_v14 = vsel %vm1101_vm10, %v1075_v53, %v1063_v48 }
 0x509   : > { %v3516_v55 = vpop.eup %3515 }
 0x50a   : > { %1078 = vrot.lane.b32.xlu0 %v3516_v55, %s3869_s19  ;;  %962 = vrot.lane.b32.xlu1 %v4238_v15, %s3870_s14 }
 0x50e   : > { %1102 = vrot.lane.b32.xlu0 %v4247_v16, %s3870_s14 }
 0x578   : > { %v939_v59 = vpop.permute.xlu1 %938 }
 0x579   : > { %v4285_v60 = vmul.f32 %v3510_v37, %v939_v59 }
 0x57c   : > { %v1079_v62 = vpop.permute.xlu0 %1078  ;;  %v963_v63 = vpop.permute.xlu1 %962 }
 0x57d   : > { %v965_v0 = vsel %vm961_vm9, %v4285_v60, %v963_v63  ;;  %v4289_v1 = vmul.f32 %v3512_v41, %v1079_v62 }
 0x57e   : > { %967 = vrot.lane.b32.xlu1 %v965_v0, %s3867_s20 }
 0x580   : > { %v1103_v2 = vpop.permute.xlu0 %1102 }
 0x581   : > { %v1105_v3 = vsel %vm1101_vm10, %v4289_v1, %v1103_v2 }
 0x582   : > { %1107 = vrot.lane.b32.xlu0 %v1105_v3, %s3867_s20  ;;  %973 = vrot.lane.b32.xlu1 %v971_v12, %s3870_s14 }
 0x586   : > { %1113 = vrot.lane.b32.xlu0 %v1111_v14, %s3870_s14 }
 0x5f0   : > { %v968_v15 = vpop.permute.xlu1 %967 }
 0x5f1   : > { %970 = vst.msk [vmem:[#allocation2] sm:$0xff] %vm562_vm2, %v968_v15 }
 0x5f4   : > { %v1108_v16 = vpop.permute.xlu0 %1107  ;;  %v974_v17 = vpop.permute.xlu1 %973 }
 0x5f5   : > { %1110 = vst.msk [vmem:[#allocation4] sm:$0xff] %vm562_vm2, %v1108_v16  ;;  %976 = vst.msk [vmem:[#allocation3] sm:$0xff] %vm562_vm2, %v974_v17 }
 0x5f8   : > { %v1114_v18 = vpop.permute.xlu0 %1113  ;;  %v4298_v19 = vld [vmem:[#allocation2] sm:$0xff] }
 0x5f9   : > { %1116 = vst.msk [vmem:[#allocation5] sm:$0xff] %vm562_vm2, %v1114_v18  ;;  %3241 = vmatmul.mubr.msk.f32.vlgmr.msra.gmra.mxu0 %vm562_vm2, %v4298_v19 }
 0x5fa   : > { %3255 = vmatpush3.msra.mxu0 %v4139_v4  ;;  %3262 = vmatprep.mubr.msk.f32.mxu0 %vm3866_vm1, %v3865_v6 }
 0x5fb   : > { %3256 = vmatprep.subr.mxu0 %v3865_v6 }
 0x5fc   : > { %v4307_v20 = vld [vmem:[#allocation4] sm:$0xff]  ;;  %3257 = vmatpush3.msra.mxu0 %v4144_v7  ;;  %v1118_v32 = vld [vmem:[#allocation3] sm:$0xff] }
 0x5fd   : > { %3252 = vmatmul.mubr.msk.f32.vlgmr.msra.gmra.mxu1 %vm562_vm2, %v4307_v20  ;;  %3258 = vmatprep.subr.mxu0 %v3865_v6 }
 0x5fe   : > { %3259 = vmatpush3.msra.mxu0 %v4152_v9  ;;  %3266 = vmatpush3.msra.mxu1 %v4141_v5 }
 0x5ff   : > { %3260 = vmatprep.subr.mxu0 %v3865_v6  ;;  %3267 = vmatprep.subr.mxu1 %v3865_v6 }
 0x600   : > { %3268 = vmatpush3.msra.mxu1 %v4147_v8  ;;  %3261 = vmatpush3.msra.mxu0 %v4160_v11  ;;  %v1258_v33 = vld [vmem:[#allocation5] sm:$0xff] }
 0x601   : > { %3269 = vmatprep.subr.mxu1 %v3865_v6  ;;  %3273 = vmatprep.mubr.msk.f32.mxu1 %vm3866_vm1, %v3865_v6 }
 0x602   : > { %3270 = vmatpush3.msra.mxu1 %v4157_v10  ;;  %3276 = vmatprep.subr.mxu0 %v3865_v6 }
 0x603   : > { %3271 = vmatprep.subr.mxu1 %v3865_v6 }
 0x604   : > { %3272 = vmatpush3.msra.mxu1 %v4168_v13 }
 0x605   : > { %3287 = vmatprep.subr.mxu1 %v3865_v6 }
 0x6b9   : > { %v1190_v22 = vpop.f32.mrf.mxu0 }
 0x6ba   : > { %v1191_v23 = vadd.f32 %v3041_v21, %v1190_v22 }
 0x6bb   : > { %v3242_v24 = vpop.f32.mrf.mxu0 }
 0x6bc   : > { %3517 = vtanh.f32 %v1191_v23  ;;  %v3043_v34 = vmul.f32 -1.442695, %v1191_v23 }
 0x6bd   : > { %v1330_v27 = vpop.f32.mrf.mxu1 }
 0x6be   : > { %v1331_v28 = vadd.f32 %v3046_v26, %v1330_v27 }
 0x6bf   : > { %v3253_v29 = vpop.f32.mrf.mxu1 }
 0x6c0   : > { %3519 = vtanh.f32 %v1331_v28  ;;  %v3048_v35 = vmul.f32 -1.442695, %v1331_v28  ;;  %v3051_v28 = vld [vmem:[%s4110_s15 + $0x18] sm:$0xff] }
 0x6c1   : > { %3521 = vpow2.f32 %v3043_v34 }
 0x6c2   : > { %3523 = vpow2.f32 %v3048_v35 }
 0x6c9   : > { %v3518_v30 = vpop.eup %3517 }
 0x6ca   : > { %1207 = vrot.lane.b32.xlu1 %v3518_v30, %s3869_s19 }
 0x6cd   : > { %v3520_v31 = vpop.eup %3519 }
 0x6ce   : > { %1347 = vrot.lane.b32.xlu0 %v3520_v31, %s3869_s19  ;;  %1202 = vrot.lane.b32.xlu1 %v1118_v32, %s3867_s20  ;;  %v3522_v36 = vpop.eup %3521  ;;  %v3056_v32 = vld [vmem:[%s4115_s5 + $0x20] sm:$0xff] }
 0x6cf   : > { %v1197_v37 = vadd.f32 1.0, %v3522_v36  ;;  %v3524_v38 = vpop.eup %3523 }
 0x6d0   : > { %v1337_v39 = vadd.f32 1.0, %v3524_v38 }
 0x6d1   : > { %3525 = vrcp.f32 %v1197_v37 }
 0x6d2   : > { %1342 = vrot.lane.b32.xlu0 %v1258_v33, %s3867_s20  ;;  %3527 = vrcp.f32 %v1337_v39 }
 0x6de   : > { %v3526_v41 = vpop.eup %3525 }
 0x6df   : > { %v3528_v45 = vpop.eup %3527 }
 0x73c   : > { %v1208_v42 = vpop.permute.xlu1 %1207 }
 0x73d   : > { %v1210_v43 = vmul.f32 %v3526_v41, %v1208_v42 }
 0x73f   : > { %1212 = vrot.lane.b32.xlu1 %v1210_v43, %s3867_s20 }
 0x740   : > { %v1348_v46 = vpop.permute.xlu0 %1347  ;;  %v1203_v50 = vpop.permute.xlu1 %1202 }
 0x741   : > { %v1350_v48 = vmul.f32 %v3528_v45, %v1348_v46  ;;  %v1205_v51 = vmul.f32 %v3526_v41, %v1203_v50  ;;  %v4394_v46 = vld [vmem:[%s4120_s13 + $0x18] sm:$0xff] }
 0x742   : > { %vm1504_vm15 = vcmp.gt.f32.partialorder %v4394_v46, 0.5 }
 0x743   : > { %1352 = vrot.lane.b32.xlu0 %v1350_v48, %s3867_s20  ;;  %1239 = vperm.xlu1 %3484, %v1237_v47  }
 0x744   : > { %v1343_v52 = vpop.permute.xlu0 %1342 }
 0x745   : > { %v1345_v55 = vmul.f32 %v3528_v45, %v1343_v52 }
 0x747   : > { %1379 = vperm.xlu0 %3483, %v1377_v49  }
 0x7b1   : > { %v1213_v53 = vpop.permute.xlu1 %1212 }
 0x7b2   : > { %v1215_v54 = vadd.f32 %v1213_v53, %v1205_v51  ;;  %v1517_v53 = vsel %vm1504_vm15, 1, %v3868_v25 }
 0x7b4   : > { %3529 = vtanh.f32 %v1215_v54 }
 0x7b5   : > { %v1353_v56 = vpop.permute.xlu0 %1352 }
 0x7b6   : > { %v1355_v58 = vadd.f32 %v1353_v56, %v1345_v55 }
 0x7b8   : > { %3531 = vtanh.f32 %v1355_v58 }
 0x7be   : > { %v1240_v63 = vpop.permute.xlu1 %1239 }
 0x7bf   : > { %vm1241_vm13 = vcmp.eq.s32.totalorder %v1240_v63, 1 }
 0x7c1   : > { %v3530_v59 = vpop.eup %3529 }
 0x7c2   : > { %1218 = vrot.lane.b32.xlu1 %v3530_v59, %s3869_s19  ;;  %v1380_v0 = vpop.permute.xlu0 %1379 }
 0x7c3   : > { %vm1381_vm14 = vcmp.eq.s32.totalorder %v1380_v0, 1 }
 0x7c5   : > { %v3532_v62 = vpop.eup %3531 }
 0x7c6   : > { %1358 = vrot.lane.b32.xlu0 %v3532_v62, %s3869_s19  ;;  %1242 = vrot.lane.b32.xlu1 %v4298_v19, %s3870_s14  ;;  %v1251_v19 = vsel %vm1241_vm13, %v1215_v54, %v1203_v50  ;;  %v4398_v50 = vld [vmem:[%s4125_s29 + $0x20] sm:$0xff] }
 0x7c7   : > { %vm1644_vm0 = vcmp.gt.f32.partialorder %v4398_v50, 0.5 }
 0x7c8   : > { %v1657_v55 = vsel %vm1644_vm0, 1, %v3868_v25 }
 0x7ca   : > { %1382 = vrot.lane.b32.xlu0 %v4307_v20, %s3870_s14  ;;  %v1391_v20 = vsel %vm1381_vm14, %v1355_v58, %v1343_v52 }
 0x834   : > { %v1219_v2 = vpop.permute.xlu1 %1218 }
 0x835   : > { %v4345_v3 = vmul.f32 %v3526_v41, %v1219_v2 }
 0x838   : > { %v1359_v12 = vpop.permute.xlu0 %1358  ;;  %v1243_v14 = vpop.permute.xlu1 %1242 }
 0x839   : > { %v1245_v15 = vsel %vm1241_vm13, %v4345_v3, %v1243_v14  ;;  %v4349_v16 = vmul.f32 %v3528_v45, %v1359_v12 }
 0x83a   : > { %1247 = vrot.lane.b32.xlu1 %v1245_v15, %s3867_s20 }
 0x83c   : > { %v1383_v17 = vpop.permute.xlu0 %1382 }
 0x83d   : > { %v1385_v18 = vsel %vm1381_vm14, %v4349_v16, %v1383_v17 }
 0x83e   : > { %1387 = vrot.lane.b32.xlu0 %v1385_v18, %s3867_s20  ;;  %1253 = vrot.lane.b32.xlu1 %v1251_v19, %s3870_s14 }
 0x842   : > { %1393 = vrot.lane.b32.xlu0 %v1391_v20, %s3870_s14 }
 0x8ac   : > { %v1248_v21 = vpop.permute.xlu1 %1247 }
 0x8ad   : > { %1250 = vst.msk [vmem:[#allocation2] sm:$0xff] %vm562_vm2, %v1248_v21 }
 0x8b0   : > { %v1388_v22 = vpop.permute.xlu0 %1387  ;;  %v1254_v23 = vpop.permute.xlu1 %1253 }
 0x8b1   : > { %1390 = vst.msk [vmem:[#allocation4] sm:$0xff] %vm562_vm2, %v1388_v22  ;;  %1256 = vst.msk [vmem:[#allocation3] sm:$0xff] %vm562_vm2, %v1254_v23 }
 0x8b4   : > { %v1394_v24 = vpop.permute.xlu0 %1393  ;;  %v4358_v26 = vld [vmem:[#allocation2] sm:$0xff] }
 0x8b5   : > { %1396 = vst.msk [vmem:[#allocation5] sm:$0xff] %vm562_vm2, %v1394_v24  ;;  %3263 = vmatmul.mubr.msk.f32.vlgmr.msra.gmra.mxu0 %vm562_vm2, %v4358_v26 }
 0x8b6   : > { %3277 = vmatpush3.msra.mxu0 %v4139_v4  ;;  %3284 = vmatprep.mubr.msk.f32.mxu0 %vm3866_vm1, %v3865_v6 }
 0x8b7   : > { %3278 = vmatprep.subr.mxu0 %v3865_v6 }
 0x8b8   : > { %v4367_v27 = vld [vmem:[#allocation4] sm:$0xff]  ;;  %3279 = vmatpush3.msra.mxu0 %v4144_v7  ;;  %v1398_v38 = vld [vmem:[#allocation3] sm:$0xff] }
 0x8b9   : > { %3274 = vmatmul.mubr.msk.f32.vlgmr.msra.gmra.mxu1 %vm562_vm2, %v4367_v27  ;;  %3280 = vmatprep.subr.mxu0 %v3865_v6 }
 0x8ba   : > { %3281 = vmatpush3.msra.mxu0 %v4152_v9  ;;  %3288 = vmatpush3.msra.mxu1 %v4141_v5 }
 0x8bb   : > { %3282 = vmatprep.subr.mxu0 %v3865_v6  ;;  %3289 = vmatprep.subr.mxu1 %v3865_v6 }
 0x8bc   : > { %3290 = vmatpush3.msra.mxu1 %v4147_v8  ;;  %3283 = vmatpush3.msra.mxu0 %v4160_v11  ;;  %v1538_v39 = vld [vmem:[#allocation5] sm:$0xff] }
 0x8bd   : > { %3291 = vmatprep.subr.mxu1 %v3865_v6  ;;  %3295 = vmatprep.mubr.msk.f32.mxu1 %vm3866_vm1, %v3865_v6 }
 0x8be   : > { %3292 = vmatpush3.msra.mxu1 %v4157_v10  ;;  %3298 = vmatprep.subr.mxu0 %v3865_v6 }
 0x8bf   : > { %3293 = vmatprep.subr.mxu1 %v3865_v6 }
 0x8c0   : > { %3294 = vmatpush3.msra.mxu1 %v4168_v13 }
 0x8c1   : > { %3309 = vmatprep.subr.mxu1 %v3865_v6 }
 0x975   : > { %v1470_v29 = vpop.f32.mrf.mxu0 }
 0x976   : > { %v1471_v30 = vadd.f32 %v3051_v28, %v1470_v29 }
 0x977   : > { %v3264_v31 = vpop.f32.mrf.mxu0 }
 0x978   : > { %3533 = vtanh.f32 %v1471_v30  ;;  %v3053_v40 = vmul.f32 -1.442695, %v1471_v30 }
 0x979   : > { %v1610_v33 = vpop.f32.mrf.mxu1 }
 0x97a   : > { %v1611_v34 = vadd.f32 %v3056_v32, %v1610_v33 }
 0x97b   : > { %v3275_v35 = vpop.f32.mrf.mxu1 }
 0x97c   : > { %3535 = vtanh.f32 %v1611_v34  ;;  %v3058_v41 = vmul.f32 -1.442695, %v1611_v34 }
 0x97d   : > { %3537 = vpow2.f32 %v3053_v40 }
 0x97e   : > { %3539 = vpow2.f32 %v3058_v41 }
 0x985   : > { %v3534_v36 = vpop.eup %3533 }
 0x986   : > { %1487 = vrot.lane.b32.xlu1 %v3534_v36, %s3869_s19 }
 0x989   : > { %v3536_v37 = vpop.eup %3535 }
 0x98a   : > { %1627 = vrot.lane.b32.xlu0 %v3536_v37, %s3869_s19  ;;  %1482 = vrot.lane.b32.xlu1 %v1398_v38, %s3867_s20  ;;  %v3538_v42 = vpop.eup %3537 }
 0x98b   : > { %v1477_v43 = vadd.f32 1.0, %v3538_v42  ;;  %v3540_v44 = vpop.eup %3539 }
 0x98c   : > { %v1617_v45 = vadd.f32 1.0, %v3540_v44 }
 0x98d   : > { %3541 = vrcp.f32 %v1477_v43 }
 0x98e   : > { %1622 = vrot.lane.b32.xlu0 %v1538_v39, %s3867_s20  ;;  %3543 = vrcp.f32 %v1617_v45 }
 0x99a   : > { %v3542_v47 = vpop.eup %3541 }
 0x99b   : > { %v3544_v51 = vpop.eup %3543 }
 0x9f8   : > { %v1488_v48 = vpop.permute.xlu1 %1487 }
 0x9f9   : > { %v1490_v49 = vmul.f32 %v3542_v47, %v1488_v48 }
 0x9fb   : > { %1492 = vrot.lane.b32.xlu1 %v1490_v49, %s3867_s20 }
 0x9fc   : > { %v1628_v52 = vpop.permute.xlu0 %1627  ;;  %v1483_v56 = vpop.permute.xlu1 %1482 }
 0x9fd   : > { %v1630_v54 = vmul.f32 %v3544_v51, %v1628_v52  ;;  %v1485_v58 = vmul.f32 %v3542_v47, %v1483_v56  ;;  %v4464_v52 = vld [vmem:[%s4125_s29 + $0x18] sm:$0xff] }
 0x9fe   : > { %vm1924_vm6 = vcmp.gt.f32.partialorder %v4464_v52, 0.5 }
 0x9ff   : > { %1632 = vrot.lane.b32.xlu0 %v1630_v54, %s3867_s20  ;;  %1519 = vperm.xlu1 %3484, %v1517_v53  }
 0xa00   : > { %v1623_v59 = vpop.permute.xlu0 %1622 }
 0xa01   : > { %v1625_v0 = vmul.f32 %v3544_v51, %v1623_v59 }
 0xa03   : > { %1659 = vperm.xlu0 %3483, %v1657_v55  }
 0xa6d   : > { %v1493_v62 = vpop.permute.xlu1 %1492 }
 0xa6e   : > { %v1495_v63 = vadd.f32 %v1493_v62, %v1485_v58  ;;  %v1937_v58 = vsel %vm1924_vm6, 1, %v3868_v25 }
 0xa70   : > { %3545 = vtanh.f32 %v1495_v63 }
 0xa71   : > { %v1633_v2 = vpop.permute.xlu0 %1632 }
 0xa72   : > { %v1635_v12 = vadd.f32 %v1633_v2, %v1625_v0 }
 0xa74   : > { %3547 = vtanh.f32 %v1635_v12 }
 0xa7a   : > { %v1520_v17 = vpop.permute.xlu1 %1519 }
 0xa7b   : > { %vm1521_vm3 = vcmp.eq.s32.totalorder %v1520_v17, 1 }
 0xa7c   : > { %v1531_v29 = vsel %vm1521_vm3, %v1495_v63, %v1483_v56 }
 0xa7d   : > { %v3546_v14 = vpop.eup %3545 }
 0xa7e   : > { %1498 = vrot.lane.b32.xlu1 %v3546_v14, %s3869_s19  ;;  %v1660_v18 = vpop.permute.xlu0 %1659 }
 0xa7f   : > { %vm1661_vm4 = vcmp.eq.s32.totalorder %v1660_v18, 1 }
 0xa81   : > { %v3548_v15 = vpop.eup %3547 }
 0xa82   : > { %1638 = vrot.lane.b32.xlu0 %v3548_v15, %s3869_s19  ;;  %1522 = vrot.lane.b32.xlu1 %v4358_v26, %s3870_s14 }
 0xa86   : > { %1662 = vrot.lane.b32.xlu0 %v4367_v27, %s3870_s14  ;;  %v1671_v27 = vsel %vm1661_vm4, %v1635_v12, %v1623_v59 }
 0xaf0   : > { %v1499_v19 = vpop.permute.xlu1 %1498 }
 0xaf1   : > { %v4411_v20 = vmul.f32 %v3542_v47, %v1499_v19  ;;  %v4460_v47 = vld [vmem:[%s4120_s13 + $0x20] sm:$0xff] }
 0xaf2   : > { %vm1784_vm5 = vcmp.gt.f32.partialorder %v4460_v47, 0.5 }
 0xaf3   : > { %v1797_v55 = vsel %vm1784_vm5, 1, %v3868_v25 }
 0xaf4   : > { %v1639_v21 = vpop.permute.xlu0 %1638  ;;  %v1523_v22 = vpop.permute.xlu1 %1522 }
 0xaf5   : > { %v1525_v23 = vsel %vm1521_vm3, %v4411_v20, %v1523_v22  ;;  %v4415_v24 = vmul.f32 %v3544_v51, %v1639_v21 }
 0xaf6   : > { %1527 = vrot.lane.b32.xlu1 %v1525_v23, %s3867_s20 }
 0xaf8   : > { %v1663_v28 = vpop.permute.xlu0 %1662 }
 0xaf9   : > { %v1665_v26 = vsel %vm1661_vm4, %v4415_v24, %v1663_v28 }
 0xafa   : > { %1667 = vrot.lane.b32.xlu0 %v1665_v26, %s3867_s20  ;;  %1533 = vrot.lane.b32.xlu1 %v1531_v29, %s3870_s14 }
 0xafe   : > { %1673 = vrot.lane.b32.xlu0 %v1671_v27, %s3870_s14 }
 0xb68   : > { %v1528_v30 = vpop.permute.xlu1 %1527 }
 0xb69   : > { %1530 = vst.msk [vmem:[#allocation2] sm:$0xff] %vm562_vm2, %v1528_v30 }
 0xb6c   : > { %v1668_v31 = vpop.permute.xlu0 %1667  ;;  %v1534_v32 = vpop.permute.xlu1 %1533 }
 0xb6d   : > { %1670 = vst.msk [vmem:[#allocation4] sm:$0xff] %vm562_vm2, %v1668_v31  ;;  %1536 = vst.msk [vmem:[#allocation3] sm:$0xff] %vm562_vm2, %v1534_v32 }
 0xb70   : > { %v1674_v33 = vpop.permute.xlu0 %1673  ;;  %v4424_v34 = vld [vmem:[#allocation2] sm:$0xff] }
 0xb71   : > { %1676 = vst.msk [vmem:[#allocation5] sm:$0xff] %vm562_vm2, %v1674_v33  ;;  %3285 = vmatmul.mubr.msk.f32.vlgmr.msra.gmra.mxu0 %vm562_vm2, %v4424_v34 }
 0xb72   : > { %3299 = vmatpush3.msra.mxu0 %v4139_v4  ;;  %3306 = vmatprep.mubr.msk.f32.mxu0 %vm3866_vm1, %v3865_v6  ;;  %v3061_v4 = vld [vmem:[%s4110_s15 + $0x20] sm:$0xff] }
 0xb73   : > { %3300 = vmatprep.subr.mxu0 %v3865_v6 }
 0xb74   : > { %v4433_v35 = vld [vmem:[#allocation4] sm:$0xff]  ;;  %3301 = vmatpush3.msra.mxu0 %v4144_v7  ;;  %v1678_v39 = vld [vmem:[#allocation3] sm:$0xff] }
 0xb75   : > { %3296 = vmatmul.mubr.msk.f32.vlgmr.msra.gmra.mxu1 %vm562_vm2, %v4433_v35  ;;  %3302 = vmatprep.subr.mxu0 %v3865_v6 }
 0xb76   : > { %3303 = vmatpush3.msra.mxu0 %v4152_v9  ;;  %3310 = vmatpush3.msra.mxu1 %v4141_v5  ;;  %v3066_v9 = vld [vmem:[%s4115_s5 + $0x18] sm:$0xff] }
 0xb77   : > { %3304 = vmatprep.subr.mxu0 %v3865_v6  ;;  %3311 = vmatprep.subr.mxu1 %v3865_v6 }
 0xb78   : > { %3312 = vmatpush3.msra.mxu1 %v4147_v8  ;;  %3305 = vmatpush3.msra.mxu0 %v4160_v11 }
 0xb79   : > { %3313 = vmatprep.subr.mxu1 %v3865_v6  ;;  %3317 = vmatprep.mubr.msk.f32.mxu1 %vm3866_vm1, %v3865_v6 }
 0xb7a   : > { %3314 = vmatpush3.msra.mxu1 %v4157_v10  ;;  %3320 = vmatprep.subr.mxu0 %v3865_v6 }
 0xb7b   : > { %3315 = vmatprep.subr.mxu1 %v3865_v6 }
 0xb7c   : > { %3316 = vmatpush3.msra.mxu1 %v4168_v13  ;;  %v1818_v13 = vld [vmem:[#allocation5] sm:$0xff] }
 0xb7d   : > { %3331 = vmatprep.subr.mxu1 %v3865_v6 }
 0xc31   : > { %v1750_v5 = vpop.f32.mrf.mxu0 }
 0xc32   : > { %v1751_v7 = vadd.f32 %v3061_v4, %v1750_v5 }
 0xc33   : > { %v3286_v8 = vpop.f32.mrf.mxu0 }
 0xc34   : > { %3549 = vtanh.f32 %v1751_v7  ;;  %v3063_v40 = vmul.f32 -1.442695, %v1751_v7  ;;  %v4495_v8 = vld [vmem:[#allocation11 + $0x18] sm:$0xff] }
 0xc35   : > { %v1890_v11 = vpop.f32.mrf.mxu1 }
 0xc36   : > { %v1891_v36 = vadd.f32 %v3066_v9, %v1890_v11  ;;  %v4503_v11 = vld [vmem:[#allocation11 + $0x10] sm:$0xff] }
 0xc37   : > { %v3297_v37 = vpop.f32.mrf.mxu1 }
 0xc38   : > { %3551 = vtanh.f32 %v1891_v36  ;;  %v3068_v41 = vmul.f32 -1.442695, %v1891_v36  ;;  %v4509_v36 = vld [vmem:[#allocation11 + $0x8] sm:$0xff]  ;;  %v4512_v37 = vld [vmem:[#allocation12 + $0x18] sm:$0xff] }
 0xc39   : > { %3553 = vpow2.f32 %v3063_v40  ;;  %v3071_v40 = vld [vmem:[%s4110_s15 + $0x28] sm:$0xff] }
 0xc3a   : > { %3555 = vpow2.f32 %v3068_v41 }
 0xc41   : > { %v3550_v38 = vpop.eup %3549 }
 0xc42   : > { %1767 = vrot.lane.b32.xlu1 %v3550_v38, %s3869_s19  ;;  %v4517_v38 = vld [vmem:[#allocation12 + $0x10] sm:$0xff] }
 0xc45   : > { %v3552_v10 = vpop.eup %3551 }
 0xc46   : > { %1907 = vrot.lane.b32.xlu0 %v3552_v10, %s3869_s19  ;;  %1762 = vrot.lane.b32.xlu1 %v1678_v39, %s3867_s20  ;;  %v3554_v42 = vpop.eup %3553  ;;  %v4520_v10 = vld [vmem:[#allocation11] sm:$0xff]  ;;  %v4526_v39 = vld [vmem:[#allocation12 + $0x8] sm:$0xff] }
 0xc47   : > { %v1757_v43 = vadd.f32 1.0, %v3554_v42  ;;  %v3556_v44 = vpop.eup %3555 }
 0xc48   : > { %v1897_v45 = vadd.f32 1.0, %v3556_v44  ;;  %v3076_v44 = vld [vmem:[%s4115_s5 + $0x10] sm:$0xff] }
 0xc49   : > { %3557 = vrcp.f32 %v1757_v43 }
 0xc4a   : > { %1902 = vrot.lane.b32.xlu0 %v1818_v13, %s3867_s20  ;;  %3559 = vrcp.f32 %v1897_v45  ;;  %v4531_v13 = vld [vmem:[#allocation12] sm:$0xff] }
 0xc56   : > { %v3558_v48 = vpop.eup %3557 }
 0xc57   : > { %v3560_v53 = vpop.eup %3559 }
 0xcb4   : > { %v1768_v49 = vpop.permute.xlu1 %1767 }
 0xcb5   : > { %v1770_v51 = vmul.f32 %v3558_v48, %v1768_v49 }
 0xcb7   : > { %1772 = vrot.lane.b32.xlu1 %v1770_v51, %s3867_s20 }
 0xcb8   : > { %v1908_v54 = vpop.permute.xlu0 %1907  ;;  %v1763_v59 = vpop.permute.xlu1 %1762 }
 0xcb9   : > { %v1910_v56 = vmul.f32 %v3560_v53, %v1908_v54  ;;  %v1765_v62 = vmul.f32 %v3558_v48, %v1763_v59 }
 0xcbb   : > { %1912 = vrot.lane.b32.xlu0 %v1910_v56, %s3867_s20  ;;  %1799 = vperm.xlu1 %3484, %v1797_v55  }
 0xcbc   : > { %v1903_v63 = vpop.permute.xlu0 %1902 }
 0xcbd   : > { %v1905_v12 = vmul.f32 %v3560_v53, %v1903_v63 }
 0xcbf   : > { %1939 = vperm.xlu0 %3483, %v1937_v58  }
 0xd29   : > { %v1773_v0 = vpop.permute.xlu1 %1772 }
 0xd2a   : > { %v1775_v2 = vadd.f32 %v1773_v0, %v1765_v62 }
 0xd2c   : > { %3561 = vtanh.f32 %v1775_v2 }
 0xd2d   : > { %v1913_v14 = vpop.permute.xlu0 %1912 }
 0xd2e   : > { %v1915_v15 = vadd.f32 %v1913_v14, %v1905_v12 }
 0xd30   : > { %3563 = vtanh.f32 %v1915_v15 }
 0xd36   : > { %v1800_v19 = vpop.permute.xlu1 %1799 }
 0xd37   : > { %vm1801_vm7 = vcmp.eq.s32.totalorder %v1800_v19, 1 }
 0xd38   : > { %v1811_v32 = vsel %vm1801_vm7, %v1775_v2, %v1763_v59  ;;  %v4542_v2 = vld [vmem:[%s4120_s13 + $0x28] sm:$0xff] }
 0xd39   : > { %v3562_v17 = vpop.eup %3561  ;;  %vm2064_vm9 = vcmp.gt.f32.partialorder %v4542_v2, 0.5 }
 0xd3a   : > { %1778 = vrot.lane.b32.xlu1 %v3562_v17, %s3869_s19  ;;  %v1940_v21 = vpop.permute.xlu0 %1939  ;;  %v4546_v17 = vld [vmem:[%s4125_s29 + $0x10] sm:$0xff] }
 0xd3b   : > { %vm1941_vm8 = vcmp.eq.s32.totalorder %v1940_v21, 1  ;;  %v2077_v21 = vsel %vm2064_vm9, 1, %v3868_v25  ;;  %vm2204_vm10 = vcmp.gt.f32.partialorder %v4546_v17, 0.5 }
 0xd3c   : > { %v1951_v33 = vsel %vm1941_vm8, %v1915_v15, %v1903_v63 }
 0xd3d   : > { %v3564_v18 = vpop.eup %3563 }
 0xd3e   : > { %1918 = vrot.lane.b32.xlu0 %v3564_v18, %s3869_s19  ;;  %1802 = vrot.lane.b32.xlu1 %v4424_v34, %s3870_s14 }
 0xd42   : > { %1942 = vrot.lane.b32.xlu0 %v4433_v35, %s3870_s14 }
 0xdac   : > { %v1779_v22 = vpop.permute.xlu1 %1778 }
 0xdad   : > { %v4477_v23 = vmul.f32 %v3558_v48, %v1779_v22 }
 0xdb0   : > { %v1919_v28 = vpop.permute.xlu0 %1918  ;;  %v1803_v26 = vpop.permute.xlu1 %1802 }
 0xdb1   : > { %v1805_v29 = vsel %vm1801_vm7, %v4477_v23, %v1803_v26  ;;  %v4481_v27 = vmul.f32 %v3560_v53, %v1919_v28  ;;  %v2217_v28 = vsel %vm2204_vm10, 1, %v3868_v25 }
 0xdb2   : > { %1807 = vrot.lane.b32.xlu1 %v1805_v29, %s3867_s20 }
 0xdb4   : > { %v1943_v30 = vpop.permute.xlu0 %1942 }
 0xdb5   : > { %v1945_v31 = vsel %vm1941_vm8, %v4481_v27, %v1943_v30 }
 0xdb6   : > { %1947 = vrot.lane.b32.xlu0 %v1945_v31, %s3867_s20  ;;  %1813 = vrot.lane.b32.xlu1 %v1811_v32, %s3870_s14 }
 0xdba   : > { %1953 = vrot.lane.b32.xlu0 %v1951_v33, %s3870_s14 }
 0xe24   : > { %v1808_v34 = vpop.permute.xlu1 %1807 }
 0xe25   : > { %1810 = vst.msk [vmem:[#allocation2] sm:$0xff] %vm562_vm2, %v1808_v34 }
 0xe28   : > { %v1948_v35 = vpop.permute.xlu0 %1947  ;;  %v1814_v4 = vpop.permute.xlu1 %1813 }
 0xe29   : > { %1950 = vst.msk [vmem:[#allocation4] sm:$0xff] %vm562_vm2, %v1948_v35  ;;  %1816 = vst.msk [vmem:[#allocation3] sm:$0xff] %vm562_vm2, %v1814_v4 }
 0xe2c   : > { %v1954_v5 = vpop.permute.xlu0 %1953  ;;  %v4490_v7 = vld [vmem:[#allocation2] sm:$0xff] }
 0xe2d   : > { %1956 = vst.msk [vmem:[#allocation5] sm:$0xff] %vm562_vm2, %v1954_v5  ;;  %3307 = vmatmul.mubr.msk.f32.vlgmr.msra.gmra.mxu0 %vm562_vm2, %v4490_v7 }
 0xe2e   : > { %3321 = vmatpush3.msra.mxu0 %v4495_v8  ;;  %3328 = vmatprep.mubr.msk.f32.mxu0 %vm3866_vm1, %v3865_v6 }
 0xe2f   : > { %3322 = vmatprep.subr.mxu0 %v3865_v6 }
 0xe30   : > { %v4501_v9 = vld [vmem:[#allocation4] sm:$0xff]  ;;  %3323 = vmatpush3.msra.mxu0 %v4503_v11  ;;  %v1958_v54 = vld [vmem:[#allocation3] sm:$0xff] }
 0xe31   : > { %3318 = vmatmul.mubr.msk.f32.vlgmr.msra.gmra.mxu1 %vm562_vm2, %v4501_v9  ;;  %3324 = vmatprep.subr.mxu0 %v3865_v6 }
 0xe32   : > { %3325 = vmatpush3.msra.mxu0 %v4509_v36  ;;  %3332 = vmatpush3.msra.mxu1 %v4512_v37 }
 0xe33   : > { %3326 = vmatprep.subr.mxu0 %v3865_v6  ;;  %3333 = vmatprep.subr.mxu1 %v3865_v6 }
 0xe34   : > { %3334 = vmatpush3.msra.mxu1 %v4517_v38  ;;  %3327 = vmatpush3.msra.mxu0 %v4520_v10  ;;  %v2098_v55 = vld [vmem:[#allocation5] sm:$0xff] }
 0xe35   : > { %3335 = vmatprep.subr.mxu1 %v3865_v6  ;;  %3339 = vmatprep.mubr.msk.f32.mxu1 %vm3866_vm1, %v3865_v6 }
 0xe36   : > { %3336 = vmatpush3.msra.mxu1 %v4526_v39  ;;  %3342 = vmatprep.subr.mxu0 %v3865_v6 }
 0xe37   : > { %3337 = vmatprep.subr.mxu1 %v3865_v6 }
 0xe38   : > { %3338 = vmatpush3.msra.mxu1 %v4531_v13 }
 0xe39   : > { %3353 = vmatprep.subr.mxu1 %v3865_v6 }
 0xeed   : > { %v2030_v41 = vpop.f32.mrf.mxu0 }
 0xeee   : > { %v2031_v42 = vadd.f32 %v3071_v40, %v2030_v41 }
 0xeef   : > { %v3308_v43 = vpop.f32.mrf.mxu0 }
 0xef0   : > { %3565 = vtanh.f32 %v2031_v42  ;;  %v3073_v56 = vmul.f32 -1.442695, %v2031_v42 }
 0xef1   : > { %v2170_v45 = vpop.f32.mrf.mxu1 }
 0xef2   : > { %v2171_v48 = vadd.f32 %v3076_v44, %v2170_v45 }
 0xef3   : > { %v3319_v49 = vpop.f32.mrf.mxu1 }
 0xef4   : > { %3567 = vtanh.f32 %v2171_v48  ;;  %v3078_v58 = vmul.f32 -1.442695, %v2171_v48 }
 0xef5   : > { %3569 = vpow2.f32 %v3073_v56 }
 0xef6   : > { %3571 = vpow2.f32 %v3078_v58 }
 0xefd   : > { %v3566_v51 = vpop.eup %3565 }
 0xefe   : > { %2047 = vrot.lane.b32.xlu1 %v3566_v51, %s3869_s19 }
 0xf01   : > { %v3568_v53 = vpop.eup %3567 }
 0xf02   : > { %2187 = vrot.lane.b32.xlu0 %v3568_v53, %s3869_s19  ;;  %2042 = vrot.lane.b32.xlu1 %v1958_v54, %s3867_s20  ;;  %v3570_v59 = vpop.eup %3569 }
 0xf03   : > { %v2037_v62 = vadd.f32 1.0, %v3570_v59  ;;  %v3572_v63 = vpop.eup %3571 }
 0xf04   : > { %v2177_v0 = vadd.f32 1.0, %v3572_v63  ;;  %v3086_v63 = vld [vmem:[%s4115_s5 + $0x8] sm:$0xff] }
 0xf05   : > { %3573 = vrcp.f32 %v2037_v62 }
 0xf06   : > { %2182 = vrot.lane.b32.xlu0 %v2098_v55, %s3867_s20  ;;  %3575 = vrcp.f32 %v2177_v0 }
 0xf12   : > { %v3574_v12 = vpop.eup %3573 }
 0xf13   : > { %v3576_v18 = vpop.eup %3575 }
 0xf70   : > { %v2048_v14 = vpop.permute.xlu1 %2047 }
 0xf71   : > { %v2050_v15 = vmul.f32 %v3574_v12, %v2048_v14 }
 0xf73   : > { %2052 = vrot.lane.b32.xlu1 %v2050_v15, %s3867_s20 }
 0xf74   : > { %v2188_v19 = vpop.permute.xlu0 %2187  ;;  %v2043_v26 = vpop.permute.xlu1 %2042 }
 0xf75   : > { %v2190_v22 = vmul.f32 %v3576_v18, %v2188_v19  ;;  %v2045_v29 = vmul.f32 %v3574_v12, %v2043_v26 }
 0xf77   : > { %2192 = vrot.lane.b32.xlu0 %v2190_v22, %s3867_s20  ;;  %2079 = vperm.xlu1 %3484, %v2077_v21  }
 0xf78   : > { %v2183_v30 = vpop.permute.xlu0 %2182 }
 0xf79   : > { %v2185_v33 = vmul.f32 %v3576_v18, %v2183_v30 }
 0xf7b   : > { %2219 = vperm.xlu0 %3483, %v2217_v28   ;;  %v4606_v28 = vld [vmem:[%s4120_s13 + $0x30] sm:$0xff] }
 0xfe5   : > { %v2053_v31 = vpop.permute.xlu1 %2052 }
 0xfe6   : > { %v2055_v32 = vadd.f32 %v2053_v31, %v2045_v29  ;;  %v4610_v31 = vld [vmem:[%s4125_s29 + $0x8] sm:$0xff] }
 0xfe7   : > { %vm2484_vm13 = vcmp.gt.f32.partialorder %v4610_v31, 0.5 }
 0xfe8   : > { %3577 = vtanh.f32 %v2055_v32 }
 0xfe9   : > { %v2193_v34 = vpop.permute.xlu0 %2192 }
 0xfea   : > { %v2195_v35 = vadd.f32 %v2193_v34, %v2185_v33 }
 0xfec   : > { %3579 = vtanh.f32 %v2195_v35 }
 0xff2   : > { %v2080_v40 = vpop.permute.xlu1 %2079 }
 0xff3   : > { %vm2081_vm11 = vcmp.eq.s32.totalorder %v2080_v40, 1 }
 0xff4   : > { %v2091_v53 = vsel %vm2081_vm11, %v2055_v32, %v2043_v26 }
 0xff5   : > { %v3578_v4 = vpop.eup %3577 }
 0xff6   : > { %2058 = vrot.lane.b32.xlu1 %v3578_v4, %s3869_s19  ;;  %v2220_v41 = vpop.permute.xlu0 %2219  ;;  %v2497_v4 = vsel %vm2484_vm13, 1, %v3868_v25 }
 0xff7   : > { %vm2221_vm12 = vcmp.eq.s32.totalorder %v2220_v41, 1 }
 0xff9   : > { %v3580_v5 = vpop.eup %3579 }
 0xffa   : > { %2198 = vrot.lane.b32.xlu0 %v3580_v5, %s3869_s19  ;;  %2082 = vrot.lane.b32.xlu1 %v4490_v7, %s3870_s14 }
 0xffe   : > { %2222 = vrot.lane.b32.xlu0 %v4501_v9, %s3870_s14  ;;  %v2231_v9 = vsel %vm2221_vm12, %v2195_v35, %v2183_v30 }
0x1068   : > { %v2059_v42 = vpop.permute.xlu1 %2058 }
0x1069   : > { %v4559_v43 = vmul.f32 %v3574_v12, %v2059_v42 }
0x106c   : > { %v2199_v44 = vpop.permute.xlu0 %2198  ;;  %v2083_v45 = vpop.permute.xlu1 %2082 }
0x106d   : > { %v2085_v48 = vsel %vm2081_vm11, %v4559_v43, %v2083_v45  ;;  %v4563_v49 = vmul.f32 %v3576_v18, %v2199_v44 }
0x106e   : > { %2087 = vrot.lane.b32.xlu1 %v2085_v48, %s3867_s20 }
0x1070   : > { %v2223_v51 = vpop.permute.xlu0 %2222 }
0x1071   : > { %v2225_v7 = vsel %vm2221_vm12, %v4563_v49, %v2223_v51 }
0x1072   : > { %2227 = vrot.lane.b32.xlu0 %v2225_v7, %s3867_s20  ;;  %2093 = vrot.lane.b32.xlu1 %v2091_v53, %s3870_s14 }
0x1076   : > { %2233 = vrot.lane.b32.xlu0 %v2231_v9, %s3870_s14 }
0x10e0   : > { %v2088_v54 = vpop.permute.xlu1 %2087 }
0x10e1   : > { %2090 = vst.msk [vmem:[#allocation2] sm:$0xff] %vm562_vm2, %v2088_v54 }
0x10e4   : > { %v2228_v55 = vpop.permute.xlu0 %2227  ;;  %v2094_v56 = vpop.permute.xlu1 %2093 }
0x10e5   : > { %2230 = vst.msk [vmem:[#allocation4] sm:$0xff] %vm562_vm2, %v2228_v55  ;;  %2096 = vst.msk [vmem:[#allocation3] sm:$0xff] %vm562_vm2, %v2094_v56 }
0x10e8   : > { %v2234_v58 = vpop.permute.xlu0 %2233  ;;  %v4572_v59 = vld [vmem:[#allocation2] sm:$0xff] }
0x10e9   : > { %2236 = vst.msk [vmem:[#allocation5] sm:$0xff] %vm562_vm2, %v2234_v58  ;;  %3329 = vmatmul.mubr.msk.f32.vlgmr.msra.gmra.mxu0 %vm562_vm2, %v4572_v59 }
0x10ea   : > { %3343 = vmatpush3.msra.mxu0 %v4495_v8  ;;  %3350 = vmatprep.mubr.msk.f32.mxu0 %vm3866_vm1, %v3865_v6  ;;  %v3081_v8 = vld [vmem:[%s4110_s15 + $0x30] sm:$0xff] }
0x10eb   : > { %3344 = vmatprep.subr.mxu0 %v3865_v6 }
0x10ec   : > { %v4581_v62 = vld [vmem:[#allocation4] sm:$0xff]  ;;  %3345 = vmatpush3.msra.mxu0 %v4503_v11 }
0x10ed   : > { %3340 = vmatmul.mubr.msk.f32.vlgmr.msra.gmra.mxu1 %vm562_vm2, %v4581_v62  ;;  %3346 = vmatprep.subr.mxu0 %v3865_v6 }
0x10ee   : > { %3347 = vmatpush3.msra.mxu0 %v4509_v36  ;;  %3354 = vmatpush3.msra.mxu1 %v4512_v37 }
0x10ef   : > { %3348 = vmatprep.subr.mxu0 %v3865_v6  ;;  %3355 = vmatprep.subr.mxu1 %v3865_v6 }
0x10f0   : > { %3356 = vmatpush3.msra.mxu1 %v4517_v38  ;;  %3349 = vmatpush3.msra.mxu0 %v4520_v10 }
0x10f1   : > { %3357 = vmatprep.subr.mxu1 %v3865_v6  ;;  %3361 = vmatprep.mubr.msk.f32.mxu1 %vm3866_vm1, %v3865_v6  ;;  %vm2344_vm1 = vcmp.gt.f32.partialorder %v4606_v28, 0.5 }
0x10f2   : > { %3358 = vmatpush3.msra.mxu1 %v4526_v39  ;;  %v2238_v39 = vld [vmem:[#allocation3] sm:$0xff]  ;;  %v2357_v34 = vsel %vm2344_vm1, 1, %v3868_v25 }
0x10f3   : > { %3359 = vmatprep.subr.mxu1 %v3865_v6  ;;  %v2378_v6 = vld [vmem:[#allocation5] sm:$0xff] }
0x10f4   : > { %3360 = vmatpush3.msra.mxu1 %v4531_v13 }
0x11a9   : > { %v2310_v11 = vpop.f32.mrf.mxu0 }
0x11aa   : > { %v2311_v36 = vadd.f32 %v3081_v8, %v2310_v11 }
0x11ab   : > { %v3330_v37 = vpop.f32.mrf.mxu0 }
0x11ac   : > { %3581 = vtanh.f32 %v2311_v36  ;;  %v3083_v13 = vmul.f32 -1.442695, %v2311_v36 }
0x11ad   : > { %v2450_v38 = vpop.f32.mrf.mxu1 }
0x11ae   : > { %v2451_v0 = vadd.f32 %v3086_v63, %v2450_v38 }
0x11af   : > { %v3341_v10 = vpop.f32.mrf.mxu1 }
0x11b0   : > { %3583 = vtanh.f32 %v2451_v0  ;;  %v3088_v15 = vmul.f32 -1.442695, %v2451_v0 }
0x11b1   : > { %3585 = vpow2.f32 %v3083_v13 }
0x11b2   : > { %3587 = vpow2.f32 %v3088_v15 }
0x11b9   : > { %v3582_v12 = vpop.eup %3581 }
0x11ba   : > { %2327 = vrot.lane.b32.xlu1 %v3582_v12, %s3869_s19 }
0x11bd   : > { %v3584_v14 = vpop.eup %3583 }
0x11be   : > { %2467 = vrot.lane.b32.xlu0 %v3584_v14, %s3869_s19  ;;  %2322 = vrot.lane.b32.xlu1 %v2238_v39, %s3867_s20  ;;  %v3586_v18 = vpop.eup %3585 }
0x11bf   : > { %v2317_v19 = vadd.f32 1.0, %v3586_v18  ;;  %v3588_v21 = vpop.eup %3587 }
0x11c0   : > { %v2457_v22 = vadd.f32 1.0, %v3588_v21 }
0x11c1   : > { %3589 = vrcp.f32 %v2317_v19  ;;  %v2659_v19 = vld [vmem:[%s4115_s5] sm:$0xff]  ;;  %s2813_s5 = sshll.u32 %s4127_s23, 4  ;;  %s4776_s5 = int_to_ptr.vmem [resolvable:$true] %s2813_s5 }
0x11c2   : > { %2462 = vrot.lane.b32.xlu0 %v2378_v6, %s3867_s20  ;;  %3591 = vrcp.f32 %v2457_v22  ;;  %v3091_v6 = vld [vmem:[%s4110_s15 + $0x38] sm:$0xff] }
0x11ce   : > { %v3590_v26 = vpop.eup %3589 }
0x11cf   : > { %v3592_v32 = vpop.eup %3591 }
0x122c   : > { %v2328_v29 = vpop.permute.xlu1 %2327 }
0x122d   : > { %v2330_v30 = vmul.f32 %v3590_v26, %v2328_v29 }
0x122f   : > { %2332 = vrot.lane.b32.xlu1 %v2330_v30, %s3867_s20 }
0x1230   : > { %v2468_v33 = vpop.permute.xlu0 %2467  ;;  %v2323_v5 = vpop.permute.xlu1 %2322 }
0x1231   : > { %v2470_v35 = vmul.f32 %v3592_v32, %v2468_v33  ;;  %v2325_v40 = vmul.f32 %v3590_v26, %v2323_v5 }
0x1233   : > { %2472 = vrot.lane.b32.xlu0 %v2470_v35, %s3867_s20  ;;  %2359 = vperm.xlu1 %3484, %v2357_v34  }
0x1234   : > { %v2463_v41 = vpop.permute.xlu0 %2462 }
0x1235   : > { %v2465_v45 = vmul.f32 %v3592_v32, %v2463_v41 }
0x1237   : > { %2499 = vperm.xlu0 %3483, %v2497_v4  }
0x12a1   : > { %v2333_v42 = vpop.permute.xlu1 %2332 }
0x12a2   : > { %v2335_v44 = vadd.f32 %v2333_v42, %v2325_v40 }
0x12a4   : > { %3593 = vtanh.f32 %v2335_v44 }
0x12a5   : > { %v2473_v48 = vpop.permute.xlu0 %2472 }
0x12a6   : > { %v2475_v51 = vadd.f32 %v2473_v48, %v2465_v45 }
0x12a8   : > { %3595 = vtanh.f32 %v2475_v51 }
0x12ae   : > { %v2360_v9 = vpop.permute.xlu1 %2359 }
0x12af   : > { %vm2361_vm14 = vcmp.eq.s32.totalorder %v2360_v9, 1  ;;  %v3622_v9 = vld [vmem:[%s4125_s29 + $0x38] sm:$0xff] }
0x12b1   : > { %v3594_v7 = vpop.eup %3593 }
0x12b2   : > { %2338 = vrot.lane.b32.xlu1 %v3594_v7, %s3869_s19  ;;  %v2500_v54 = vpop.permute.xlu0 %2499 }
0x12b3   : > { %vm2501_vm15 = vcmp.eq.s32.totalorder %v2500_v54, 1  ;;  %v3623_v54 = vld [vmem:[%s4120_s13 + $0x8] sm:$0xff] }
0x12b5   : > { %v3596_v53 = vpop.eup %3595 }
0x12b6   : > { %2478 = vrot.lane.b32.xlu0 %v3596_v53, %s3869_s19  ;;  %2362 = vrot.lane.b32.xlu1 %v4572_v59, %s3870_s14  ;;  %v2371_v59 = vsel %vm2361_vm14, %v2335_v44, %v2323_v5  ;;  %v3621_v53 = vld [vmem:[%s4120_s13] sm:$0xff] }
0x12ba   : > { %2502 = vrot.lane.b32.xlu0 %v4581_v62, %s3870_s14  ;;  %v2511_v62 = vsel %vm2501_vm15, %v2475_v51, %v2463_v41 }
0x1324   : > { %v2339_v55 = vpop.permute.xlu1 %2338 }
0x1325   : > { %v4623_v56 = vmul.f32 %v3590_v26, %v2339_v55  ;;  %v3624_v55 = vld [vmem:[%s4125_s29 + $0x30] sm:$0xff] }
0x1328   : > { %v2479_v58 = vpop.permute.xlu0 %2478  ;;  %v2363_v8 = vpop.permute.xlu1 %2362 }
0x1329   : > { %v2365_v11 = vsel %vm2361_vm14, %v4623_v56, %v2363_v8  ;;  %v4627_v36 = vmul.f32 %v3592_v32, %v2479_v58  ;;  %v3625_v58 = vld [vmem:[%s4120_s13 + $0x10] sm:$0xff]  ;;  %v3626_v8 = vld [vmem:[%s4125_s29 + $0x28] sm:$0xff] }
0x132a   : > { %2367 = vrot.lane.b32.xlu1 %v2365_v11, %s3867_s20  ;;  %v3094_v11 = vld [vmem:[%s4120_s13 + $0x38] sm:$0xff]  ;;  %s3106_s13 = sshll.u32 %s3971_s24, 10 }
0x132b   : > { %vm2624_vm0 = vcmp.gt.f32.partialorder %v3094_v11, 0.5  ;;  %s4774_s24 = scalar_lea.hbm %s4876_s10, %s3106_s13 }
0x132c   : > { %v2503_v37 = vpop.permute.xlu0 %2502 }
0x132d   : > { %v2505_v63 = vsel %vm2501_vm15, %v4627_v36, %v2503_v37  ;;  %v2761_v37 = vld [vmem:[%s4125_s29] sm:$0xff] }
0x132e   : > { %2507 = vrot.lane.b32.xlu0 %v2505_v63, %s3867_s20  ;;  %2373 = vrot.lane.b32.xlu1 %v2371_v59, %s3870_s14  ;;  %vm2762_vm3 = vcmp.gt.f32.partialorder %v2761_v37, 0.5 }
0x1332   : > { %2513 = vrot.lane.b32.xlu0 %v2511_v62, %s3870_s14 }
0x139c   : > { %v2368_v38 = vpop.permute.xlu1 %2367 }
0x139d   : > { %2370 = vst.msk [vmem:[#allocation2] sm:$0xff] %vm562_vm2, %v2368_v38 }
0x13a0   : > { %v2508_v0 = vpop.permute.xlu0 %2507  ;;  %v2374_v10 = vpop.permute.xlu1 %2373 }
0x13a1   : > { %2510 = vst.msk [vmem:[#allocation4] sm:$0xff] %vm562_vm2, %v2508_v0  ;;  %2376 = vst.msk [vmem:[#allocation3] sm:$0xff] %vm562_vm2, %v2374_v10 }
0x13a4   : > { %v2514_v12 = vpop.permute.xlu0 %2513  ;;  %v4636_v14 = vld [vmem:[#allocation2] sm:$0xff] }
0x13a5   : > { %2516 = vst.msk [vmem:[#allocation5] sm:$0xff] %vm562_vm2, %v2514_v12  ;;  %3351 = vmatmul.mubr.msk.f32.vlgmr.msra.gmra.mxu0 %vm562_vm2, %v4636_v14 }
0x13a8   : > { %v4641_v39 = vld [vmem:[#allocation4] sm:$0xff]  ;;  %v2518_v32 = vld [vmem:[#allocation3] sm:$0xff] }
0x13a9   : > { %3362 = vmatmul.mubr.msk.f32.vlgmr.msra.gmra.mxu1 %vm562_vm2, %v4641_v39 }
0x13ac   : > { %v2658_v33 = vld [vmem:[#allocation5] sm:$0xff] }
0x1465   : > { %v2590_v13 = vpop.f32.mrf.mxu0 }
0x1466   : > { %v2591_v15 = vadd.f32 %v3091_v6, %v2590_v13 }
0x1467   : > { %v3352_v18 = vpop.f32.mrf.mxu0 }
0x1468   : > { %3597 = vtanh.f32 %v2591_v15  ;;  %v3093_v34 = vmul.f32 -1.442695, %v2591_v15 }
0x1469   : > { %v2729_v21 = vpop.f32.mrf.mxu1 }
0x146a   : > { %v2730_v22 = vadd.f32 %v2729_v21, %v2659_v19 }
0x146b   : > { %v3363_v26 = vpop.f32.mrf.mxu1 }
0x146c   : > { %3599 = vtanh.f32 %v2730_v22  ;;  %v3097_v35 = vmul.f32 -1.442695, %v2730_v22 }
0x146d   : > { %3601 = vpow2.f32 %v3093_v34 }
0x146e   : > { %3603 = vpow2.f32 %v3097_v35 }
0x1475   : > { %v3598_v29 = vpop.eup %3597 }
0x1476   : > { %2607 = vrot.lane.b32.xlu1 %v3598_v29, %s3869_s19 }
0x1479   : > { %v3600_v30 = vpop.eup %3599 }
0x147a   : > { %2746 = vrot.lane.b32.xlu0 %v3600_v30, %s3869_s19  ;;  %2602 = vrot.lane.b32.xlu1 %v2518_v32, %s3867_s20  ;;  %v3602_v4 = vpop.eup %3601 }
0x147b   : > { %v2597_v5 = vadd.f32 1.0, %v3602_v4  ;;  %v3604_v40 = vpop.eup %3603 }
0x147c   : > { %v2736_v41 = vadd.f32 1.0, %v3604_v40 }
0x147d   : > { %3605 = vrcp.f32 %v2597_v5 }
0x147e   : > { %2741 = vrot.lane.b32.xlu0 %v2658_v33, %s3867_s20  ;;  %3607 = vrcp.f32 %v2736_v41 }
0x148a   : > { %v4651_v42 = vpop.eup %3605 }
0x148b   : > { %v4655_v48 = vpop.eup %3607 }
0x14e8   : > { %v2608_v44 = vpop.permute.xlu1 %2607 }
0x14e9   : > { %v2610_v45 = vmul.f32 %v4651_v42, %v2608_v44 }
0x14eb   : > { %2612 = vrot.lane.b32.xlu1 %v2610_v45, %s3867_s20 }
0x14ec   : > { %v2747_v51 = vpop.permute.xlu0 %2746 }
0x14ed   : > { %v2749_v7 = vmul.f32 %v4655_v48, %v2747_v51 }
0x14ef   : > { %2751 = vrot.lane.b32.xlu0 %v2749_v7, %s3867_s20  ;;  %668 = vperm.xlu1 %3484, %v3621_v53  }
0x14f3   : > { %807 = vperm.xlu0 %3483, %v3622_v9   ;;  %947 = vperm.xlu1 %3484, %v3623_v54  }
0x14f7   : > { %1087 = vperm.xlu0 %3483, %v3624_v55   ;;  %1227 = vperm.xlu1 %3484, %v3625_v58  }
0x14fb   : > { %1367 = vperm.xlu0 %3483, %v3626_v8   ;;  %1507 = vperm.xlu1 %3484, %v4394_v46   ;;  %v2637_v46 = vsel %vm2624_vm0, 1, %v3868_v25 }
0x14ff   : > { %1647 = vperm.xlu0 %3483, %v4398_v50   ;;  %1787 = vperm.xlu1 %3484, %v4460_v47   ;;  %v2774_v50 = vsel %vm2762_vm3, 1, %v3868_v25  ;;  %v2603_v47 = vpop.permute.xlu1 %2602 }
0x1503   : > { %1927 = vperm.xlu0 %3483, %v4464_v52   ;;  %2067 = vperm.xlu1 %3484, %v4542_v2   ;;  %v2605_v52 = vmul.f32 %v4651_v42, %v2603_v47  ;;  %v4678_v2 = vpop.permute.xlu0 %2741 }
0x1507   : > { %2207 = vperm.xlu0 %3483, %v4546_v17   ;;  %2347 = vperm.xlu1 %3484, %v4606_v28  }
0x150b   : > { %2487 = vperm.xlu0 %3483, %v4610_v31   ;;  %2627 = vperm.xlu1 %3484, %v3094_v11   ;;  %v2744_v31 = vmul.f32 %v4655_v48, %v4678_v2 }
0x150f   : > { %2765 = vperm.xlu0 %3483, %v2761_v37   ;;  %2639 = vperm.xlu1 %3484, %v2637_v46  }
0x1513   : > { %2776 = vperm.xlu0 %3483, %v2774_v50  }
0x155d   : > { %v2613_v17 = vpop.permute.xlu1 %2612 }
0x155e   : > { %v2615_v28 = vadd.f32 %v2613_v17, %v2605_v52 }
0x1560   : > { %3609 = vtanh.f32 %v2615_v28 }
0x1561   : > { %v2752_v59 = vpop.permute.xlu0 %2751 }
0x1562   : > { %v4682_v63 = vadd.f32 %v2752_v59, %v2744_v31 }
0x1564   : > { %3611 = vtanh.f32 %v4682_v63 }
0x156a   : > { %v669_v62 = vpop.permute.xlu1 %668 }
0x156b   : > { %v671_v13 = vmul.f32 %v669_v62, %v4225_v57 }
0x156d   : > { %v3610_v38 = vpop.eup %3609 }
0x156e   : > { %v808_v25 = vpop.permute.xlu0 %807  ;;  %v948_v0 = vpop.permute.xlu1 %947  ;;  %2618 = vrot.lane.b32.xlu1 %v3610_v38, %s3869_s19 }
0x156f   : > { %v810_v19 = vmul.f32 %v808_v25, %v4229_v61  ;;  %v950_v21 = vmul.f32 %v948_v0, %v4285_v60 }
0x1571   : > { %v3612_v10 = vpop.eup %3611 }
0x1572   : > { %2757 = vrot.lane.b32.xlu0 %v3612_v10, %s3869_s19  ;;  %v1088_v12 = vpop.permute.xlu0 %1087  ;;  %v1228_v6 = vpop.permute.xlu1 %1227  ;;  %2642 = vrot.lane.b32.xlu1 %v4636_v14, %s3870_s14 }
0x1573   : > { %v1090_v14 = vmul.f32 %v1088_v12, %v4289_v1  ;;  %v1230_v57 = vmul.f32 %v1228_v6, %v4345_v3 }
0x1576   : > { %2779 = vrot.lane.b32.xlu0 %v4641_v39, %s3870_s14  ;;  %v1368_v15 = vpop.permute.xlu0 %1367  ;;  %v1508_v18 = vpop.permute.xlu1 %1507  ;;  %673 = vrot.lane.b32.xlu1 %v671_v13, %s3867_s20 }
0x1577   : > { %v1370_v29 = vmul.f32 %v1368_v15, %v4349_v16  ;;  %v1510_v61 = vmul.f32 %v1508_v18, %v4411_v20 }
0x157a   : > { %812 = vrot.lane.b32.xlu0 %v810_v19, %s3867_s20  ;;  %v1788_v22 = vpop.permute.xlu1 %1787  ;;  %952 = vrot.lane.b32.xlu1 %v950_v21, %s3867_s20  ;;  %v1648_v26 = vpop.permute.xlu0 %1647 }
0x157b   : > { %v1650_v32 = vmul.f32 %v1648_v26, %v4415_v24  ;;  %v1790_v1 = vmul.f32 %v1788_v22, %v4477_v23 }
0x157e   : > { %1092 = vrot.lane.b32.xlu0 %v1090_v14, %s3867_s20  ;;  %v2068_v39 = vpop.permute.xlu1 %2067  ;;  %1232 = vrot.lane.b32.xlu1 %v1230_v57, %s3867_s20  ;;  %v1928_v60 = vpop.permute.xlu0 %1927 }
0x157f   : > { %v1930_v33 = vmul.f32 %v1928_v60, %v4481_v27  ;;  %v2070_v16 = vmul.f32 %v2068_v39, %v4559_v43 }
0x1582   : > { %1372 = vrot.lane.b32.xlu0 %v1370_v29, %s3867_s20  ;;  %1512 = vrot.lane.b32.xlu1 %v1510_v61, %s3867_s20  ;;  %v2348_v30 = vpop.permute.xlu1 %2347  ;;  %v2208_v3 = vpop.permute.xlu0 %2207 }
0x1583   : > { %v2210_v34 = vmul.f32 %v2208_v3, %v4563_v49  ;;  %v2350_v24 = vmul.f32 %v2348_v30, %v4623_v56 }
0x1586   : > { %1652 = vrot.lane.b32.xlu0 %v1650_v32, %s3867_s20  ;;  %1792 = vrot.lane.b32.xlu1 %v1790_v1, %s3867_s20  ;;  %v2628_v20 = vpop.permute.xlu1 %2627  ;;  %v2488_v35 = vpop.permute.xlu0 %2487 }
0x1587   : > { %v2490_v4 = vmul.f32 %v2488_v35, %v4627_v36 }
0x158a   : > { %1932 = vrot.lane.b32.xlu0 %v1930_v33, %s3867_s20  ;;  %2072 = vrot.lane.b32.xlu1 %v2070_v16, %s3867_s20  ;;  %v2640_v23 = vpop.permute.xlu1 %2639  ;;  %v2766_v43 = vpop.permute.xlu0 %2765 }
0x158b   : > { %vm2641_vm4 = vcmp.eq.s32.totalorder %v2640_v23, 1 }
0x158c   : > { %v2651_v27 = vsel %vm2641_vm4, %v2615_v28, %v2603_v47 }
0x158e   : > { %2212 = vrot.lane.b32.xlu0 %v2210_v34, %s3867_s20  ;;  %2352 = vrot.lane.b32.xlu1 %v2350_v24, %s3867_s20  ;;  %v2777_v5 = vpop.permute.xlu0 %2776 }
0x158f   : > { %vm2778_vm5 = vcmp.eq.s32.totalorder %v2777_v5, 1 }
0x1592   : > { %2492 = vrot.lane.b32.xlu0 %v2490_v4, %s3867_s20 }
0x1596   : > { %2653 = vrot.lane.b32.xlu0 %v2651_v27, %s3870_s14 }
0x15e0   : > { %v2619_v49 = vpop.permute.xlu1 %2618 }
0x15e1   : > { %v2621_v56 = vmul.f32 %v4651_v42, %v2619_v49  ;;  %v2788_v42 = vsel %vm2778_vm5, %v4682_v63, %v4678_v2 }
0x15e3   : > { %v2630_v51 = vmul.f32 %v2628_v20, %v2621_v56 }
0x15e4   : > { %v2758_v40 = vpop.permute.xlu0 %2757  ;;  %v2643_v41 = vpop.permute.xlu1 %2642 }
0x15e5   : > { %v2760_v44 = vmul.f32 %v4655_v48, %v2758_v40  ;;  %v2645_v45 = vsel %vm2641_vm4, %v2621_v56, %v2643_v41 }
0x15e6   : > { %2647 = vrot.lane.b32.xlu1 %v2645_v45, %s3867_s20 }
0x15e7   : > { %v2768_v36 = vmul.f32 %v2766_v43, %v2760_v44 }
0x15e8   : > { %v2780_v7 = vpop.permute.xlu0 %2779  ;;  %v674_v53 = vpop.permute.xlu1 %673 }
0x15e9   : > { %676 = vst.msk [vmem:[%s4127_s23] sm:$0xff] %vm562_vm2, %v674_v53  ;;  %2770 = vrot.lane.b32.xlu0 %v2768_v36, %s3867_s20  ;;  %v2782_v54 = vsel %vm2778_vm5, %v2760_v44, %v2780_v7 }
0x15ea   : > { %2632 = vrot.lane.b32.xlu1 %v2630_v51, %s3867_s20 }
0x15ec   : > { %v813_v48 = vpop.permute.xlu0 %812  ;;  %v953_v9 = vpop.permute.xlu1 %952 }
0x15ed   : > { %3030 = vst.msk [vmem:[%s4129_s22 + $0x38] sm:$0xff] %vm562_vm2, %v813_v48  ;;  %3035 = vst.msk [vmem:[%s4127_s23 + $0x8] sm:$0xff] %vm562_vm2, %v953_v9  ;;  %2790 = vrot.lane.b32.xlu0 %v2788_v42, %s3870_s14 }
0x15ee   : > { %2784 = vrot.lane.b32.xlu1 %v2782_v54, %s3867_s20  ;;  %s3871_s20 = smov [#allocation15]  }
0x15ef   : > { %s3735_s19 = sshll.u32 %s3871_s20, 4  ;;  %s3736_s19 = int_to_ptr.vmem [resolvable:$false] %s3735_s19 }
0x15f0   : > { %v1093_v55 = vpop.permute.xlu0 %1092  ;;  %v1233_v58 = vpop.permute.xlu1 %1232  ;;  %s3737_s14 = scalar_lea.vmem %s3736_s19, 2048  ;;  %p3738_p12 = scmp.lt.s32.totalorder %s4769_s25, %s3736_s19 }
0x15f1   : > { %3040 = vst.msk [vmem:[%s4129_s22 + $0x30] sm:$0xff] %vm562_vm2, %v1093_v55  ;;  %3045 = vst.msk [vmem:[%s4127_s23 + $0x10] sm:$0xff] %vm562_vm2, %v1233_v58  ;;  %p3739_p1 = scmp.lt.s32.totalorder %s3737_s14, %s3731_s7 }
0x15f3   : > { %p3740_p7 = por %p3739_p1, %p3738_p12 }
0x15f4   : > { %v1373_v8 = vpop.permute.xlu0 %1372  ;;  %v1513_v11 = vpop.permute.xlu1 %1512 }
0x15f5   : > { %3050 = vst.msk [vmem:[%s4129_s22 + $0x28] sm:$0xff] %vm562_vm2, %v1373_v8  ;;  %3055 = vst.msk [vmem:[%s4127_s23 + $0x18] sm:$0xff] %vm562_vm2, %v1513_v11  ;;  %p3741_p5 = pnand %p3740_p7, %p3734_p6 }
0x15f8   : > { %v1653_v37 = vpop.permute.xlu0 %1652  ;;  %v1793_v46 = vpop.permute.xlu1 %1792 }
0x15f9   : > { %3060 = vst.msk [vmem:[%s4129_s22 + $0x20] sm:$0xff] %vm562_vm2, %v1653_v37  ;;  %3065 = vst.msk [vmem:[%s4127_s23 + $0x20] sm:$0xff] %vm562_vm2, %v1793_v46 }
0x15fc   : > { %v1933_v50 = vpop.permute.xlu0 %1932  ;;  %v2073_v47 = vpop.permute.xlu1 %2072 }
0x15fd   : > { %3070 = vst.msk [vmem:[%s4129_s22 + $0x18] sm:$0xff] %vm562_vm2, %v1933_v50  ;;  %3075 = vst.msk [vmem:[%s4127_s23 + $0x28] sm:$0xff] %vm562_vm2, %v2073_v47 }
0x1600   : > { %v2213_v52 = vpop.permute.xlu0 %2212  ;;  %v2353_v2 = vpop.permute.xlu1 %2352 }
0x1601   : > { %3080 = vst.msk [vmem:[%s4129_s22 + $0x10] sm:$0xff] %vm562_vm2, %v2213_v52  ;;  %3085 = vst.msk [vmem:[%s4127_s23 + $0x30] sm:$0xff] %vm562_vm2, %v2353_v2 }
0x1604   : > { %v2493_v17 = vpop.permute.xlu0 %2492 }
0x1605   : > { %3090 = vst.msk [vmem:[%s4129_s22 + $0x8] sm:$0xff] %vm562_vm2, %v2493_v17 }
0x1608   : > { %v2654_v28 = vpop.permute.xlu0 %2653 }
0x1609   : > { %2656 = vst.msk [vmem:[#allocation3] sm:$0xff] %vm562_vm2, %v2654_v28 }
0x1658   : > { %v2648_v31 = vpop.permute.xlu1 %2647 }
0x1659   : > { %2650 = vst.msk [vmem:[#allocation2] sm:$0xff] %vm562_vm2, %v2648_v31 }
0x165b   : > { %v2771_v59 = vpop.permute.xlu0 %2770 }
0x165c   : > { %2773 = vst.msk [vmem:[%s4129_s22] sm:$0xff] %vm562_vm2, %v2771_v59  ;;  %v2633_v63 = vpop.permute.xlu1 %2632 }
0x165d   : > { %3095 = vst.msk [vmem:[%s4127_s23 + $0x38] sm:$0xff] %vm562_vm2, %v2633_v63 }
0x165e   : > { %3744 = shalt.err (!%p3741_p5)
}
0x165f   : > { %s3745_s23 = scalar_lea.hbm %s4767_s26, 1024  ;;  %s3749_s16 = scalar_lea.hbm %s4877_s11, 2048 }
0x1660   : > { %p3746_p11 = scmp.ne.s32.totalorder %s4767_s26, %s3745_s23  ;;  %p3750_p10 = scmp.lt.s32.totalorder %s4767_s26, %s4877_s11 }
0x1661   : > { %p3751_p13 = scmp.lt.s32.totalorder %s3749_s16, %s3745_s23 }
0x1662   : > { %p3747_p3 = pnand %p3746_p11, %p4929_p9 }
0x1663   : > { %p3752_p2 = por %p3751_p13, %p3750_p10 }
0x1664   : > { %p3748_p4 = pneg %p3747_p3 }
0x1666   : > { %p3753_p8 = pnand %p3752_p2, %p3748_p4 }
0x1668   : > { %3756 = shalt.err (!%p3753_p8)
}
0x1669   : > { %s3872_s15 = smov 128   ;;  %s3873_s29 = smov 8  }
0x166a   : > { %3381 = dma.vmem_to_hbm [thread:$0]  (%p4929_p9), %s4769_s25, 1024, %s4767_s26, %s4784_s17, %s3872_s15, %s3872_s15, %s3873_s29  }
0x166b   : > { %s4930_s8 = sand.u32 1, %s3849_s21   ;;  %s3757_s7 = scalar_lea.vmem %s4776_s5, 1024 }
0x166c   : > { %s2795_s9 = scalar_lea.sflag [#allocation8], %s4930_s8  ;;  %p3758_p0 = scmp.ne.s32.totalorder %s4776_s5, %s3757_s7 }
0x166d   : > { %p4931_p6 = scmp.ne.s32.totalorder %s4906_s12, 0  ;;  %s3874_s20 = smov [#allocation14]  }
0x166e   : > { %s3761_s19 = sshll.u32 %s3874_s20, 4  ;;  %s3762_s19 = int_to_ptr.vmem [resolvable:$false] %s3761_s19 }
0x166f   : > { %p3759_p12 = pnand %p3758_p0, %p4931_p6  ;;  %s3763_s14 = scalar_lea.vmem %s3762_s19, 2048 }
0x1670   : > { %p3764_p7 = scmp.lt.s32.totalorder %s4776_s5, %s3762_s19  ;;  %p3765_p5 = scmp.lt.s32.totalorder %s3763_s14, %s3757_s7 }
0x1671   : > { %p3760_p1 = pneg %p3759_p12 }
0x1672   : > { %p3766_p11 = por %p3765_p5, %p3764_p7 }
0x1674   : > { %p3767_p3 = pnand %p3766_p11, %p3760_p1 }
0x1676   : > { %3770 = shalt.err (!%p3767_p3)
}
0x1677   : > { %s3771_s28 = scalar_lea.hbm %s4774_s24, 1024  ;;  %s3775_s17 = scalar_lea.hbm %s4876_s10, 2048 }
0x1678   : > { %p3772_p9 = scmp.ne.s32.totalorder %s4774_s24, %s3771_s28  ;;  %p3776_p13 = scmp.lt.s32.totalorder %s4774_s24, %s4876_s10 }
0x1679   : > { %p3777_p2 = scmp.lt.s32.totalorder %s3775_s17, %s3771_s28 }
0x167a   : > { %p3773_p4 = pnand %p3772_p9, %p4931_p6 }
0x167b   : > { %p3778_p8 = por %p3777_p2, %p3776_p13 }
0x167c   : > { %p3774_p10 = pneg %p3773_p4 }
0x167e   : > { %p3779_p0 = pnand %p3778_p8, %p3774_p10 }
0x1680   : > { %3782 = shalt.err (!%p3779_p0)
}
0x1681   : > { %3380 = dma.vmem_to_hbm [thread:$0]  (%p4931_p6), %s4776_s5, 1024, %s4774_s24, %s2795_s9, %s3872_s15, %s3872_s15, %s3873_s29   ;;  %v2791_v62 = vpop.permute.xlu0 %2790  ;;  %v2785_v38 = vpop.permute.xlu1 %2784 }
0x1682   : > { %2793 = vst.msk [vmem:[#allocation5] sm:$0xff] %vm562_vm2, %v2791_v62  ;;  %2787 = vst.msk [vmem:[#allocation4] sm:$0xff] %vm562_vm2, %v2785_v38 }
0x1683 PF: > { %s4932_s13 = sld [smem:[#allocation26_spill]] }
0x1684   : > { %s4933_s16 = sld [smem:[#allocation24_spill]] }
0x1685   : > { %s4934_s30 = sld [smem:[#allocation29_spill]] }
0x1689   : > { %p3412_p12 = scmp.ge.s32.totalorder %s4932_s13, 2 }
0x168a   : > { %s2845_s27 = sand.u32 1, %s4933_s16  }
0x168b   : > { %p4935_p1 = scmp.ne.s32.totalorder %s4934_s30, 0  ;;  %s2846_s12 = scalar_lea.sflag [#allocation8], %s2845_s27 }
0x168d   : > { %p3398_p7 = pnand %p3412_p12, %p4935_p1 }
0x168f   : > { %p3399_p5 = pneg %p3398_p7 }
0x1691   : > { %3824 = dma.done.wait (%p3399_p5), %s2846_s12, 1024  }
0x1692   : > { %3826 = vsyncadd (%p3399_p5), %s2846_s12, 4294966272  ;;  %s4936_s8 = sld [smem:[#allocation22_spill]] }
0x1693   : > { %s4937_s5 = sld [smem:[#allocation31_spill]] }
0x1698   : > { %s2854_s24 = sand.u32 1, %s4936_s8  }
0x1699   : > { %p4938_p6 = scmp.ne.s32.totalorder %s4937_s5, 0  ;;  %s2855_s15 = scalar_lea.sflag [#allocation16], %s2854_s24 }
0x169b   : > { %p3401_p11 = pnand %p3412_p12, %p4938_p6 }
0x169d   : > { %p3402_p3 = pneg %p3401_p11 }
0x169f   : > { %3828 = dma.done.wait (%p3402_p3), %s2855_s15, 1024  }
0x16a0   : > { %3830 = vsyncadd (%p3402_p3), %s2855_s15, 4294966272  ;;  %s4939_s23 = sld [smem:[#allocation27_spill]]  ;;  %s4944_s17 = smov %s3837_s18 }
0x16a1   : > { %s4940_s29 = sld [smem:[#allocation23_spill]]  ;;  %s4946_s20 = smov %s3849_s21 }
0x16a2   : > { %s4941_s19 = sld [smem:[#allocation30_spill]] }
0x16a3   : > { %s4942_s9 = sld [smem:[#allocation25_spill]] }
0x16a4   : > { %s4943_s22 = sld [smem:[#allocation28_spill]] }
0x16a6   : > { %p28_p9 = scmp.ge.s32.totalorder %s4939_s23, 4  }
0x16a7   : > { %s4945_s18 = smov %s4940_s29 }
0x16a8   :  { %30 = sbr.rel (!%p28_p9) target bundleno = 15 (0xf), region = 184 }
0x16a9   : > { %s4947_s21 = smov %s4942_s9 }
0x16ad   :  { %2860 = vsyncpa [#allocation7], 1 }
0x16ae   :  { %2862 = vsyncpa [#allocation7 + $0x1], 1 }
0x16af   :  { %2863 = vsyncpa [#allocation10], 1 }
0x16b0   :  { %2864 = vsyncpa [#allocation13], 1 }
0x16b1   :  { %2865 = vsyncpa [#allocation8], 1 }
0x16b2   :  { %2867 = vsyncpa [#allocation8 + $0x1], 1 }
0x16b3   :  { %2868 = vsyncpa [#allocation16], 1 }
0x16b4   :  { %2870 = vsyncpa [#allocation16 + $0x1], 1 }

</bundles_post_ra>
